<compile_context>
chip_gen: v6e
topology: v6e:2x2x1
jax: 0.10.0
libtpu: 0.0.40
codegen_flags: <defaults>
</compile_context>

<pallas_src>
import functools

import jax
import jax.numpy as jnp
from jax import lax
from jax.experimental import pallas as pl
from jax.experimental.pallas import tpu as pltpu

KS = 7
PAD = KS // 2


def _vmem_budget_bytes():
    """Scoped-VMEM budget per TPU generation, with headroom for Mosaic scratch."""
    cap = 64 * 1024 * 1024          # conservative default (v7x-sized)
    try:
        cap = int(pltpu.get_tpu_info().vmem_capacity_bytes)
    except Exception:
        pass
    return (cap * 3) // 4           # ~96 MiB on v5e/v6e, ~48 MiB on v7x


def _conv7x7_sigmoid(mx, av, w_ref, col, H, W):
    """sigmoid(7x7 zero-padded conv([max, mean])) in the flattened (1, H*W) layout.

    mx, av : (1, H*W) float32 channel-max / channel-mean maps.
    w_ref  : (2, 49) float32 VMEM ref, rows = [max-weights, mean-weights].
    col    : (1, H*W) int32 column index (p % W) of every flattened position.
    Returns a (1, H*W) float32 attention map.
    """
    HW = H * W
    pos = lax.broadcasted_iota(jnp.int32, (1, HW), 1)

    # Validity masks for the zero-padded conv, built once per offset.
    col_ok = {}
    for kw in range(KS):
        dw = kw - PAD
        col_ok[dw] = jnp.logical_and(col + dw >= 0, col + dw < W)
    row_ok = {}
    for kh in range(KS):
        dh = kh - PAD
        row_ok[dh] = jnp.logical_and(pos >= max(0, -dh) * W,
                                     pos < (H - max(0, dh)) * W)

    # Stack both maps on the sublane axis: ONE roll per tap shifts both.
    st = jnp.concatenate([mx, av], axis=0)                     # (2, HW)
    acc = jnp.zeros((2, HW), jnp.float32)
    for kh in range(KS):
        dh = kh - PAD
        for kw in range(KS):
            dw = kw - PAD
            s = dh * W + dw                                     # flattened shift
            r = st if s == 0 else pltpu.roll(st, shift=(-s) % HW, axis=1)
            t = kh * KS + kw
            wcol = w_ref[:, t:t + 1]                            # (2, 1)
            mask = jnp.logical_and(row_ok[dh], col_ok[dw])      # (1, HW)
            acc = acc + jnp.where(mask, r * wcol, 0.0)
    conv = jnp.sum(acc, axis=0, keepdims=True)                  # (1, HW)
    return jax.nn.sigmoid(conv)


def _fused_kernel(H, W, C, w_ref, col_ref, x_ref, o_ref):
    # One whole batch element resident: x_ref / o_ref are (1, C, H*W).
    xf = x_ref[0].astype(jnp.float32)                           # (C, HW)
    mx = jnp.max(xf, axis=0, keepdims=True)
    av = jnp.sum(xf, axis=0, keepdims=True) * (1.0 / C)
    scale = _conv7x7_sigmoid(mx, av, w_ref, col_ref[...], H, W)
    o_ref[0] = (xf * scale).astype(o_ref.dtype)


def _scale_kernel(H, W, C, w_ref, col_ref, x_ref, scale_ref, mx_ref, sm_ref):
    # Channel-tiled reduction pass: x_ref is (1, tc, H*W); scale_ref (1, 1, H*W).
    j = pl.program_id(1)
    ncb = pl.num_programs(1)
    tc = x_ref.shape[1]

    @pl.when(j == 0)
    def _():
        mx_ref[...] = jnp.full(mx_ref.shape, -jnp.inf, mx_ref.dtype)
        sm_ref[...] = jnp.zeros(sm_ref.shape, sm_ref.dtype)

    x = x_ref[0].astype(jnp.float32)                            # (tc, HW)
    if C % tc != 0:
        # Partial last channel block (pl.cdiv grid): mask the padded rows.
        ch = j * tc + lax.broadcasted_iota(jnp.int32, x.shape, 0)
        valid = ch < C
        x_max = jnp.where(valid, x, -jnp.inf)
        x_sum = jnp.where(valid, x, 0.0)
    else:
        x_max = x_sum = x
    mx_ref[...] = jnp.maximum(mx_ref[...], jnp.max(x_max, axis=0, keepdims=True))
    sm_ref[...] = sm_ref[...] + jnp.sum(x_sum, axis=0, keepdims=True)

    @pl.when(j == ncb - 1)
    def _():
        scale = _conv7x7_sigmoid(mx_ref[...], sm_ref[...] * (1.0 / C),
                                 w_ref, col_ref[...], H, W)
        scale_ref[...] = scale[None]                            # (1, 1, HW)


def _apply_kernel(x_ref, s_ref, o_ref):
    # Multiply in f32 and cast once (no double rounding for bf16 inputs).
    o_ref[...] = (x_ref[...].astype(jnp.float32) * s_ref[...]).astype(o_ref.dtype)


def _pick_channel_tile(C, HW, itemsize, cap_bytes, sublane):
    """Largest channel tile that is a multiple of `sublane` (or == C) keeping one
    (tc, HW) block within cap_bytes.  Never exceeds C; may not divide C — the
    pl.cdiv grid plus in-kernel masking handle the partial last block."""
    if C * HW * itemsize <= cap_bytes:
        return C
    tc = (cap_bytes // (HW * itemsize)) // sublane * sublane
    tc = max(int(tc), sublane)
    # TODO(synk): add a spatial (H*W) tiling axis with a 3-pixel halo for the
    # tiny-C / huge-HW case where even one sublane group of channels exceeds the
    # cap; until then clamp to C (block == full channel dim is always legal).
    return min(tc, C)


def spatial_attention_block(x, conv_weight, *, force_two_pass=False,
                            max_block_bytes=None):
    """x: (N, C, H, W); conv_weight: (1, 2, KS, KS) (PyTorch OIHW, [max, mean])."""
    N, C, H, W = x.shape
    HW = H * W
    itemsize = jnp.dtype(x.dtype).itemsize

    x_flat = x.reshape(N, C, HW)                                # lane-dense last axis
    w2 = conv_weight.astype(jnp.float32).reshape(2, KS * KS)    # rows: [max, mean]
    col_ids = (jnp.arange(HW, dtype=jnp.int32) % W).reshape(1, HW)

    vmem_limit = _vmem_budget_bytes()

    def cparams(sem):
        return pltpu.CompilerParams(dimension_semantics=sem,
                                    vmem_limit_bytes=vmem_limit)

    # ---- Fused single-pass path: 1 read + 1 write of x over HBM. -------------
    slab = C * HW * itemsize
    fused_need = 4 * slab + 2 * C * HW * 4 + 64 * HW * 4   # dbl-buf io + f32 temps
    if not force_two_pass and fused_need <= vmem_limit:
        out_flat = pl.pallas_call(
            functools.partial(_fused_kernel, H, W, C),
            out_shape=jax.ShapeDtypeStruct((N, C, HW), x.dtype),
            grid=(N,),
            in_specs=[
                pl.BlockSpec((2, KS * KS), lambda b: (0, 0)),   # conv weight
                pl.BlockSpec((1, HW), lambda b: (0, 0)),        # column indices
                pl.BlockSpec((1, C, HW), lambda b: (b, 0, 0)),  # x slab
            ],
            out_specs=pl.BlockSpec((1, C, HW), lambda b: (b, 0, 0)),
            compiler_params=cparams(("parallel",)),
        )(w2, col_ids, x_flat)
        # TODO(synk): for N == 1 on v7x (2 TensorCores) add a halo'd spatial
        # parallel axis so the second core is not idle.
        return out_flat.reshape(N, C, H, W)

    # ---- Fallback two-pass path (batch element too large for VMEM). ----------
    sublane = 8 * max(1, 4 // itemsize)        # 8 (f32) / 16 (bf16) / 32 (int8)

    # Pass 1: per-batch spatial attention map, channel axis as reduction.
    cap1 = max_block_bytes if max_block_bytes is not None else vmem_limit // 6
    tc1 = _pick_channel_tile(C, HW, itemsize, cap1, sublane)
    n1 = pl.cdiv(C, tc1)
    scale = pl.pallas_call(
        functools.partial(_scale_kernel, H, W, C),
        out_shape=jax.ShapeDtypeStruct((N, 1, HW), jnp.float32),
        grid=(N, n1),
        in_specs=[
            pl.BlockSpec((2, KS * KS), lambda b, j: (0, 0)),
            pl.BlockSpec((1, HW), lambda b, j: (0, 0)),
            pl.BlockSpec((1, tc1, HW), lambda b, j: (b, j, 0)),
        ],
        out_specs=pl.BlockSpec((1, 1, HW), lambda b, j: (b, 0, 0)),
        scratch_shapes=[pltpu.VMEM((1, HW), jnp.float32),       # running max
                        pltpu.VMEM((1, HW), jnp.float32)],      # running sum
        compiler_params=cparams(("parallel", "arbitrary")),
    )(w2, col_ids, x_flat)

    # Pass 2: x * scale, fully parallel, independently (larger) tiled stream.
    cap2 = max_block_bytes if max_block_bytes is not None else vmem_limit // 8
    tc2 = _pick_channel_tile(C, HW, itemsize, cap2, sublane)
    n2 = pl.cdiv(C, tc2)
    out_flat = pl.pallas_call(
        _apply_kernel,
        out_shape=jax.ShapeDtypeStruct((N, C, HW), x.dtype),
        grid=(N, n2),
        in_specs=[
            pl.BlockSpec((1, tc2, HW), lambda b, j: (b, j, 0)),
            pl.BlockSpec((1, 1, HW), lambda b, j: (b, 0, 0)),
        ],
        out_specs=pl.BlockSpec((1, tc2, HW), lambda b, j: (b, j, 0)),
        compiler_params=cparams(("parallel", "parallel")),
    )(x_flat, scale)

    return out_flat.reshape(N, C, H, W)


def _reference(x, conv_weight):
    x = x.astype(jnp.float32)
    mx = jnp.max(x, axis=1, keepdims=True)
    av = jnp.mean(x, axis=1, keepdims=True)
    concat = jnp.concatenate([mx, av], axis=1)
    conv = lax.conv_general_dilated(
        concat, conv_weight.astype(jnp.float32), window_strides=(1, 1),
        padding=[(PAD, PAD), (PAD, PAD)],
        dimension_numbers=("NCHW", "OIHW", "NCHW"))
    return x * jax.nn.sigmoid(conv)


if __name__ == "__main__":
    key = jax.random.PRNGKey(0)
    kx, kw = jax.random.split(key)

    # Deterministic init of Conv2d(2, 1, kernel_size=7, bias=False) weight (OIHW).
    conv_weight = jax.random.normal(kw, (1, 2, KS, KS), dtype=jnp.float32) * 0.1

    # 1) Canonical small shape -> fused single-pass path.
    x = jax.random.normal(kx, (2, 4, 16, 16), dtype=jnp.float32)
    out = jax.block_until_ready(spatial_attention_block(x, conv_weight))
    ref = _reference(x, conv_weight)
    assert out.shape == x.shape
    err = float(jnp.max(jnp.abs(out - ref)))
    assert jnp.allclose(out, ref, atol=1e-5, rtol=1e-5), err

    # 2) Same input through the two-pass fallback path.
    out2 = jax.block_until_ready(
        spatial_attention_block(x, conv_weight, force_two_pass=True))
    err2 = float(jnp.max(jnp.abs(out2 - ref)))
    assert jnp.allclose(out2, ref, atol=1e-5, rtol=1e-5), err2

    # 3) Asymmetric map (H != W), C not a multiple of the channel tile:
    #    exercises the multi-block running max/sum, the masked partial last
    #    block, and the conv boundary masks for W != H.
    x3 = jax.random.normal(jax.random.PRNGKey(1), (1, 20, 8, 32), dtype=jnp.float32)
    out3 = jax.block_until_ready(
        spatial_attention_block(x3, conv_weight, force_two_pass=True,
                                max_block_bytes=8 * (8 * 32) * 4))
    ref3 = _reference(x3, conv_weight)
    err3 = float(jnp.max(jnp.abs(out3 - ref3)))
    assert jnp.allclose(out3, ref3, atol=1e-5, rtol=1e-5), err3

    # 4) bf16 input through the fused path (f32 math inside, single downcast).
    x4 = jax.random.normal(jax.random.PRNGKey(2), (2, 4, 16, 16), dtype=jnp.bfloat16)
    out4 = jax.block_until_ready(spatial_attention_block(x4, conv_weight))
    ref4 = _reference(x4, conv_weight)
    err4 = float(jnp.max(jnp.abs(out4.astype(jnp.float32) - ref4)))
    assert out4.dtype == jnp.bfloat16
    assert err4 < 0.05, err4

    print("KERNEL_OK")
</pallas_src>

<mosaic_0001>
module attributes {stable_mosaic.version = 11 : i64} {
  func.func @_fused_kernel(%arg0: i32, %arg1: memref<2x49xf32, #tpu.memory_space<vmem>>, %arg2: memref<1x256xi32, #tpu.memory_space<vmem>>, %arg3: memref<1x4x256xf32, #tpu.memory_space<vmem>>, %arg4: memref<1x4x256xf32, #tpu.memory_space<vmem>>) attributes {dimension_semantics = [#tpu.dimension_semantics<parallel>], iteration_bounds = array<i64: 2>, scalar_prefetch = 0 : i64, scratch_operands = 0 : i64, tpu.core_type = #tpu.core_type<tc>, window_params = [{pipeline_mode = #tpu.pipeline_mode<synchronous>, transform_indices = @transform_0, window_bounds = array<i64: 2, 49>}, {pipeline_mode = #tpu.pipeline_mode<synchronous>, transform_indices = @transform_1, window_bounds = array<i64: 1, 256>}, {transform_indices = @transform_2, window_bounds = array<i64: 1, 4, 256>}, {transform_indices = @transform_3, window_bounds = array<i64: 1, 4, 256>}]} {
    %c0 = arith.constant 0 : index
    %c0_0 = arith.constant 0 : index
    %c0_1 = arith.constant 0 : index
    %0 = vector.load %arg3[%c0, %c0_0, %c0_1] : memref<1x4x256xf32, #tpu.memory_space<vmem>>, vector<1x4x256xf32>
    %1 = vector.shape_cast %0 : vector<1x4x256xf32> to vector<4x256xf32>
    %cst = arith.constant dense<0xFF800000> : vector<256xf32>
    %2 = vector.multi_reduction <maximumf>, %1, %cst [0] : vector<4x256xf32> to vector<256xf32>
    %3 = vector.shape_cast %2 : vector<256xf32> to vector<1x256xf32>
    %cst_2 = arith.constant dense<0.000000e+00> : vector<256xf32>
    %4 = vector.multi_reduction <add>, %1, %cst_2 [0] : vector<4x256xf32> to vector<256xf32>
    %5 = vector.shape_cast %4 : vector<256xf32> to vector<1x256xf32>
    %cst_3 = arith.constant 2.500000e-01 : f32
    %6 = vector.broadcast %cst_3 : f32 to vector<1x256xf32>
    %7 = arith.mulf %5, %6 : vector<1x256xf32>
    %c0_4 = arith.constant 0 : index
    %c0_5 = arith.constant 0 : index
    %8 = vector.load %arg2[%c0_4, %c0_5] : memref<1x256xi32, #tpu.memory_space<vmem>>, vector<1x256xi32>
    %9 = tpu.iota {dimensions = array<i32: 1>} : vector<1x256xi32>
    %c-3_i32 = arith.constant -3 : i32
    %10 = vector.broadcast %c-3_i32 : i32 to vector<1x256xi32>
    %11 = arith.addi %8, %10 : vector<1x256xi32>
    %c0_i32 = arith.constant 0 : i32
    %12 = vector.broadcast %c0_i32 : i32 to vector<1x256xi32>
    %13 = arith.cmpi sge, %11, %12 : vector<1x256xi32>
    %c-3_i32_6 = arith.constant -3 : i32
    %14 = vector.broadcast %c-3_i32_6 : i32 to vector<1x256xi32>
    %15 = arith.addi %8, %14 : vector<1x256xi32>
    %c16_i32 = arith.constant 16 : i32
    %16 = vector.broadcast %c16_i32 : i32 to vector<1x256xi32>
    %17 = arith.cmpi slt, %15, %16 : vector<1x256xi32>
    %18 = arith.andi %13, %17 : vector<1x256xi1>
    %c-2_i32 = arith.constant -2 : i32
    %19 = vector.broadcast %c-2_i32 : i32 to vector<1x256xi32>
    %20 = arith.addi %8, %19 : vector<1x256xi32>
    %c0_i32_7 = arith.constant 0 : i32
    %21 = vector.broadcast %c0_i32_7 : i32 to vector<1x256xi32>
    %22 = arith.cmpi sge, %20, %21 : vector<1x256xi32>
    %c-2_i32_8 = arith.constant -2 : i32
    %23 = vector.broadcast %c-2_i32_8 : i32 to vector<1x256xi32>
    %24 = arith.addi %8, %23 : vector<1x256xi32>
    %c16_i32_9 = arith.constant 16 : i32
    %25 = vector.broadcast %c16_i32_9 : i32 to vector<1x256xi32>
    %26 = arith.cmpi slt, %24, %25 : vector<1x256xi32>
    %27 = arith.andi %22, %26 : vector<1x256xi1>
    %c-1_i32 = arith.constant -1 : i32
    %28 = vector.broadcast %c-1_i32 : i32 to vector<1x256xi32>
    %29 = arith.addi %8, %28 : vector<1x256xi32>
    %c0_i32_10 = arith.constant 0 : i32
    %30 = vector.broadcast %c0_i32_10 : i32 to vector<1x256xi32>
    %31 = arith.cmpi sge, %29, %30 : vector<1x256xi32>
    %c-1_i32_11 = arith.constant -1 : i32
    %32 = vector.broadcast %c-1_i32_11 : i32 to vector<1x256xi32>
    %33 = arith.addi %8, %32 : vector<1x256xi32>
    %c16_i32_12 = arith.constant 16 : i32
    %34 = vector.broadcast %c16_i32_12 : i32 to vector<1x256xi32>
    %35 = arith.cmpi slt, %33, %34 : vector<1x256xi32>
    %36 = arith.andi %31, %35 : vector<1x256xi1>
    %c0_i32_13 = arith.constant 0 : i32
    %37 = vector.broadcast %c0_i32_13 : i32 to vector<1x256xi32>
    %38 = arith.addi %8, %37 : vector<1x256xi32>
    %c0_i32_14 = arith.constant 0 : i32
    %39 = vector.broadcast %c0_i32_14 : i32 to vector<1x256xi32>
    %40 = arith.cmpi sge, %38, %39 : vector<1x256xi32>
    %c0_i32_15 = arith.constant 0 : i32
    %41 = vector.broadcast %c0_i32_15 : i32 to vector<1x256xi32>
    %42 = arith.addi %8, %41 : vector<1x256xi32>
    %c16_i32_16 = arith.constant 16 : i32
    %43 = vector.broadcast %c16_i32_16 : i32 to vector<1x256xi32>
    %44 = arith.cmpi slt, %42, %43 : vector<1x256xi32>
    %45 = arith.andi %40, %44 : vector<1x256xi1>
    %c1_i32 = arith.constant 1 : i32
    %46 = vector.broadcast %c1_i32 : i32 to vector<1x256xi32>
    %47 = arith.addi %8, %46 : vector<1x256xi32>
    %c0_i32_17 = arith.constant 0 : i32
    %48 = vector.broadcast %c0_i32_17 : i32 to vector<1x256xi32>
    %49 = arith.cmpi sge, %47, %48 : vector<1x256xi32>
    %c1_i32_18 = arith.constant 1 : i32
    %50 = vector.broadcast %c1_i32_18 : i32 to vector<1x256xi32>
    %51 = arith.addi %8, %50 : vector<1x256xi32>
    %c16_i32_19 = arith.constant 16 : i32
    %52 = vector.broadcast %c16_i32_19 : i32 to vector<1x256xi32>
    %53 = arith.cmpi slt, %51, %52 : vector<1x256xi32>
    %54 = arith.andi %49, %53 : vector<1x256xi1>
    %c2_i32 = arith.constant 2 : i32
    %55 = vector.broadcast %c2_i32 : i32 to vector<1x256xi32>
    %56 = arith.addi %8, %55 : vector<1x256xi32>
    %c0_i32_20 = arith.constant 0 : i32
    %57 = vector.broadcast %c0_i32_20 : i32 to vector<1x256xi32>
    %58 = arith.cmpi sge, %56, %57 : vector<1x256xi32>
    %c2_i32_21 = arith.constant 2 : i32
    %59 = vector.broadcast %c2_i32_21 : i32 to vector<1x256xi32>
    %60 = arith.addi %8, %59 : vector<1x256xi32>
    %c16_i32_22 = arith.constant 16 : i32
    %61 = vector.broadcast %c16_i32_22 : i32 to vector<1x256xi32>
    %62 = arith.cmpi slt, %60, %61 : vector<1x256xi32>
    %63 = arith.andi %58, %62 : vector<1x256xi1>
    %c3_i32 = arith.constant 3 : i32
    %64 = vector.broadcast %c3_i32 : i32 to vector<1x256xi32>
    %65 = arith.addi %8, %64 : vector<1x256xi32>
    %c0_i32_23 = arith.constant 0 : i32
    %66 = vector.broadcast %c0_i32_23 : i32 to vector<1x256xi32>
    %67 = arith.cmpi sge, %65, %66 : vector<1x256xi32>
    %c3_i32_24 = arith.constant 3 : i32
    %68 = vector.broadcast %c3_i32_24 : i32 to vector<1x256xi32>
    %69 = arith.addi %8, %68 : vector<1x256xi32>
    %c16_i32_25 = arith.constant 16 : i32
    %70 = vector.broadcast %c16_i32_25 : i32 to vector<1x256xi32>
    %71 = arith.cmpi slt, %69, %70 : vector<1x256xi32>
    %72 = arith.andi %67, %71 : vector<1x256xi1>
    %c48_i32 = arith.constant 48 : i32
    %73 = vector.broadcast %c48_i32 : i32 to vector<1x256xi32>
    %74 = arith.cmpi sge, %9, %73 : vector<1x256xi32>
    %c256_i32 = arith.constant 256 : i32
    %75 = vector.broadcast %c256_i32 : i32 to vector<1x256xi32>
    %76 = arith.cmpi slt, %9, %75 : vector<1x256xi32>
    %77 = arith.andi %74, %76 : vector<1x256xi1>
    %c32_i32 = arith.constant 32 : i32
    %78 = vector.broadcast %c32_i32 : i32 to vector<1x256xi32>
    %79 = arith.cmpi sge, %9, %78 : vector<1x256xi32>
    %c256_i32_26 = arith.constant 256 : i32
    %80 = vector.broadcast %c256_i32_26 : i32 to vector<1x256xi32>
    %81 = arith.cmpi slt, %9, %80 : vector<1x256xi32>
    %82 = arith.andi %79, %81 : vector<1x256xi1>
    %c16_i32_27 = arith.constant 16 : i32
    %83 = vector.broadcast %c16_i32_27 : i32 to vector<1x256xi32>
    %84 = arith.cmpi sge, %9, %83 : vector<1x256xi32>
    %c256_i32_28 = arith.constant 256 : i32
    %85 = vector.broadcast %c256_i32_28 : i32 to vector<1x256xi32>
    %86 = arith.cmpi slt, %9, %85 : vector<1x256xi32>
    %87 = arith.andi %84, %86 : vector<1x256xi1>
    %c0_i32_29 = arith.constant 0 : i32
    %88 = vector.broadcast %c0_i32_29 : i32 to vector<1x256xi32>
    %89 = arith.cmpi sge, %9, %88 : vector<1x256xi32>
    %c256_i32_30 = arith.constant 256 : i32
    %90 = vector.broadcast %c256_i32_30 : i32 to vector<1x256xi32>
    %91 = arith.cmpi slt, %9, %90 : vector<1x256xi32>
    %92 = arith.andi %89, %91 : vector<1x256xi1>
    %c0_i32_31 = arith.constant 0 : i32
    %93 = vector.broadcast %c0_i32_31 : i32 to vector<1x256xi32>
    %94 = arith.cmpi sge, %9, %93 : vector<1x256xi32>
    %c240_i32 = arith.constant 240 : i32
    %95 = vector.broadcast %c240_i32 : i32 to vector<1x256xi32>
    %96 = arith.cmpi slt, %9, %95 : vector<1x256xi32>
    %97 = arith.andi %94, %96 : vector<1x256xi1>
    %c0_i32_32 = arith.constant 0 : i32
    %98 = vector.broadcast %c0_i32_32 : i32 to vector<1x256xi32>
    %99 = arith.cmpi sge, %9, %98 : vector<1x256xi32>
    %c224_i32 = arith.constant 224 : i32
    %100 = vector.broadcast %c224_i32 : i32 to vector<1x256xi32>
    %101 = arith.cmpi slt, %9, %100 : vector<1x256xi32>
    %102 = arith.andi %99, %101 : vector<1x256xi1>
    %c0_i32_33 = arith.constant 0 : i32
    %103 = vector.broadcast %c0_i32_33 : i32 to vector<1x256xi32>
    %104 = arith.cmpi sge, %9, %103 : vector<1x256xi32>
    %c208_i32 = arith.constant 208 : i32
    %105 = vector.broadcast %c208_i32 : i32 to vector<1x256xi32>
    %106 = arith.cmpi slt, %9, %105 : vector<1x256xi32>
    %107 = arith.andi %104, %106 : vector<1x256xi1>
    %108 = tpu.concatenate %3, %7 in 0 : vector<1x256xf32>, vector<1x256xf32> -> vector<2x256xf32>
    %cst_34 = arith.constant 0.000000e+00 : f32
    %109 = vector.broadcast %cst_34 : f32 to vector<2x256xf32>
    %c51_i32 = arith.constant 51 : i32
    %110 = tpu.dynamic_rotate %108 by %c51_i32 dim 1 : vector<2x256xf32>, i32 -> vector<2x256xf32>
    %c0_35 = arith.constant 0 : index
    %c0_36 = arith.constant 0 : index
    %111 = vector.load %arg1[%c0_35, %c0_36] : memref<2x49xf32, #tpu.memory_space<vmem>>, vector<2x1xf32>
    %112 = arith.andi %77, %18 : vector<1x256xi1>
    %113 = vector.broadcast %111 : vector<2x1xf32> to vector<2x256xf32>
    %114 = arith.mulf %110, %113 : vector<2x256xf32>
    %cst_37 = arith.constant 0.000000e+00 : f32
    %115 = vector.shape_cast %112 : vector<1x256xi1> to vector<1x256xi1>
    %116 = vector.broadcast %115 : vector<1x256xi1> to vector<2x256xi1>
    %117 = vector.broadcast %cst_37 : f32 to vector<2x256xf32>
    %118 = arith.select %116, %114, %117 : vector<2x256xi1>, vector<2x256xf32>
    %119 = arith.addf %109, %118 : vector<2x256xf32>
    %c50_i32 = arith.constant 50 : i32
    %120 = tpu.dynamic_rotate %108 by %c50_i32 dim 1 : vector<2x256xf32>, i32 -> vector<2x256xf32>
    %c0_38 = arith.constant 0 : index
    %c1 = arith.constant 1 : index
    %121 = vector.load %arg1[%c0_38, %c1] : memref<2x49xf32, #tpu.memory_space<vmem>>, vector<2x1xf32>
    %122 = arith.andi %77, %27 : vector<1x256xi1>
    %123 = vector.broadcast %121 : vector<2x1xf32> to vector<2x256xf32>
    %124 = arith.mulf %120, %123 : vector<2x256xf32>
    %cst_39 = arith.constant 0.000000e+00 : f32
    %125 = vector.shape_cast %122 : vector<1x256xi1> to vector<1x256xi1>
    %126 = vector.broadcast %125 : vector<1x256xi1> to vector<2x256xi1>
    %127 = vector.broadcast %cst_39 : f32 to vector<2x256xf32>
    %128 = arith.select %126, %124, %127 : vector<2x256xi1>, vector<2x256xf32>
    %129 = arith.addf %119, %128 : vector<2x256xf32>
    %c49_i32 = arith.constant 49 : i32
    %130 = tpu.dynamic_rotate %108 by %c49_i32 dim 1 : vector<2x256xf32>, i32 -> vector<2x256xf32>
    %c0_40 = arith.constant 0 : index
    %c2 = arith.constant 2 : index
    %131 = vector.load %arg1[%c0_40, %c2] : memref<2x49xf32, #tpu.memory_space<vmem>>, vector<2x1xf32>
    %132 = arith.andi %77, %36 : vector<1x256xi1>
    %133 = vector.broadcast %131 : vector<2x1xf32> to vector<2x256xf32>
    %134 = arith.mulf %130, %133 : vector<2x256xf32>
    %cst_41 = arith.constant 0.000000e+00 : f32
    %135 = vector.shape_cast %132 : vector<1x256xi1> to vector<1x256xi1>
    %136 = vector.broadcast %135 : vector<1x256xi1> to vector<2x256xi1>
    %137 = vector.broadcast %cst_41 : f32 to vector<2x256xf32>
    %138 = arith.select %136, %134, %137 : vector<2x256xi1>, vector<2x256xf32>
    %139 = arith.addf %129, %138 : vector<2x256xf32>
    %c48_i32_42 = arith.constant 48 : i32
    %140 = tpu.dynamic_rotate %108 by %c48_i32_42 dim 1 : vector<2x256xf32>, i32 -> vector<2x256xf32>
    %c0_43 = arith.constant 0 : index
    %c3 = arith.constant 3 : index
    %141 = vector.load %arg1[%c0_43, %c3] : memref<2x49xf32, #tpu.memory_space<vmem>>, vector<2x1xf32>
    %142 = arith.andi %77, %45 : vector<1x256xi1>
    %143 = vector.broadcast %141 : vector<2x1xf32> to vector<2x256xf32>
    %144 = arith.mulf %140, %143 : vector<2x256xf32>
    %cst_44 = arith.constant 0.000000e+00 : f32
    %145 = vector.shape_cast %142 : vector<1x256xi1> to vector<1x256xi1>
    %146 = vector.broadcast %145 : vector<1x256xi1> to vector<2x256xi1>
    %147 = vector.broadcast %cst_44 : f32 to vector<2x256xf32>
    %148 = arith.select %146, %144, %147 : vector<2x256xi1>, vector<2x256xf32>
    %149 = arith.addf %139, %148 : vector<2x256xf32>
    %c47_i32 = arith.constant 47 : i32
    %150 = tpu.dynamic_rotate %108 by %c47_i32 dim 1 : vector<2x256xf32>, i32 -> vector<2x256xf32>
    %c0_45 = arith.constant 0 : index
    %c4 = arith.constant 4 : index
    %151 = vector.load %arg1[%c0_45, %c4] : memref<2x49xf32, #tpu.memory_space<vmem>>, vector<2x1xf32>
    %152 = arith.andi %77, %54 : vector<1x256xi1>
    %153 = vector.broadcast %151 : vector<2x1xf32> to vector<2x256xf32>
    %154 = arith.mulf %150, %153 : vector<2x256xf32>
    %cst_46 = arith.constant 0.000000e+00 : f32
    %155 = vector.shape_cast %152 : vector<1x256xi1> to vector<1x256xi1>
    %156 = vector.broadcast %155 : vector<1x256xi1> to vector<2x256xi1>
    %157 = vector.broadcast %cst_46 : f32 to vector<2x256xf32>
    %158 = arith.select %156, %154, %157 : vector<2x256xi1>, vector<2x256xf32>
    %159 = arith.addf %149, %158 : vector<2x256xf32>
    %c46_i32 = arith.constant 46 : i32
    %160 = tpu.dynamic_rotate %108 by %c46_i32 dim 1 : vector<2x256xf32>, i32 -> vector<2x256xf32>
    %c0_47 = arith.constant 0 : index
    %c5 = arith.constant 5 : index
    %161 = vector.load %arg1[%c0_47, %c5] : memref<2x49xf32, #tpu.memory_space<vmem>>, vector<2x1xf32>
    %162 = arith.andi %77, %63 : vector<1x256xi1>
    %163 = vector.broadcast %161 : vector<2x1xf32> to vector<2x256xf32>
    %164 = arith.mulf %160, %163 : vector<2x256xf32>
    %cst_48 = arith.constant 0.000000e+00 : f32
    %165 = vector.shape_cast %162 : vector<1x256xi1> to vector<1x256xi1>
    %166 = vector.broadcast %165 : vector<1x256xi1> to vector<2x256xi1>
    %167 = vector.broadcast %cst_48 : f32 to vector<2x256xf32>
    %168 = arith.select %166, %164, %167 : vector<2x256xi1>, vector<2x256xf32>
    %169 = arith.addf %159, %168 : vector<2x256xf32>
    %c45_i32 = arith.constant 45 : i32
    %170 = tpu.dynamic_rotate %108 by %c45_i32 dim 1 : vector<2x256xf32>, i32 -> vector<2x256xf32>
    %c0_49 = arith.constant 0 : index
    %c6 = arith.constant 6 : index
    %171 = vector.load %arg1[%c0_49, %c6] : memref<2x49xf32, #tpu.memory_space<vmem>>, vector<2x1xf32>
    %172 = arith.andi %77, %72 : vector<1x256xi1>
    %173 = vector.broadcast %171 : vector<2x1xf32> to vector<2x256xf32>
    %174 = arith.mulf %170, %173 : vector<2x256xf32>
    %cst_50 = arith.constant 0.000000e+00 : f32
    %175 = vector.shape_cast %172 : vector<1x256xi1> to vector<1x256xi1>
    %176 = vector.broadcast %175 : vector<1x256xi1> to vector<2x256xi1>
    %177 = vector.broadcast %cst_50 : f32 to vector<2x256xf32>
    %178 = arith.select %176, %174, %177 : vector<2x256xi1>, vector<2x256xf32>
    %179 = arith.addf %169, %178 : vector<2x256xf32>
    %c35_i32 = arith.constant 35 : i32
    %180 = tpu.dynamic_rotate %108 by %c35_i32 dim 1 : vector<2x256xf32>, i32 -> vector<2x256xf32>
    %c0_51 = arith.constant 0 : index
    %c7 = arith.constant 7 : index
    %181 = vector.load %arg1[%c0_51, %c7] : memref<2x49xf32, #tpu.memory_space<vmem>>, vector<2x1xf32>
    %182 = arith.andi %82, %18 : vector<1x256xi1>
    %183 = vector.broadcast %181 : vector<2x1xf32> to vector<2x256xf32>
    %184 = arith.mulf %180, %183 : vector<2x256xf32>
    %cst_52 = arith.constant 0.000000e+00 : f32
    %185 = vector.shape_cast %182 : vector<1x256xi1> to vector<1x256xi1>
    %186 = vector.broadcast %185 : vector<1x256xi1> to vector<2x256xi1>
    %187 = vector.broadcast %cst_52 : f32 to vector<2x256xf32>
    %188 = arith.select %186, %184, %187 : vector<2x256xi1>, vector<2x256xf32>
    %189 = arith.addf %179, %188 : vector<2x256xf32>
    %c34_i32 = arith.constant 34 : i32
    %190 = tpu.dynamic_rotate %108 by %c34_i32 dim 1 : vector<2x256xf32>, i32 -> vector<2x256xf32>
    %c0_53 = arith.constant 0 : index
    %c8 = arith.constant 8 : index
    %191 = vector.load %arg1[%c0_53, %c8] : memref<2x49xf32, #tpu.memory_space<vmem>>, vector<2x1xf32>
    %192 = arith.andi %82, %27 : vector<1x256xi1>
    %193 = vector.broadcast %191 : vector<2x1xf32> to vector<2x256xf32>
    %194 = arith.mulf %190, %193 : vector<2x256xf32>
    %cst_54 = arith.constant 0.000000e+00 : f32
    %195 = vector.shape_cast %192 : vector<1x256xi1> to vector<1x256xi1>
    %196 = vector.broadcast %195 : vector<1x256xi1> to vector<2x256xi1>
    %197 = vector.broadcast %cst_54 : f32 to vector<2x256xf32>
    %198 = arith.select %196, %194, %197 : vector<2x256xi1>, vector<2x256xf32>
    %199 = arith.addf %189, %198 : vector<2x256xf32>
    %c33_i32 = arith.constant 33 : i32
    %200 = tpu.dynamic_rotate %108 by %c33_i32 dim 1 : vector<2x256xf32>, i32 -> vector<2x256xf32>
    %c0_55 = arith.constant 0 : index
    %c9 = arith.constant 9 : index
    %201 = vector.load %arg1[%c0_55, %c9] : memref<2x49xf32, #tpu.memory_space<vmem>>, vector<2x1xf32>
    %202 = arith.andi %82, %36 : vector<1x256xi1>
    %203 = vector.broadcast %201 : vector<2x1xf32> to vector<2x256xf32>
    %204 = arith.mulf %200, %203 : vector<2x256xf32>
    %cst_56 = arith.constant 0.000000e+00 : f32
    %205 = vector.shape_cast %202 : vector<1x256xi1> to vector<1x256xi1>
    %206 = vector.broadcast %205 : vector<1x256xi1> to vector<2x256xi1>
    %207 = vector.broadcast %cst_56 : f32 to vector<2x256xf32>
    %208 = arith.select %206, %204, %207 : vector<2x256xi1>, vector<2x256xf32>
    %209 = arith.addf %199, %208 : vector<2x256xf32>
    %c32_i32_57 = arith.constant 32 : i32
    %210 = tpu.dynamic_rotate %108 by %c32_i32_57 dim 1 : vector<2x256xf32>, i32 -> vector<2x256xf32>
    %c0_58 = arith.constant 0 : index
    %c10 = arith.constant 10 : index
    %211 = vector.load %arg1[%c0_58, %c10] : memref<2x49xf32, #tpu.memory_space<vmem>>, vector<2x1xf32>
    %212 = arith.andi %82, %45 : vector<1x256xi1>
    %213 = vector.broadcast %211 : vector<2x1xf32> to vector<2x256xf32>
    %214 = arith.mulf %210, %213 : vector<2x256xf32>
    %cst_59 = arith.constant 0.000000e+00 : f32
    %215 = vector.shape_cast %212 : vector<1x256xi1> to vector<1x256xi1>
    %216 = vector.broadcast %215 : vector<1x256xi1> to vector<2x256xi1>
    %217 = vector.broadcast %cst_59 : f32 to vector<2x256xf32>
    %218 = arith.select %216, %214, %217 : vector<2x256xi1>, vector<2x256xf32>
    %219 = arith.addf %209, %218 : vector<2x256xf32>
    %c31_i32 = arith.constant 31 : i32
    %220 = tpu.dynamic_rotate %108 by %c31_i32 dim 1 : vector<2x256xf32>, i32 -> vector<2x256xf32>
    %c0_60 = arith.constant 0 : index
    %c11 = arith.constant 11 : index
    %221 = vector.load %arg1[%c0_60, %c11] : memref<2x49xf32, #tpu.memory_space<vmem>>, vector<2x1xf32>
    %222 = arith.andi %82, %54 : vector<1x256xi1>
    %223 = vector.broadcast %221 : vector<2x1xf32> to vector<2x256xf32>
    %224 = arith.mulf %220, %223 : vector<2x256xf32>
    %cst_61 = arith.constant 0.000000e+00 : f32
    %225 = vector.shape_cast %222 : vector<1x256xi1> to vector<1x256xi1>
    %226 = vector.broadcast %225 : vector<1x256xi1> to vector<2x256xi1>
    %227 = vector.broadcast %cst_61 : f32 to vector<2x256xf32>
    %228 = arith.select %226, %224, %227 : vector<2x256xi1>, vector<2x256xf32>
    %229 = arith.addf %219, %228 : vector<2x256xf32>
    %c30_i32 = arith.constant 30 : i32
    %230 = tpu.dynamic_rotate %108 by %c30_i32 dim 1 : vector<2x256xf32>, i32 -> vector<2x256xf32>
    %c0_62 = arith.constant 0 : index
    %c12 = arith.constant 12 : index
    %231 = vector.load %arg1[%c0_62, %c12] : memref<2x49xf32, #tpu.memory_space<vmem>>, vector<2x1xf32>
    %232 = arith.andi %82, %63 : vector<1x256xi1>
    %233 = vector.broadcast %231 : vector<2x1xf32> to vector<2x256xf32>
    %234 = arith.mulf %230, %233 : vector<2x256xf32>
    %cst_63 = arith.constant 0.000000e+00 : f32
    %235 = vector.shape_cast %232 : vector<1x256xi1> to vector<1x256xi1>
    %236 = vector.broadcast %235 : vector<1x256xi1> to vector<2x256xi1>
    %237 = vector.broadcast %cst_63 : f32 to vector<2x256xf32>
    %238 = arith.select %236, %234, %237 : vector<2x256xi1>, vector<2x256xf32>
    %239 = arith.addf %229, %238 : vector<2x256xf32>
    %c29_i32 = arith.constant 29 : i32
    %240 = tpu.dynamic_rotate %108 by %c29_i32 dim 1 : vector<2x256xf32>, i32 -> vector<2x256xf32>
    %c0_64 = arith.constant 0 : index
    %c13 = arith.constant 13 : index
    %241 = vector.load %arg1[%c0_64, %c13] : memref<2x49xf32, #tpu.memory_space<vmem>>, vector<2x1xf32>
    %242 = arith.andi %82, %72 : vector<1x256xi1>
    %243 = vector.broadcast %241 : vector<2x1xf32> to vector<2x256xf32>
    %244 = arith.mulf %240, %243 : vector<2x256xf32>
    %cst_65 = arith.constant 0.000000e+00 : f32
    %245 = vector.shape_cast %242 : vector<1x256xi1> to vector<1x256xi1>
    %246 = vector.broadcast %245 : vector<1x256xi1> to vector<2x256xi1>
    %247 = vector.broadcast %cst_65 : f32 to vector<2x256xf32>
    %248 = arith.select %246, %244, %247 : vector<2x256xi1>, vector<2x256xf32>
    %249 = arith.addf %239, %248 : vector<2x256xf32>
    %c19_i32 = arith.constant 19 : i32
    %250 = tpu.dynamic_rotate %108 by %c19_i32 dim 1 : vector<2x256xf32>, i32 -> vector<2x256xf32>
    %c0_66 = arith.constant 0 : index
    %c14 = arith.constant 14 : index
    %251 = vector.load %arg1[%c0_66, %c14] : memref<2x49xf32, #tpu.memory_space<vmem>>, vector<2x1xf32>
    %252 = arith.andi %87, %18 : vector<1x256xi1>
    %253 = vector.broadcast %251 : vector<2x1xf32> to vector<2x256xf32>
    %254 = arith.mulf %250, %253 : vector<2x256xf32>
    %cst_67 = arith.constant 0.000000e+00 : f32
    %255 = vector.shape_cast %252 : vector<1x256xi1> to vector<1x256xi1>
    %256 = vector.broadcast %255 : vector<1x256xi1> to vector<2x256xi1>
    %257 = vector.broadcast %cst_67 : f32 to vector<2x256xf32>
    %258 = arith.select %256, %254, %257 : vector<2x256xi1>, vector<2x256xf32>
    %259 = arith.addf %249, %258 : vector<2x256xf32>
    %c18_i32 = arith.constant 18 : i32
    %260 = tpu.dynamic_rotate %108 by %c18_i32 dim 1 : vector<2x256xf32>, i32 -> vector<2x256xf32>
    %c0_68 = arith.constant 0 : index
    %c15 = arith.constant 15 : index
    %261 = vector.load %arg1[%c0_68, %c15] : memref<2x49xf32, #tpu.memory_space<vmem>>, vector<2x1xf32>
    %262 = arith.andi %87, %27 : vector<1x256xi1>
    %263 = vector.broadcast %261 : vector<2x1xf32> to vector<2x256xf32>
    %264 = arith.mulf %260, %263 : vector<2x256xf32>
    %cst_69 = arith.constant 0.000000e+00 : f32
    %265 = vector.shape_cast %262 : vector<1x256xi1> to vector<1x256xi1>
    %266 = vector.broadcast %265 : vector<1x256xi1> to vector<2x256xi1>
    %267 = vector.broadcast %cst_69 : f32 to vector<2x256xf32>
    %268 = arith.select %266, %264, %267 : vector<2x256xi1>, vector<2x256xf32>
    %269 = arith.addf %259, %268 : vector<2x256xf32>
    %c17_i32 = arith.constant 17 : i32
    %270 = tpu.dynamic_rotate %108 by %c17_i32 dim 1 : vector<2x256xf32>, i32 -> vector<2x256xf32>
    %c0_70 = arith.constant 0 : index
    %c16 = arith.constant 16 : index
    %271 = vector.load %arg1[%c0_70, %c16] : memref<2x49xf32, #tpu.memory_space<vmem>>, vector<2x1xf32>
    %272 = arith.andi %87, %36 : vector<1x256xi1>
    %273 = vector.broadcast %271 : vector<2x1xf32> to vector<2x256xf32>
    %274 = arith.mulf %270, %273 : vector<2x256xf32>
    %cst_71 = arith.constant 0.000000e+00 : f32
    %275 = vector.shape_cast %272 : vector<1x256xi1> to vector<1x256xi1>
    %276 = vector.broadcast %275 : vector<1x256xi1> to vector<2x256xi1>
    %277 = vector.broadcast %cst_71 : f32 to vector<2x256xf32>
    %278 = arith.select %276, %274, %277 : vector<2x256xi1>, vector<2x256xf32>
    %279 = arith.addf %269, %278 : vector<2x256xf32>
    %c16_i32_72 = arith.constant 16 : i32
    %280 = tpu.dynamic_rotate %108 by %c16_i32_72 dim 1 : vector<2x256xf32>, i32 -> vector<2x256xf32>
    %c0_73 = arith.constant 0 : index
    %c17 = arith.constant 17 : index
    %281 = vector.load %arg1[%c0_73, %c17] : memref<2x49xf32, #tpu.memory_space<vmem>>, vector<2x1xf32>
    %282 = arith.andi %87, %45 : vector<1x256xi1>
    %283 = vector.broadcast %281 : vector<2x1xf32> to vector<2x256xf32>
    %284 = arith.mulf %280, %283 : vector<2x256xf32>
    %cst_74 = arith.constant 0.000000e+00 : f32
    %285 = vector.shape_cast %282 : vector<1x256xi1> to vector<1x256xi1>
    %286 = vector.broadcast %285 : vector<1x256xi1> to vector<2x256xi1>
    %287 = vector.broadcast %cst_74 : f32 to vector<2x256xf32>
    %288 = arith.select %286, %284, %287 : vector<2x256xi1>, vector<2x256xf32>
    %289 = arith.addf %279, %288 : vector<2x256xf32>
    %c15_i32 = arith.constant 15 : i32
    %290 = tpu.dynamic_rotate %108 by %c15_i32 dim 1 : vector<2x256xf32>, i32 -> vector<2x256xf32>
    %c0_75 = arith.constant 0 : index
    %c18 = arith.constant 18 : index
    %291 = vector.load %arg1[%c0_75, %c18] : memref<2x49xf32, #tpu.memory_space<vmem>>, vector<2x1xf32>
    %292 = arith.andi %87, %54 : vector<1x256xi1>
    %293 = vector.broadcast %291 : vector<2x1xf32> to vector<2x256xf32>
    %294 = arith.mulf %290, %293 : vector<2x256xf32>
    %cst_76 = arith.constant 0.000000e+00 : f32
    %295 = vector.shape_cast %292 : vector<1x256xi1> to vector<1x256xi1>
    %296 = vector.broadcast %295 : vector<1x256xi1> to vector<2x256xi1>
    %297 = vector.broadcast %cst_76 : f32 to vector<2x256xf32>
    %298 = arith.select %296, %294, %297 : vector<2x256xi1>, vector<2x256xf32>
    %299 = arith.addf %289, %298 : vector<2x256xf32>
    %c14_i32 = arith.constant 14 : i32
    %300 = tpu.dynamic_rotate %108 by %c14_i32 dim 1 : vector<2x256xf32>, i32 -> vector<2x256xf32>
    %c0_77 = arith.constant 0 : index
    %c19 = arith.constant 19 : index
    %301 = vector.load %arg1[%c0_77, %c19] : memref<2x49xf32, #tpu.memory_space<vmem>>, vector<2x1xf32>
    %302 = arith.andi %87, %63 : vector<1x256xi1>
    %303 = vector.broadcast %301 : vector<2x1xf32> to vector<2x256xf32>
    %304 = arith.mulf %300, %303 : vector<2x256xf32>
    %cst_78 = arith.constant 0.000000e+00 : f32
    %305 = vector.shape_cast %302 : vector<1x256xi1> to vector<1x256xi1>
    %306 = vector.broadcast %305 : vector<1x256xi1> to vector<2x256xi1>
    %307 = vector.broadcast %cst_78 : f32 to vector<2x256xf32>
    %308 = arith.select %306, %304, %307 : vector<2x256xi1>, vector<2x256xf32>
    %309 = arith.addf %299, %308 : vector<2x256xf32>
    %c13_i32 = arith.constant 13 : i32
    %310 = tpu.dynamic_rotate %108 by %c13_i32 dim 1 : vector<2x256xf32>, i32 -> vector<2x256xf32>
    %c0_79 = arith.constant 0 : index
    %c20 = arith.constant 20 : index
    %311 = vector.load %arg1[%c0_79, %c20] : memref<2x49xf32, #tpu.memory_space<vmem>>, vector<2x1xf32>
    %312 = arith.andi %87, %72 : vector<1x256xi1>
    %313 = vector.broadcast %311 : vector<2x1xf32> to vector<2x256xf32>
    %314 = arith.mulf %310, %313 : vector<2x256xf32>
    %cst_80 = arith.constant 0.000000e+00 : f32
    %315 = vector.shape_cast %312 : vector<1x256xi1> to vector<1x256xi1>
    %316 = vector.broadcast %315 : vector<1x256xi1> to vector<2x256xi1>
    %317 = vector.broadcast %cst_80 : f32 to vector<2x256xf32>
    %318 = arith.select %316, %314, %317 : vector<2x256xi1>, vector<2x256xf32>
    %319 = arith.addf %309, %318 : vector<2x256xf32>
    %c3_i32_81 = arith.constant 3 : i32
    %320 = tpu.dynamic_rotate %108 by %c3_i32_81 dim 1 : vector<2x256xf32>, i32 -> vector<2x256xf32>
    %c0_82 = arith.constant 0 : index
    %c21 = arith.constant 21 : index
    %321 = vector.load %arg1[%c0_82, %c21] : memref<2x49xf32, #tpu.memory_space<vmem>>, vector<2x1xf32>
    %322 = arith.andi %92, %18 : vector<1x256xi1>
    %323 = vector.broadcast %321 : vector<2x1xf32> to vector<2x256xf32>
    %324 = arith.mulf %320, %323 : vector<2x256xf32>
    %cst_83 = arith.constant 0.000000e+00 : f32
    %325 = vector.shape_cast %322 : vector<1x256xi1> to vector<1x256xi1>
    %326 = vector.broadcast %325 : vector<1x256xi1> to vector<2x256xi1>
    %327 = vector.broadcast %cst_83 : f32 to vector<2x256xf32>
    %328 = arith.select %326, %324, %327 : vector<2x256xi1>, vector<2x256xf32>
    %329 = arith.addf %319, %328 : vector<2x256xf32>
    %c2_i32_84 = arith.constant 2 : i32
    %330 = tpu.dynamic_rotate %108 by %c2_i32_84 dim 1 : vector<2x256xf32>, i32 -> vector<2x256xf32>
    %c0_85 = arith.constant 0 : index
    %c22 = arith.constant 22 : index
    %331 = vector.load %arg1[%c0_85, %c22] : memref<2x49xf32, #tpu.memory_space<vmem>>, vector<2x1xf32>
    %332 = arith.andi %92, %27 : vector<1x256xi1>
    %333 = vector.broadcast %331 : vector<2x1xf32> to vector<2x256xf32>
    %334 = arith.mulf %330, %333 : vector<2x256xf32>
    %cst_86 = arith.constant 0.000000e+00 : f32
    %335 = vector.shape_cast %332 : vector<1x256xi1> to vector<1x256xi1>
    %336 = vector.broadcast %335 : vector<1x256xi1> to vector<2x256xi1>
    %337 = vector.broadcast %cst_86 : f32 to vector<2x256xf32>
    %338 = arith.select %336, %334, %337 : vector<2x256xi1>, vector<2x256xf32>
    %339 = arith.addf %329, %338 : vector<2x256xf32>
    %c1_i32_87 = arith.constant 1 : i32
    %340 = tpu.dynamic_rotate %108 by %c1_i32_87 dim 1 : vector<2x256xf32>, i32 -> vector<2x256xf32>
    %c0_88 = arith.constant 0 : index
    %c23 = arith.constant 23 : index
    %341 = vector.load %arg1[%c0_88, %c23] : memref<2x49xf32, #tpu.memory_space<vmem>>, vector<2x1xf32>
    %342 = arith.andi %92, %36 : vector<1x256xi1>
    %343 = vector.broadcast %341 : vector<2x1xf32> to vector<2x256xf32>
    %344 = arith.mulf %340, %343 : vector<2x256xf32>
    %cst_89 = arith.constant 0.000000e+00 : f32
    %345 = vector.shape_cast %342 : vector<1x256xi1> to vector<1x256xi1>
    %346 = vector.broadcast %345 : vector<1x256xi1> to vector<2x256xi1>
    %347 = vector.broadcast %cst_89 : f32 to vector<2x256xf32>
    %348 = arith.select %346, %344, %347 : vector<2x256xi1>, vector<2x256xf32>
    %349 = arith.addf %339, %348 : vector<2x256xf32>
    %c0_90 = arith.constant 0 : index
    %c24 = arith.constant 24 : index
    %350 = vector.load %arg1[%c0_90, %c24] : memref<2x49xf32, #tpu.memory_space<vmem>>, vector<2x1xf32>
    %351 = arith.andi %92, %45 : vector<1x256xi1>
    %352 = vector.broadcast %350 : vector<2x1xf32> to vector<2x256xf32>
    %353 = arith.mulf %108, %352 : vector<2x256xf32>
    %cst_91 = arith.constant 0.000000e+00 : f32
    %354 = vector.shape_cast %351 : vector<1x256xi1> to vector<1x256xi1>
    %355 = vector.broadcast %354 : vector<1x256xi1> to vector<2x256xi1>
    %356 = vector.broadcast %cst_91 : f32 to vector<2x256xf32>
    %357 = arith.select %355, %353, %356 : vector<2x256xi1>, vector<2x256xf32>
    %358 = arith.addf %349, %357 : vector<2x256xf32>
    %c255_i32 = arith.constant 255 : i32
    %359 = tpu.dynamic_rotate %108 by %c255_i32 dim 1 : vector<2x256xf32>, i32 -> vector<2x256xf32>
    %c0_92 = arith.constant 0 : index
    %c25 = arith.constant 25 : index
    %360 = vector.load %arg1[%c0_92, %c25] : memref<2x49xf32, #tpu.memory_space<vmem>>, vector<2x1xf32>
    %361 = arith.andi %92, %54 : vector<1x256xi1>
    %362 = vector.broadcast %360 : vector<2x1xf32> to vector<2x256xf32>
    %363 = arith.mulf %359, %362 : vector<2x256xf32>
    %cst_93 = arith.constant 0.000000e+00 : f32
    %364 = vector.shape_cast %361 : vector<1x256xi1> to vector<1x256xi1>
    %365 = vector.broadcast %364 : vector<1x256xi1> to vector<2x256xi1>
    %366 = vector.broadcast %cst_93 : f32 to vector<2x256xf32>
    %367 = arith.select %365, %363, %366 : vector<2x256xi1>, vector<2x256xf32>
    %368 = arith.addf %358, %367 : vector<2x256xf32>
    %c254_i32 = arith.constant 254 : i32
    %369 = tpu.dynamic_rotate %108 by %c254_i32 dim 1 : vector<2x256xf32>, i32 -> vector<2x256xf32>
    %c0_94 = arith.constant 0 : index
    %c26 = arith.constant 26 : index
    %370 = vector.load %arg1[%c0_94, %c26] : memref<2x49xf32, #tpu.memory_space<vmem>>, vector<2x1xf32>
    %371 = arith.andi %92, %63 : vector<1x256xi1>
    %372 = vector.broadcast %370 : vector<2x1xf32> to vector<2x256xf32>
    %373 = arith.mulf %369, %372 : vector<2x256xf32>
    %cst_95 = arith.constant 0.000000e+00 : f32
    %374 = vector.shape_cast %371 : vector<1x256xi1> to vector<1x256xi1>
    %375 = vector.broadcast %374 : vector<1x256xi1> to vector<2x256xi1>
    %376 = vector.broadcast %cst_95 : f32 to vector<2x256xf32>
    %377 = arith.select %375, %373, %376 : vector<2x256xi1>, vector<2x256xf32>
    %378 = arith.addf %368, %377 : vector<2x256xf32>
    %c253_i32 = arith.constant 253 : i32
    %379 = tpu.dynamic_rotate %108 by %c253_i32 dim 1 : vector<2x256xf32>, i32 -> vector<2x256xf32>
    %c0_96 = arith.constant 0 : index
    %c27 = arith.constant 27 : index
    %380 = vector.load %arg1[%c0_96, %c27] : memref<2x49xf32, #tpu.memory_space<vmem>>, vector<2x1xf32>
    %381 = arith.andi %92, %72 : vector<1x256xi1>
    %382 = vector.broadcast %380 : vector<2x1xf32> to vector<2x256xf32>
    %383 = arith.mulf %379, %382 : vector<2x256xf32>
    %cst_97 = arith.constant 0.000000e+00 : f32
    %384 = vector.shape_cast %381 : vector<1x256xi1> to vector<1x256xi1>
    %385 = vector.broadcast %384 : vector<1x256xi1> to vector<2x256xi1>
    %386 = vector.broadcast %cst_97 : f32 to vector<2x256xf32>
    %387 = arith.select %385, %383, %386 : vector<2x256xi1>, vector<2x256xf32>
    %388 = arith.addf %378, %387 : vector<2x256xf32>
    %c243_i32 = arith.constant 243 : i32
    %389 = tpu.dynamic_rotate %108 by %c243_i32 dim 1 : vector<2x256xf32>, i32 -> vector<2x256xf32>
    %c0_98 = arith.constant 0 : index
    %c28 = arith.constant 28 : index
    %390 = vector.load %arg1[%c0_98, %c28] : memref<2x49xf32, #tpu.memory_space<vmem>>, vector<2x1xf32>
    %391 = arith.andi %97, %18 : vector<1x256xi1>
    %392 = vector.broadcast %390 : vector<2x1xf32> to vector<2x256xf32>
    %393 = arith.mulf %389, %392 : vector<2x256xf32>
    %cst_99 = arith.constant 0.000000e+00 : f32
    %394 = vector.shape_cast %391 : vector<1x256xi1> to vector<1x256xi1>
    %395 = vector.broadcast %394 : vector<1x256xi1> to vector<2x256xi1>
    %396 = vector.broadcast %cst_99 : f32 to vector<2x256xf32>
    %397 = arith.select %395, %393, %396 : vector<2x256xi1>, vector<2x256xf32>
    %398 = arith.addf %388, %397 : vector<2x256xf32>
    %c242_i32 = arith.constant 242 : i32
    %399 = tpu.dynamic_rotate %108 by %c242_i32 dim 1 : vector<2x256xf32>, i32 -> vector<2x256xf32>
    %c0_100 = arith.constant 0 : index
    %c29 = arith.constant 29 : index
    %400 = vector.load %arg1[%c0_100, %c29] : memref<2x49xf32, #tpu.memory_space<vmem>>, vector<2x1xf32>
    %401 = arith.andi %97, %27 : vector<1x256xi1>
    %402 = vector.broadcast %400 : vector<2x1xf32> to vector<2x256xf32>
    %403 = arith.mulf %399, %402 : vector<2x256xf32>
    %cst_101 = arith.constant 0.000000e+00 : f32
    %404 = vector.shape_cast %401 : vector<1x256xi1> to vector<1x256xi1>
    %405 = vector.broadcast %404 : vector<1x256xi1> to vector<2x256xi1>
    %406 = vector.broadcast %cst_101 : f32 to vector<2x256xf32>
    %407 = arith.select %405, %403, %406 : vector<2x256xi1>, vector<2x256xf32>
    %408 = arith.addf %398, %407 : vector<2x256xf32>
    %c241_i32 = arith.constant 241 : i32
    %409 = tpu.dynamic_rotate %108 by %c241_i32 dim 1 : vector<2x256xf32>, i32 -> vector<2x256xf32>
    %c0_102 = arith.constant 0 : index
    %c30 = arith.constant 30 : index
    %410 = vector.load %arg1[%c0_102, %c30] : memref<2x49xf32, #tpu.memory_space<vmem>>, vector<2x1xf32>
    %411 = arith.andi %97, %36 : vector<1x256xi1>
    %412 = vector.broadcast %410 : vector<2x1xf32> to vector<2x256xf32>
    %413 = arith.mulf %409, %412 : vector<2x256xf32>
    %cst_103 = arith.constant 0.000000e+00 : f32
    %414 = vector.shape_cast %411 : vector<1x256xi1> to vector<1x256xi1>
    %415 = vector.broadcast %414 : vector<1x256xi1> to vector<2x256xi1>
    %416 = vector.broadcast %cst_103 : f32 to vector<2x256xf32>
    %417 = arith.select %415, %413, %416 : vector<2x256xi1>, vector<2x256xf32>
    %418 = arith.addf %408, %417 : vector<2x256xf32>
    %c240_i32_104 = arith.constant 240 : i32
    %419 = tpu.dynamic_rotate %108 by %c240_i32_104 dim 1 : vector<2x256xf32>, i32 -> vector<2x256xf32>
    %c0_105 = arith.constant 0 : index
    %c31 = arith.constant 31 : index
    %420 = vector.load %arg1[%c0_105, %c31] : memref<2x49xf32, #tpu.memory_space<vmem>>, vector<2x1xf32>
    %421 = arith.andi %97, %45 : vector<1x256xi1>
    %422 = vector.broadcast %420 : vector<2x1xf32> to vector<2x256xf32>
    %423 = arith.mulf %419, %422 : vector<2x256xf32>
    %cst_106 = arith.constant 0.000000e+00 : f32
    %424 = vector.shape_cast %421 : vector<1x256xi1> to vector<1x256xi1>
    %425 = vector.broadcast %424 : vector<1x256xi1> to vector<2x256xi1>
    %426 = vector.broadcast %cst_106 : f32 to vector<2x256xf32>
    %427 = arith.select %425, %423, %426 : vector<2x256xi1>, vector<2x256xf32>
    %428 = arith.addf %418, %427 : vector<2x256xf32>
    %c239_i32 = arith.constant 239 : i32
    %429 = tpu.dynamic_rotate %108 by %c239_i32 dim 1 : vector<2x256xf32>, i32 -> vector<2x256xf32>
    %c0_107 = arith.constant 0 : index
    %c32 = arith.constant 32 : index
    %430 = vector.load %arg1[%c0_107, %c32] : memref<2x49xf32, #tpu.memory_space<vmem>>, vector<2x1xf32>
    %431 = arith.andi %97, %54 : vector<1x256xi1>
    %432 = vector.broadcast %430 : vector<2x1xf32> to vector<2x256xf32>
    %433 = arith.mulf %429, %432 : vector<2x256xf32>
    %cst_108 = arith.constant 0.000000e+00 : f32
    %434 = vector.shape_cast %431 : vector<1x256xi1> to vector<1x256xi1>
    %435 = vector.broadcast %434 : vector<1x256xi1> to vector<2x256xi1>
    %436 = vector.broadcast %cst_108 : f32 to vector<2x256xf32>
    %437 = arith.select %435, %433, %436 : vector<2x256xi1>, vector<2x256xf32>
    %438 = arith.addf %428, %437 : vector<2x256xf32>
    %c238_i32 = arith.constant 238 : i32
    %439 = tpu.dynamic_rotate %108 by %c238_i32 dim 1 : vector<2x256xf32>, i32 -> vector<2x256xf32>
    %c0_109 = arith.constant 0 : index
    %c33 = arith.constant 33 : index
    %440 = vector.load %arg1[%c0_109, %c33] : memref<2x49xf32, #tpu.memory_space<vmem>>, vector<2x1xf32>
    %441 = arith.andi %97, %63 : vector<1x256xi1>
    %442 = vector.broadcast %440 : vector<2x1xf32> to vector<2x256xf32>
    %443 = arith.mulf %439, %442 : vector<2x256xf32>
    %cst_110 = arith.constant 0.000000e+00 : f32
    %444 = vector.shape_cast %441 : vector<1x256xi1> to vector<1x256xi1>
    %445 = vector.broadcast %444 : vector<1x256xi1> to vector<2x256xi1>
    %446 = vector.broadcast %cst_110 : f32 to vector<2x256xf32>
    %447 = arith.select %445, %443, %446 : vector<2x256xi1>, vector<2x256xf32>
    %448 = arith.addf %438, %447 : vector<2x256xf32>
    %c237_i32 = arith.constant 237 : i32
    %449 = tpu.dynamic_rotate %108 by %c237_i32 dim 1 : vector<2x256xf32>, i32 -> vector<2x256xf32>
    %c0_111 = arith.constant 0 : index
    %c34 = arith.constant 34 : index
    %450 = vector.load %arg1[%c0_111, %c34] : memref<2x49xf32, #tpu.memory_space<vmem>>, vector<2x1xf32>
    %451 = arith.andi %97, %72 : vector<1x256xi1>
    %452 = vector.broadcast %450 : vector<2x1xf32> to vector<2x256xf32>
    %453 = arith.mulf %449, %452 : vector<2x256xf32>
    %cst_112 = arith.constant 0.000000e+00 : f32
    %454 = vector.shape_cast %451 : vector<1x256xi1> to vector<1x256xi1>
    %455 = vector.broadcast %454 : vector<1x256xi1> to vector<2x256xi1>
    %456 = vector.broadcast %cst_112 : f32 to vector<2x256xf32>
    %457 = arith.select %455, %453, %456 : vector<2x256xi1>, vector<2x256xf32>
    %458 = arith.addf %448, %457 : vector<2x256xf32>
    %c227_i32 = arith.constant 227 : i32
    %459 = tpu.dynamic_rotate %108 by %c227_i32 dim 1 : vector<2x256xf32>, i32 -> vector<2x256xf32>
    %c0_113 = arith.constant 0 : index
    %c35 = arith.constant 35 : index
    %460 = vector.load %arg1[%c0_113, %c35] : memref<2x49xf32, #tpu.memory_space<vmem>>, vector<2x1xf32>
    %461 = arith.andi %102, %18 : vector<1x256xi1>
    %462 = vector.broadcast %460 : vector<2x1xf32> to vector<2x256xf32>
    %463 = arith.mulf %459, %462 : vector<2x256xf32>
    %cst_114 = arith.constant 0.000000e+00 : f32
    %464 = vector.shape_cast %461 : vector<1x256xi1> to vector<1x256xi1>
    %465 = vector.broadcast %464 : vector<1x256xi1> to vector<2x256xi1>
    %466 = vector.broadcast %cst_114 : f32 to vector<2x256xf32>
    %467 = arith.select %465, %463, %466 : vector<2x256xi1>, vector<2x256xf32>
    %468 = arith.addf %458, %467 : vector<2x256xf32>
    %c226_i32 = arith.constant 226 : i32
    %469 = tpu.dynamic_rotate %108 by %c226_i32 dim 1 : vector<2x256xf32>, i32 -> vector<2x256xf32>
    %c0_115 = arith.constant 0 : index
    %c36 = arith.constant 36 : index
    %470 = vector.load %arg1[%c0_115, %c36] : memref<2x49xf32, #tpu.memory_space<vmem>>, vector<2x1xf32>
    %471 = arith.andi %102, %27 : vector<1x256xi1>
    %472 = vector.broadcast %470 : vector<2x1xf32> to vector<2x256xf32>
    %473 = arith.mulf %469, %472 : vector<2x256xf32>
    %cst_116 = arith.constant 0.000000e+00 : f32
    %474 = vector.shape_cast %471 : vector<1x256xi1> to vector<1x256xi1>
    %475 = vector.broadcast %474 : vector<1x256xi1> to vector<2x256xi1>
    %476 = vector.broadcast %cst_116 : f32 to vector<2x256xf32>
    %477 = arith.select %475, %473, %476 : vector<2x256xi1>, vector<2x256xf32>
    %478 = arith.addf %468, %477 : vector<2x256xf32>
    %c225_i32 = arith.constant 225 : i32
    %479 = tpu.dynamic_rotate %108 by %c225_i32 dim 1 : vector<2x256xf32>, i32 -> vector<2x256xf32>
    %c0_117 = arith.constant 0 : index
    %c37 = arith.constant 37 : index
    %480 = vector.load %arg1[%c0_117, %c37] : memref<2x49xf32, #tpu.memory_space<vmem>>, vector<2x1xf32>
    %481 = arith.andi %102, %36 : vector<1x256xi1>
    %482 = vector.broadcast %480 : vector<2x1xf32> to vector<2x256xf32>
    %483 = arith.mulf %479, %482 : vector<2x256xf32>
    %cst_118 = arith.constant 0.000000e+00 : f32
    %484 = vector.shape_cast %481 : vector<1x256xi1> to vector<1x256xi1>
    %485 = vector.broadcast %484 : vector<1x256xi1> to vector<2x256xi1>
    %486 = vector.broadcast %cst_118 : f32 to vector<2x256xf32>
    %487 = arith.select %485, %483, %486 : vector<2x256xi1>, vector<2x256xf32>
    %488 = arith.addf %478, %487 : vector<2x256xf32>
    %c224_i32_119 = arith.constant 224 : i32
    %489 = tpu.dynamic_rotate %108 by %c224_i32_119 dim 1 : vector<2x256xf32>, i32 -> vector<2x256xf32>
    %c0_120 = arith.constant 0 : index
    %c38 = arith.constant 38 : index
    %490 = vector.load %arg1[%c0_120, %c38] : memref<2x49xf32, #tpu.memory_space<vmem>>, vector<2x1xf32>
    %491 = arith.andi %102, %45 : vector<1x256xi1>
    %492 = vector.broadcast %490 : vector<2x1xf32> to vector<2x256xf32>
    %493 = arith.mulf %489, %492 : vector<2x256xf32>
    %cst_121 = arith.constant 0.000000e+00 : f32
    %494 = vector.shape_cast %491 : vector<1x256xi1> to vector<1x256xi1>
    %495 = vector.broadcast %494 : vector<1x256xi1> to vector<2x256xi1>
    %496 = vector.broadcast %cst_121 : f32 to vector<2x256xf32>
    %497 = arith.select %495, %493, %496 : vector<2x256xi1>, vector<2x256xf32>
    %498 = arith.addf %488, %497 : vector<2x256xf32>
    %c223_i32 = arith.constant 223 : i32
    %499 = tpu.dynamic_rotate %108 by %c223_i32 dim 1 : vector<2x256xf32>, i32 -> vector<2x256xf32>
    %c0_122 = arith.constant 0 : index
    %c39 = arith.constant 39 : index
    %500 = vector.load %arg1[%c0_122, %c39] : memref<2x49xf32, #tpu.memory_space<vmem>>, vector<2x1xf32>
    %501 = arith.andi %102, %54 : vector<1x256xi1>
    %502 = vector.broadcast %500 : vector<2x1xf32> to vector<2x256xf32>
    %503 = arith.mulf %499, %502 : vector<2x256xf32>
    %cst_123 = arith.constant 0.000000e+00 : f32
    %504 = vector.shape_cast %501 : vector<1x256xi1> to vector<1x256xi1>
    %505 = vector.broadcast %504 : vector<1x256xi1> to vector<2x256xi1>
    %506 = vector.broadcast %cst_123 : f32 to vector<2x256xf32>
    %507 = arith.select %505, %503, %506 : vector<2x256xi1>, vector<2x256xf32>
    %508 = arith.addf %498, %507 : vector<2x256xf32>
    %c222_i32 = arith.constant 222 : i32
    %509 = tpu.dynamic_rotate %108 by %c222_i32 dim 1 : vector<2x256xf32>, i32 -> vector<2x256xf32>
    %c0_124 = arith.constant 0 : index
    %c40 = arith.constant 40 : index
    %510 = vector.load %arg1[%c0_124, %c40] : memref<2x49xf32, #tpu.memory_space<vmem>>, vector<2x1xf32>
    %511 = arith.andi %102, %63 : vector<1x256xi1>
    %512 = vector.broadcast %510 : vector<2x1xf32> to vector<2x256xf32>
    %513 = arith.mulf %509, %512 : vector<2x256xf32>
    %cst_125 = arith.constant 0.000000e+00 : f32
    %514 = vector.shape_cast %511 : vector<1x256xi1> to vector<1x256xi1>
    %515 = vector.broadcast %514 : vector<1x256xi1> to vector<2x256xi1>
    %516 = vector.broadcast %cst_125 : f32 to vector<2x256xf32>
    %517 = arith.select %515, %513, %516 : vector<2x256xi1>, vector<2x256xf32>
    %518 = arith.addf %508, %517 : vector<2x256xf32>
    %c221_i32 = arith.constant 221 : i32
    %519 = tpu.dynamic_rotate %108 by %c221_i32 dim 1 : vector<2x256xf32>, i32 -> vector<2x256xf32>
    %c0_126 = arith.constant 0 : index
    %c41 = arith.constant 41 : index
    %520 = vector.load %arg1[%c0_126, %c41] : memref<2x49xf32, #tpu.memory_space<vmem>>, vector<2x1xf32>
    %521 = arith.andi %102, %72 : vector<1x256xi1>
    %522 = vector.broadcast %520 : vector<2x1xf32> to vector<2x256xf32>
    %523 = arith.mulf %519, %522 : vector<2x256xf32>
    %cst_127 = arith.constant 0.000000e+00 : f32
    %524 = vector.shape_cast %521 : vector<1x256xi1> to vector<1x256xi1>
    %525 = vector.broadcast %524 : vector<1x256xi1> to vector<2x256xi1>
    %526 = vector.broadcast %cst_127 : f32 to vector<2x256xf32>
    %527 = arith.select %525, %523, %526 : vector<2x256xi1>, vector<2x256xf32>
    %528 = arith.addf %518, %527 : vector<2x256xf32>
    %c211_i32 = arith.constant 211 : i32
    %529 = tpu.dynamic_rotate %108 by %c211_i32 dim 1 : vector<2x256xf32>, i32 -> vector<2x256xf32>
    %c0_128 = arith.constant 0 : index
    %c42 = arith.constant 42 : index
    %530 = vector.load %arg1[%c0_128, %c42] : memref<2x49xf32, #tpu.memory_space<vmem>>, vector<2x1xf32>
    %531 = arith.andi %107, %18 : vector<1x256xi1>
    %532 = vector.broadcast %530 : vector<2x1xf32> to vector<2x256xf32>
    %533 = arith.mulf %529, %532 : vector<2x256xf32>
    %cst_129 = arith.constant 0.000000e+00 : f32
    %534 = vector.shape_cast %531 : vector<1x256xi1> to vector<1x256xi1>
    %535 = vector.broadcast %534 : vector<1x256xi1> to vector<2x256xi1>
    %536 = vector.broadcast %cst_129 : f32 to vector<2x256xf32>
    %537 = arith.select %535, %533, %536 : vector<2x256xi1>, vector<2x256xf32>
    %538 = arith.addf %528, %537 : vector<2x256xf32>
    %c210_i32 = arith.constant 210 : i32
    %539 = tpu.dynamic_rotate %108 by %c210_i32 dim 1 : vector<2x256xf32>, i32 -> vector<2x256xf32>
    %c0_130 = arith.constant 0 : index
    %c43 = arith.constant 43 : index
    %540 = vector.load %arg1[%c0_130, %c43] : memref<2x49xf32, #tpu.memory_space<vmem>>, vector<2x1xf32>
    %541 = arith.andi %107, %27 : vector<1x256xi1>
    %542 = vector.broadcast %540 : vector<2x1xf32> to vector<2x256xf32>
    %543 = arith.mulf %539, %542 : vector<2x256xf32>
    %cst_131 = arith.constant 0.000000e+00 : f32
    %544 = vector.shape_cast %541 : vector<1x256xi1> to vector<1x256xi1>
    %545 = vector.broadcast %544 : vector<1x256xi1> to vector<2x256xi1>
    %546 = vector.broadcast %cst_131 : f32 to vector<2x256xf32>
    %547 = arith.select %545, %543, %546 : vector<2x256xi1>, vector<2x256xf32>
    %548 = arith.addf %538, %547 : vector<2x256xf32>
    %c209_i32 = arith.constant 209 : i32
    %549 = tpu.dynamic_rotate %108 by %c209_i32 dim 1 : vector<2x256xf32>, i32 -> vector<2x256xf32>
    %c0_132 = arith.constant 0 : index
    %c44 = arith.constant 44 : index
    %550 = vector.load %arg1[%c0_132, %c44] : memref<2x49xf32, #tpu.memory_space<vmem>>, vector<2x1xf32>
    %551 = arith.andi %107, %36 : vector<1x256xi1>
    %552 = vector.broadcast %550 : vector<2x1xf32> to vector<2x256xf32>
    %553 = arith.mulf %549, %552 : vector<2x256xf32>
    %cst_133 = arith.constant 0.000000e+00 : f32
    %554 = vector.shape_cast %551 : vector<1x256xi1> to vector<1x256xi1>
    %555 = vector.broadcast %554 : vector<1x256xi1> to vector<2x256xi1>
    %556 = vector.broadcast %cst_133 : f32 to vector<2x256xf32>
    %557 = arith.select %555, %553, %556 : vector<2x256xi1>, vector<2x256xf32>
    %558 = arith.addf %548, %557 : vector<2x256xf32>
    %c208_i32_134 = arith.constant 208 : i32
    %559 = tpu.dynamic_rotate %108 by %c208_i32_134 dim 1 : vector<2x256xf32>, i32 -> vector<2x256xf32>
    %c0_135 = arith.constant 0 : index
    %c45 = arith.constant 45 : index
    %560 = vector.load %arg1[%c0_135, %c45] : memref<2x49xf32, #tpu.memory_space<vmem>>, vector<2x1xf32>
    %561 = arith.andi %107, %45 : vector<1x256xi1>
    %562 = vector.broadcast %560 : vector<2x1xf32> to vector<2x256xf32>
    %563 = arith.mulf %559, %562 : vector<2x256xf32>
    %cst_136 = arith.constant 0.000000e+00 : f32
    %564 = vector.shape_cast %561 : vector<1x256xi1> to vector<1x256xi1>
    %565 = vector.broadcast %564 : vector<1x256xi1> to vector<2x256xi1>
    %566 = vector.broadcast %cst_136 : f32 to vector<2x256xf32>
    %567 = arith.select %565, %563, %566 : vector<2x256xi1>, vector<2x256xf32>
    %568 = arith.addf %558, %567 : vector<2x256xf32>
    %c207_i32 = arith.constant 207 : i32
    %569 = tpu.dynamic_rotate %108 by %c207_i32 dim 1 : vector<2x256xf32>, i32 -> vector<2x256xf32>
    %c0_137 = arith.constant 0 : index
    %c46 = arith.constant 46 : index
    %570 = vector.load %arg1[%c0_137, %c46] : memref<2x49xf32, #tpu.memory_space<vmem>>, vector<2x1xf32>
    %571 = arith.andi %107, %54 : vector<1x256xi1>
    %572 = vector.broadcast %570 : vector<2x1xf32> to vector<2x256xf32>
    %573 = arith.mulf %569, %572 : vector<2x256xf32>
    %cst_138 = arith.constant 0.000000e+00 : f32
    %574 = vector.shape_cast %571 : vector<1x256xi1> to vector<1x256xi1>
    %575 = vector.broadcast %574 : vector<1x256xi1> to vector<2x256xi1>
    %576 = vector.broadcast %cst_138 : f32 to vector<2x256xf32>
    %577 = arith.select %575, %573, %576 : vector<2x256xi1>, vector<2x256xf32>
    %578 = arith.addf %568, %577 : vector<2x256xf32>
    %c206_i32 = arith.constant 206 : i32
    %579 = tpu.dynamic_rotate %108 by %c206_i32 dim 1 : vector<2x256xf32>, i32 -> vector<2x256xf32>
    %c0_139 = arith.constant 0 : index
    %c47 = arith.constant 47 : index
    %580 = vector.load %arg1[%c0_139, %c47] : memref<2x49xf32, #tpu.memory_space<vmem>>, vector<2x1xf32>
    %581 = arith.andi %107, %63 : vector<1x256xi1>
    %582 = vector.broadcast %580 : vector<2x1xf32> to vector<2x256xf32>
    %583 = arith.mulf %579, %582 : vector<2x256xf32>
    %cst_140 = arith.constant 0.000000e+00 : f32
    %584 = vector.shape_cast %581 : vector<1x256xi1> to vector<1x256xi1>
    %585 = vector.broadcast %584 : vector<1x256xi1> to vector<2x256xi1>
    %586 = vector.broadcast %cst_140 : f32 to vector<2x256xf32>
    %587 = arith.select %585, %583, %586 : vector<2x256xi1>, vector<2x256xf32>
    %588 = arith.addf %578, %587 : vector<2x256xf32>
    %c205_i32 = arith.constant 205 : i32
    %589 = tpu.dynamic_rotate %108 by %c205_i32 dim 1 : vector<2x256xf32>, i32 -> vector<2x256xf32>
    %c0_141 = arith.constant 0 : index
    %c48 = arith.constant 48 : index
    %590 = vector.load %arg1[%c0_141, %c48] : memref<2x49xf32, #tpu.memory_space<vmem>>, vector<2x1xf32>
    %591 = arith.andi %107, %72 : vector<1x256xi1>
    %592 = vector.broadcast %590 : vector<2x1xf32> to vector<2x256xf32>
    %593 = arith.mulf %589, %592 : vector<2x256xf32>
    %cst_142 = arith.constant 0.000000e+00 : f32
    %594 = vector.shape_cast %591 : vector<1x256xi1> to vector<1x256xi1>
    %595 = vector.broadcast %594 : vector<1x256xi1> to vector<2x256xi1>
    %596 = vector.broadcast %cst_142 : f32 to vector<2x256xf32>
    %597 = arith.select %595, %593, %596 : vector<2x256xi1>, vector<2x256xf32>
    %598 = arith.addf %588, %597 : vector<2x256xf32>
    %cst_143 = arith.constant dense<0.000000e+00> : vector<256xf32>
    %599 = vector.multi_reduction <add>, %598, %cst_143 [0] : vector<2x256xf32> to vector<256xf32>
    %600 = vector.shape_cast %599 : vector<256xf32> to vector<1x256xf32>
    %601 = arith.negf %600 : vector<1x256xf32>
    %602 = math.exp %601 : vector<1x256xf32>
    %cst_144 = arith.constant 1.000000e+00 : f32
    %603 = vector.broadcast %cst_144 : f32 to vector<1x256xf32>
    %604 = arith.addf %603, %602 : vector<1x256xf32>
    %605 = arith.divf %603, %604 : vector<1x256xf32>
    %606 = vector.broadcast %605 : vector<1x256xf32> to vector<4x256xf32>
    %607 = arith.mulf %1, %606 : vector<4x256xf32>
    %c0_145 = arith.constant 0 : index
    %c0_146 = arith.constant 0 : index
    %c0_147 = arith.constant 0 : index
    %608 = vector.load %arg4[%c0_145, %c0_146, %c0_147] : memref<1x4x256xf32, #tpu.memory_space<vmem>>, vector<1x4x256xf32>
    %609 = vector.shape_cast %608 : vector<1x4x256xf32> to vector<4x256xf32>
    %610 = vector.shape_cast %607 : vector<4x256xf32> to vector<1x4x256xf32>
    tpu.vector_store %arg4[%c0_145, %c0_146, %c0_147], %610 {strides = array<i32>} : memref<1x4x256xf32, #tpu.memory_space<vmem>>, vector<1x4x256xf32>,
    return
  }
  func.func @transform_0(%arg0: i32) -> (i32, i32) {
    %c0_i32 = arith.constant 0 : i32
    %c0_i32_0 = arith.constant 0 : i32
    %c0_i32_1 = arith.constant 0 : i32
    return %c0_i32, %c0_i32_0 : i32, i32
  }
  func.func @transform_1(%arg0: i32) -> (i32, i32) {
    %c0_i32 = arith.constant 0 : i32
    %c0_i32_0 = arith.constant 0 : i32
    %c0_i32_1 = arith.constant 0 : i32
    return %c0_i32, %c0_i32_0 : i32, i32
  }
  func.func @transform_2(%arg0: i32) -> (i32, i32, i32) {
    %c0_i32 = arith.constant 0 : i32
    %c0_i32_0 = arith.constant 0 : i32
    %c0_i32_1 = arith.constant 0 : i32
    return %arg0, %c0_i32, %c0_i32_0 : i32, i32, i32
  }
  func.func @transform_3(%arg0: i32) -> (i32, i32, i32) {
    %c0_i32 = arith.constant 0 : i32
    %c0_i32_0 = arith.constant 0 : i32
    %c0_i32_1 = arith.constant 0 : i32
    return %arg0, %c0_i32, %c0_i32_0 : i32, i32, i32
  }
}

</mosaic_0001>

<bundles_post_ra>
// kernel: tpu_custom_call.1
= control target key start
LH: loop header
LB: loop body
LE: loop exit
PB: predicated region body
PF: predicated region fallthrough
CT: control target
= control target key end

     0   :  { %8 = vsyncpa [#allocation3], 0  ;;  %s3839_s0 = inlined_call_operand.hbm [shape: f32[2,49], index: 0, kind: input, shape index: {}]   ;;  %s3840_s1 = inlined_call_operand.hbm [shape: s32[1,256], index: 1, kind: input, shape index: {}]   ;;  %s3841_s2 = inlined_call_operand.hbm [shape: f32[2,4,256], index: 2, kind: input, shape index: {}]   ;;  %s3842_s3 = inlined_call_operand.hbm [shape: f32[2,4,256], index: 3, kind: output, shape index: {}]  }
   0x1   :  { %9 = vsyncpa [#allocation6], 0 }
   0x2   :  { %10 = vsyncpa [#allocation4], 0 }
   0x3   :  { %12 = vsyncpa [#allocation4 + $0x1], 0  ;;  %s2558_s12 = smov 0   ;;  %s2560_s13 = smov 0  }
   0x4   :  { %s2562_s14 = smov 0   ;;  %s2564_s15 = smov 0  }
   0x5 LB: > { %s2579_s16 = sadd.s32 4294967295, %s2435_s15   ;;  %s2037_s17 = sadd.s32 4294967294, %s2435_s15   ;;  %s2435_s15 = sphi %s2564_s15, %s4040_s15   ;;  %s2431_s14 = sphi %s2562_s14, %s4039_s14   ;;  %s2427_s13 = sphi %s2560_s13, %s4038_s13   ;;  %s2423_s12 = sphi %s2558_s12, %s4037_s12  }
   0x6   : > { %p80_p0 = scmp.ne.s32.totalorder %s2427_s13, %s2423_s12  ;;  %p3843_p1 = scmp.eq.s32.totalorder %s2579_s16, 0 }
   0x7   : > { %p110_p3 = scmp.eq.s32.totalorder %s2037_s17, 1  ;;  %p2038_p5 = scmp.ge.s32.totalorder %s2435_s15, 1 }
   0x8   : > { %p2588_p4 = por %p3843_p1, %p80_p0  ;;  %p117_p7 = scmp.lt.s32.totalorder %s2435_s15, 3 }
   0x9   : > { %p2593_p6 = por %p110_p3, %p80_p0  ;;  %s2437_s21 = smov [#allocation2]  }
   0xa   : > { %s3883_s18 = scalar_select %p2588_p4, 1, 0 }
   0xb   : > { %s3884_s19 = scalar_select %p2593_p6, 1, 0 }
   0xc   : > { %p2598_p8 = pnand %p2038_p5, %p117_p7  ;;  %s130_s22 = sshll.u32 %s2437_s21, 4  ;;  %s131_s22 = int_to_ptr.vmem [resolvable:$true] %s130_s22 }
   0xd   : > { %s2438_s23 = smov [#allocation5]   ;;  %s2612_s26 = sadd.s32 1, %s2435_s15  }
   0xe   : > { %s3885_s20 = scalar_select %p2598_p8, 1, 0 }
   0xf   : > { %p2071_p10 = pneg %p2598_p8  ;;  %s141_s24 = sshll.u32 %s2438_s23, 4  ;;  %s142_s24 = int_to_ptr.vmem [resolvable:$true] %s141_s24 }
  0x10   : > { %s64_s27 = ssub.s32 %s2435_s15, %s2612_s26  ;;  %s2294_s28 = scalar_lea.vmem %s131_s22, 32 }
  0x11   : > { %p2607_p11 = pnand %p2071_p10, %p3843_p1  ;;  %p2295_p13 = scmp.ne.s32.totalorder %s131_s22, %s2294_s28 }
  0x12   : > { %p2302_p5 = scmp.lt.s32.totalorder %s131_s22, %s131_s22  ;;  %p2303_p7 = scmp.lt.s32.totalorder %s2294_s28, %s2294_s28 }
  0x13   : > { %p2285_p12 = pneg %p2607_p11 }
  0x14   : > { %p2304_p10 = por %p2303_p7, %p2302_p5 }
  0x15   : > { %p2297_p0 = pnand %p2295_p13, %p2285_p12 }
  0x17   : > { %p2298_p3 = pneg %p2297_p0 }
  0x19   : > { %p2305_p9 = pnand %p2304_p10, %p2298_p3 }
  0x1b   : > { %2308 = shalt.err (!%p2305_p9)
}
  0x1c   : > { %2074 = dma.hbm_to_vmem [thread:$0]  (!%p2607_p11), %s3839_s0, 32, %s131_s22, [#allocation3]  }
  0x1d   : > { %s2320_s4 = scalar_lea.vmem %s142_s24, 32  ;;  %p2328_p13 = scmp.lt.s32.totalorder %s142_s24, %s142_s24 }
  0x1e   : > { %p2321_p1 = scmp.ne.s32.totalorder %s142_s24, %s2320_s4  ;;  %p2329_p0 = scmp.lt.s32.totalorder %s2320_s4, %s2320_s4 }
  0x20   : > { %p2323_p2 = pnand %p2321_p1, %p2285_p12  ;;  %p2330_p4 = por %p2329_p0, %p2328_p13 }
  0x22   : > { %p2324_p6 = pneg %p2323_p2 }
  0x24   : > { %p2331_p8 = pnand %p2330_p4, %p2324_p6 }
  0x26   : > { %2334 = shalt.err (!%p2331_p8)
}
  0x27   : > { %2077 = dma.hbm_to_vmem [thread:$0]  (!%p2607_p11), %s3840_s1, 32, %s142_s24, [#allocation6]  }
  0x28   : > { %p65_p1 = scmp.eq.s32.totalorder %s64_s27, 0  ;;  %s67_s7 = sadd.s32 1, %s2431_s14 }
  0x29   : > { %p74_p2 = scmp.ne.s32.totalorder %s2431_s14, %s2427_s13  ;;  %p75_p4 = scmp.eq.s32.totalorder %s2435_s15, 0 }
  0x2a   : > { %s2639_s8 = scalar_select %p65_p1, %s2431_s14, %s67_s7  }
  0x2b   : > { %p76_p6 = por %p75_p4, %p74_p2  ;;  %p3887_p8 = scmp.eq.s32.totalorder %s2579_s16, 1 }
  0x2c   : > { %p2088_p12 = scmp.lt.s32.totalorder %s2435_s15, 2  ;;  %s152_s10 = sand.u32 1, %s2435_s15  }
  0x2d   : > { %p2643_p9 = por %p3887_p8, %p74_p2  ;;  %s154_s11 = sand.u32 1, %s2431_s14  }
  0x2e   : > { %s2042_s17 = sshll.u32 %s154_s11, 3  ;;  %s2057_s21 = sshll.u32 %s2435_s15, 7 }
  0x2f   : > { %s3888_s9 = scalar_select %p2643_p9, 1, 0 }
  0x30   : > { %s2654_s24 = scalar_lea.hbm %s3841_s2, %s2057_s21  ;;  %s156_s25 = scalar_lea.vmem [#allocation7], %s2042_s17 }
  0x31   : > { %s164_s27 = sshll.u32 %s156_s25, 4  ;;  %p2656_p11 = pnand %p2088_p12, %p76_p6  ;;  %s165_s27 = int_to_ptr.vmem [resolvable:$true] %s164_s27 }
  0x32   : > { %s153_s29 = scalar_lea.sflag [#allocation3], %s152_s10  ;;  %s2335_s30 = scalar_lea.hbm %s2654_s24, 128 }
  0x33   : > { %p2336_p3 = scmp.ne.s32.totalorder %s2654_s24, %s2335_s30  ;;  %p2337_p5 = pneg %p2656_p11 }
  0x34   : > { %s2340_s6 = scalar_lea.hbm %s3841_s2, 256  ;;  %p2341_p13 = scmp.lt.s32.totalorder %s2654_s24, %s3841_s2 }
  0x35   : > { %p2338_p7 = pnand %p2337_p5, %p2336_p3  ;;  %p2342_p0 = scmp.lt.s32.totalorder %s2340_s6, %s2335_s30 }
  0x37   : > { %p2339_p10 = pneg %p2338_p7  ;;  %p2343_p1 = por %p2342_p0, %p2341_p13 }
  0x39   : > { %p2344_p2 = pnand %p2343_p1, %p2339_p10 }
  0x3b   : > { %2347 = shalt.err (!%p2344_p2)
}
  0x3c   : > { %s2348_s17 = scalar_lea.vmem %s165_s27, 128  ;;  %s2439_s10 = smov [#allocation7]  }
  0x3d   : > { %p2349_p4 = scmp.ne.s32.totalorder %s165_s27, %s2348_s17  ;;  %s2353_s21 = sshll.u32 %s2439_s10, 4  ;;  %s2354_s21 = int_to_ptr.vmem [resolvable:$false] %s2353_s21 }
  0x3e   : > { %s2355_s22 = scalar_lea.vmem %s2354_s21, 256  ;;  %p2356_p12 = scmp.lt.s32.totalorder %s165_s27, %s2354_s21 }
  0x3f   : > { %p2351_p6 = pnand %p2349_p4, %p2337_p5  ;;  %p2357_p3 = scmp.lt.s32.totalorder %s2355_s22, %s2348_s17 }
  0x41   : > { %p2352_p8 = pneg %p2351_p6  ;;  %p2358_p7 = por %p2357_p3, %p2356_p12 }
  0x43   : > { %p2359_p9 = pnand %p2358_p7, %p2352_p8 }
  0x45   : > { %2362 = shalt.err (!%p2359_p9)
}
  0x46   : > { %2081 = dma.hbm_to_vmem [thread:$0]  (!%p2656_p11), %s2654_s24, 128, %s165_s27, %s153_s29  }
  0x47   : > { %p3890_p10 = scmp.ne.s32.totalorder %s3885_s20, 0 }
  0x48   : > { %p3891_p13 = scmp.eq.s32.totalorder (!%p3890_p10), %s2579_s16, 0 }
  0x49   : > { %173 = sbr.rel (%p3890_p10) target bundleno = 663 (0x297), region = 32 }
  0x4e   : > { %2406 = dma.done.wait (%p3891_p13), [#allocation3], 32   ;;  %p3892_p5 = pmov %p3891_p13 }
  0x50   : > { %2408 = vsyncadd (%p3892_p5), [#allocation3], 4294967264  ;;  %p3893_p0 = pmov %p3892_p5 }
  0x52   : > { %2410 = dma.done.wait (%p3893_p0), [#allocation6], 32   ;;  %p3894_p1 = pmov %p3893_p0 }
  0x53   : > { %s183_s23 = sand.u32 1, %s2579_s16   ;;  %s185_s24 = sand.u32 1, %s2427_s13  }
  0x54   : > { %2412 = vsyncadd (%p3894_p1), [#allocation6], 4294967264  ;;  %s2688_s20 = sshll.u32 %s185_s24, 3  ;;  %s184_s25 = scalar_lea.sflag [#allocation3], %s183_s23 }
  0x55   : > { %s187_s27 = scalar_lea.vmem [#allocation7], %s2688_s20  ;;  %p3895_p9 = scmp.ne.s32.totalorder %s3883_s18, 0 }
  0x57   : > { %2414 = dma.done.wait (%p3895_p9), %s184_s25, 128  }
  0x58   : > { %2416 = vsyncadd (%p3895_p9), %s184_s25, 4294967168  ;;  %v2440_v0 = vmov 0   ;;  %v2441_v1 = vmov 2   ;;  %vm214_vm0 = vcmask 1043456   ;;  %v210_v2 = vld [vmem:[%s187_s27] sm:$0xff]  ;;  %v2442_v15 = vmov 1  }
  0x59   : > { %2223 = vset.pattern.permute.xlu1 %v2440_v0  ;;  %2225 = vset.pattern.permute.xlu0 %v2441_v1  ;;  %v2698_v3 = vld [vmem:[#allocation2] sm:$0x3]  ;;  %v212_v4 = vcombine.high %v210_v2, %v210_v2  ;;  %v215_v5 = vsel %vm214_vm0, %v210_v2, -inf  ;;  %v229_v6 = vsel %vm214_vm0, %v210_v2, 0.0  ;;  %v2443_v16 = vmov 3   ;;  %s2444_s18 = smov 50  }
  0x5a   : > { %332 = vperm.xlu1 %2223, %v2698_v3   ;;  %416 = vperm.xlu0 %2225, %v2698_v3   ;;  %v216_v7 = vrot.slane %v215_v5, 4  ;;  %v230_v8 = vrot.slane %v229_v6, 4  ;;  %vm306_vm1 = vcmask 1040384   ;;  %s2445_s28 = smov 51   ;;  %s2446_s29 = smov 48   ;;  %v2449_v39 = vmov 4  }
  0x5b   : > { %v222_v9 = vsel %vm214_vm0, %v212_v4, -inf  ;;  %v236_v10 = vsel %vm214_vm0, %v212_v4, 0.0  ;;  %s2447_s30 = smov 49   ;;  %s2448_s4 = smov 47   ;;  %v2451_v40 = vmov 5   ;;  %v2452_v41 = vmov 6  }
  0x5c   : > { %v217_v11 = vmax.f32 %v215_v5, %v216_v7  ;;  %v223_v12 = vrot.slane %v222_v9, 4  ;;  %v231_v13 = vadd.f32 %v230_v8, %v229_v6  ;;  %v237_v14 = vrot.slane %v236_v10, 4  ;;  %s2450_s5 = smov 46   ;;  %s2453_s6 = smov 45   ;;  %v2749_v54 = vld [vmem:[#allocation5] sm:$0x3] }
  0x5d   : > { %v2454_v42 = vmov 7   ;;  %s2455_s7 = smov 35   ;;  %v2456_v43 = vmov 8   ;;  %v2457_v44 = vmov 9   ;;  %v2458_v45 = vmov 24   ;;  %s2459_s11 = smov 34  }
  0x5e   : > { %2224 = vset.pattern.permute.xlu1 %v2442_v15  ;;  %2226 = vset.pattern.permute.xlu0 %v2443_v16  ;;  %v218_v17 = vrot.slane %v217_v11, 2  ;;  %v224_v18 = vmax.f32 %v222_v9, %v223_v12  ;;  %v232_v19 = vrot.slane %v231_v13, 2  ;;  %v238_v20 = vadd.f32 %v237_v14, %v236_v10  ;;  %s2462_s17 = smov 33   ;;  %s2464_s10 = smov 32  }
  0x5f   : > { %374 = vperm.xlu1 %2224, %v2698_v3   ;;  %v2460_v46 = vmov 10   ;;  %v2461_v47 = vmov 11   ;;  %v2463_v48 = vmov 12   ;;  %v2465_v49 = vmov 13   ;;  %s2467_s21 = smov 31   ;;  %s2469_s22 = smov 30  }
  0x60   : > { %v219_v21 = vmax.f32 %v217_v11, %v218_v17  ;;  %v225_v22 = vrot.slane %v224_v18, 2  ;;  %v233_v23 = vadd.f32 %v232_v19, %v231_v13  ;;  %v239_v24 = vrot.slane %v238_v20, 2  ;;  %s2472_s23 = smov 29   ;;  %s2475_s25 = smov 19  }
  0x61   : > { %v2466_v50 = vmov 14   ;;  %v2468_v51 = vmov 15   ;;  %v2470_v52 = vmov 16   ;;  %v2471_v53 = vmov 17   ;;  %p4034_p2 = scmp.ne.s32.totalorder %s3888_s9, 0 }
  0x62   : > { %v220_v25 = vrot.slane %v219_v21, 1  ;;  %v226_v26 = vmax.f32 %v224_v18, %v225_v22  ;;  %v234_v27 = vrot.slane %v233_v23, 1  ;;  %v240_v28 = vadd.f32 %v239_v24, %v238_v20 }
  0x63   : > { %2247 = vset.pattern.permute.xlu1 %v2458_v45  ;;  %v2473_v55 = vmov 18   ;;  %v249_v56 = vadd.s32 4294967293, %v2749_v54  ;;  %v246_v57 = vlaneseq  ;;  %v253_v58 = vadd.s32 4294967294, %v2749_v54 }
  0x64   : > { %v221_v29 = vmax.f32 %v219_v21, %v220_v25  ;;  %v235_v30 = vadd.f32 %v234_v27, %v233_v23  ;;  %v241_v31 = vrot.slane %v240_v28, 1  ;;  %v227_v32 = vrot.slane %v226_v26, 1 }
  0x65   : > { %v257_v59 = vadd.s32 4294967295, %v2749_v54  ;;  %v2474_v60 = vmov 19   ;;  %vm250_vm2 = vcmp.ge.s32.totalorder %v249_v56, 0  ;;  %vm251_vm3 = vcmp.lt.s32.totalorder %v249_v56, 16 }
  0x66   : > { %v242_v33 = vadd.f32 %v241_v31, %v240_v28  ;;  %v243_v34 = vmul.f32 0.25, %v235_v30  ;;  %v228_v36 = vmax.f32 %v226_v26, %v227_v32  ;;  %v319_v61 = vshrl.u32 %v246_v57, 7  ;;  %vm252_vm6 = vmand %vm250_vm2, %vm251_vm3 }
  0x67   : > { %vm254_vm4 = vcmp.ge.s32.totalorder %v253_v58, 0  ;;  %vm255_vm5 = vcmp.lt.s32.totalorder %v253_v58, 16  ;;  %vm258_vm7 = vcmp.ge.s32.totalorder %v257_v59, 0  ;;  %vm259_vm8 = vcmp.lt.s32.totalorder %v257_v59, 16 }
  0x68   : > { %v2703_v35 = vsel %vm306_vm1, %v221_v29, %v243_v34  ;;  %v244_v37 = vmul.f32 0.25, %v242_v33  ;;  %v2476_v62 = vmov 20   ;;  %v2759_v63 = vsub.s32 0, %v319_v61  ;;  %vm256_vm9 = vmand %vm254_vm4, %vm255_vm5 }
  0x69   : > { %353 = vrot.lane.b32.xlu1 %v2703_v35, %s2444_s18  ;;  %309 = vrot.lane.b32.xlu0 %v2703_v35, %s2445_s28  ;;  %v317_v1 = vsel %vm252_vm6, 1, %v2440_v0  ;;  %vm260_vm10 = vmand %vm258_vm7, %vm259_vm8  ;;  %v360_v2 = vsel %vm256_vm9, 1, %v2440_v0  ;;  %v2765_v4 = vand.u32 127, %v246_v57  ;;  %v2478_v7 = vmov 21  }
  0x6a   : > { %v2709_v38 = vsel %vm306_vm1, %v228_v36, %v244_v37  ;;  %v321_v5 = vrot.slane %v317_v1, %v2759_v63  ;;  %v402_v6 = vsel %vm260_vm10, 1, %v2440_v0  ;;  %v2769_v8 = vsub.s32 1, %v319_v61 }
  0x6b   : > { %v364_v10 = vrot.slane %v360_v2, %v2759_v63  ;;  %v406_v12 = vrot.slane %v402_v6, %v2759_v63  ;;  %vm3847_vm11 = vcmp.ge.s32.totalorder %v2765_v4, 48  ;;  %v264_v14 = vadd.s32 1, %v2749_v54 }
  0x6c   : > { %vm2780_vm12 = vcmp.ne.s32.totalorder %v321_v5, 0  ;;  %v325_v15 = vrot.slane %v317_v1, %v2769_v8  ;;  %v368_v16 = vrot.slane %v360_v2, %v2769_v8  ;;  %vm261_vm13 = vcmp.ge.s32.totalorder %v2749_v54, 0 }
  0x6d   : > { %437 = vrot.lane.b32.xlu1 %v2703_v35, %s2446_s29  ;;  %395 = vrot.lane.b32.xlu0 %v2703_v35, %s2447_s30  ;;  %vm262_vm14 = vcmp.lt.s32.totalorder %v2749_v54, 16  ;;  %v2479_v17 = vmov 22   ;;  %vm2789_vm15 = vcmp.ne.s32.totalorder %v364_v10, 0  ;;  %v410_v19 = vrot.slane %v402_v6, %v2769_v8  ;;  %vm328_vm0 = vmand %vm3847_vm11, %vm2780_vm12 }
  0x6e   : > { %vm2802_vm1 = vcmp.ne.s32.totalorder %v406_v12, 0  ;;  %v3900_v21 = vmov 0  ;;  %vm263_vm2 = vmand %vm261_vm13, %vm262_vm14  ;;  %vm265_vm3 = vcmp.ge.s32.totalorder %v264_v14, 0  ;;  %vm266_vm4 = vcmp.lt.s32.totalorder %v264_v14, 16 }
  0x6f   : > { %v3901_v21 = vsel %vm2802_vm1, 4294967295, %v3900_v21  ;;  %vm2806_vm5 = vcmp.ne.s32.totalorder %v325_v15, 0  ;;  %v3902_v23 = vmov 0  ;;  %vm2810_vm6 = vcmp.ne.s32.totalorder %v368_v16, 0  ;;  %vm371_vm7 = vmand %vm3847_vm11, %vm2789_vm15 }
  0x70   : > { %v3903_v23 = vsel %vm2806_vm5, 4294967295, %v3902_v23  ;;  %v3904_v24 = vmov 0  ;;  %v337_v25 = vsel %vm328_vm0, 1, %v2440_v0  ;;  %vm2819_vm8 = vcmp.ne.s32.totalorder %v410_v19, 0  ;;  %vm413_vm9 = vmand %vm3847_vm11, %vm2802_vm1 }
  0x71   : > { %479 = vrot.lane.b32.xlu1 %v2703_v35, %s2448_s4  ;;  %311 = vrot.lane.b32.xlu0 %v2709_v38, %s2445_s28  ;;  %s2480_s28 = smov 17   ;;  %v3905_v24 = vsel %vm2810_vm6, 4294967295, %v3904_v24  ;;  %v3906_v26 = vmov 0  ;;  %v2481_v27 = vmov 23   ;;  %v444_v29 = vsel %vm263_vm2, 1, %v2440_v0  ;;  %vm267_vm10 = vmand %vm265_vm3, %vm266_vm4 }
  0x72   : > { %v3907_v26 = vsel %vm2819_vm8, 4294967295, %v3906_v26  ;;  %v338_v30 = vsel %vm2806_vm5, 1, %v2440_v0  ;;  %v379_v31 = vsel %vm371_vm7, 1, %v2440_v0  ;;  %v380_v32 = vsel %vm2810_vm6, 1, %v2440_v0 }
  0x73   : > { %v268_v33 = vadd.s32 2, %v2749_v54  ;;  %v342_v36 = vrot.slane %v337_v25, %v2759_v63  ;;  %v422_v37 = vsel %vm2819_vm8, 1, %v2440_v0  ;;  %vm313_vm13 = vcmp.lt.s32.totalorder %v2765_v4, 51 }
  0x74   : > { %v388_v45 = vrot.slane %v380_v32, %v2759_v63  ;;  %v3910_v56 = vmov 0  ;;  %v272_v57 = vadd.s32 3, %v2749_v54  ;;  %v3918_v1 = vmov 0 }
  0x75   : > { %397 = vrot.lane.b32.xlu1 %v2709_v38, %s2447_s30  ;;  %355 = vrot.lane.b32.xlu0 %v2709_v38, %s2444_s18  ;;  %s2477_s18 = smov 18   ;;  %s2483_s30 = smov 127   ;;  %vm269_vm14 = vcmp.ge.s32.totalorder %v268_v33, 0  ;;  %vm270_vm0 = vcmp.lt.s32.totalorder %v268_v33, 16  ;;  %vm2860_vm2 = vcmp.eq.s32.totalorder %v342_v36, 1  ;;  %v3924_v10 = vmov 0 }
  0x76   : > { %vm271_vm11 = vmand %vm269_vm14, %vm270_vm0  ;;  %vm3926_vm0 = vcmp.lt.s32.totalorder %v2765_v4, 50  ;;  %vm273_vm5 = vcmp.ge.s32.totalorder %v272_v57, 0  ;;  %v1085_v13 = vsel %vm2789_vm15, 1, %v2440_v0 }
  0x77   : > { %vm3927_vm6 = vmmov %vm3926_vm0  ;;  %v528_v15 = vsel %vm271_vm11, 1, %v2440_v0  ;;  %vm3929_vm11 = vcmp.lt.s32.totalorder %v2765_v4, 49 }
  0x79   : > { %439 = vrot.lane.b32.xlu1 %v2709_v38, %s2446_s29  ;;  %458 = vperm.xlu0 %2226, %v2698_v3   ;;  %s2482_s29 = smov 16  }
  0x7d   : > { %481 = vrot.lane.b32.xlu1 %v2709_v38, %s2448_s4  ;;  %2227 = vset.pattern.permute.xlu0 %v2449_v39  ;;  %v421_v39 = vsel %vm413_vm9, 1, %v2440_v0  ;;  %s2485_s4 = smov 126  }
  0x7e   : > { %500 = vperm.xlu0 %2227, %v2698_v3  }
  0x81   : > { %521 = vrot.lane.b32.xlu1 %v2703_v35, %s2450_s5 }
  0x82   : > { %2228 = vset.pattern.permute.xlu0 %v2451_v40  ;;  %v452_v40 = vrot.slane %v444_v29, %v2769_v8 }
  0x83   : > { %542 = vperm.xlu0 %2228, %v2698_v3  }
  0x84   : > { %vm2872_vm4 = vcmp.ne.s32.totalorder %v452_v40, 0 }
  0x85   : > { %523 = vrot.lane.b32.xlu1 %v2709_v38, %s2450_s5  ;;  %v3911_v56 = vsel %vm2872_vm4, 4294967295, %v3910_v56  ;;  %s2486_s5 = smov 15  }
  0x87   : > { %2229 = vset.pattern.permute.xlu0 %v2452_v41  ;;  %v2847_v41 = vsel %vm267_vm10, 1, %v2440_v0  ;;  %vm2888_vm10 = vcmp.eq.s32.totalorder %v388_v45, 1 }
  0x88   : > { %584 = vperm.xlu0 %2229, %v2698_v3  }
  0x89   : > { %563 = vrot.lane.b32.xlu1 %v2703_v35, %s2453_s6 }
  0x8c   : > { %2230 = vset.pattern.permute.xlu0 %v2454_v42 }
  0x8d   : > { %565 = vrot.lane.b32.xlu1 %v2709_v38, %s2453_s6  ;;  %615 = vperm.xlu0 %2230, %v2698_v3   ;;  %s2488_s6 = smov 14  }
  0x91   : > { %605 = vrot.lane.b32.xlu1 %v2703_v35, %s2455_s7  ;;  %2231 = vset.pattern.permute.xlu0 %v2456_v43  ;;  %v346_v43 = vrot.slane %v338_v30, %v2759_v63 }
  0x92   : > { %646 = vperm.xlu0 %2231, %v2698_v3  }
  0x93   : > { %vm2877_vm7 = vcmp.eq.s32.totalorder %v346_v43, 1 }
  0x95   : > { %607 = vrot.lane.b32.xlu1 %v2709_v38, %s2455_s7  ;;  %s2491_s7 = smov 13  }
  0x96   : > { %2232 = vset.pattern.permute.xlu0 %v2457_v44  ;;  %v384_v44 = vrot.slane %v379_v31, %v2759_v63 }
  0x97   : > { %677 = vperm.xlu0 %2232, %v2698_v3  }
  0x98   : > { %vm2884_vm9 = vcmp.eq.s32.totalorder %v384_v44, 1 }
  0x99   : > { %636 = vrot.lane.b32.xlu1 %v2703_v35, %s2459_s11 }
  0x9b   : > { %2233 = vset.pattern.permute.xlu0 %v2460_v46  ;;  %v430_v46 = vrot.slane %v422_v37, %v2759_v63 }
  0x9c   : > { %708 = vperm.xlu0 %2233, %v2698_v3  }
  0x9d   : > { %638 = vrot.lane.b32.xlu1 %v2709_v38, %s2459_s11  ;;  %vm2899_vm3 = vcmp.eq.s32.totalorder %v430_v46, 1  ;;  %v3933_v46 = vmov 0  ;;  %s2492_s11 = smov 113  }
  0x9e   : > { %v3919_v1 = vsel %vm2899_vm3, 4294967295, %v3918_v1 }
  0xa0   : > { %2234 = vset.pattern.permute.xlu0 %v2461_v47  ;;  %v448_v47 = vrot.slane %v444_v29, %v2759_v63 }
  0xa1   : > { %667 = vrot.lane.b32.xlu1 %v2703_v35, %s2462_s17  ;;  %739 = vperm.xlu0 %2234, %v2698_v3  }
  0xa2   : > { %vm2903_vm8 = vcmp.ne.s32.totalorder %v448_v47, 0 }
  0xa5   : > { %669 = vrot.lane.b32.xlu1 %v2709_v38, %s2462_s17  ;;  %2235 = vset.pattern.permute.xlu0 %v2463_v48  ;;  %v2484_v48 = vmov 26   ;;  %s2494_s17 = smov 3  }
  0xa6   : > { %770 = vperm.xlu0 %2235, %v2698_v3  }
  0xa9   : > { %698 = vrot.lane.b32.xlu1 %v2703_v35, %s2464_s10 }
  0xaa   : > { %2236 = vset.pattern.permute.xlu0 %v2465_v49 }
  0xab   : > { %801 = vperm.xlu0 %2236, %v2698_v3  }
  0xad   : > { %700 = vrot.lane.b32.xlu1 %v2709_v38, %s2464_s10  ;;  %s2496_s10 = smov 2  }
  0xaf   : > { %2237 = vset.pattern.permute.xlu0 %v2466_v50 }
  0xb0   : > { %832 = vperm.xlu0 %2237, %v2698_v3  }
  0xb1   : > { %729 = vrot.lane.b32.xlu1 %v2703_v35, %s2467_s21 }
  0xb4   : > { %2238 = vset.pattern.permute.xlu0 %v2468_v51  ;;  %v426_v51 = vrot.slane %v421_v39, %v2759_v63 }
  0xb5   : > { %731 = vrot.lane.b32.xlu1 %v2709_v38, %s2467_s21  ;;  %863 = vperm.xlu0 %2238, %v2698_v3   ;;  %s2499_s21 = smov 1  }
  0xb9   : > { %760 = vrot.lane.b32.xlu1 %v2703_v35, %s2469_s22  ;;  %2239 = vset.pattern.permute.xlu0 %v2470_v52  ;;  %v490_v52 = vrot.slane %v2847_v41, %v2759_v63 }
  0xba   : > { %894 = vperm.xlu0 %2239, %v2698_v3  }
  0xbb   : > { %vm2916_vm14 = vcmp.ne.s32.totalorder %v490_v52, 0 }
  0xbc   : > { %v3925_v10 = vsel %vm2916_vm14, 4294967295, %v3924_v10 }
  0xbd   : > { %762 = vrot.lane.b32.xlu1 %v2709_v38, %s2469_s22  ;;  %s2507_s22 = smov 125  }
  0xbe   : > { %2240 = vset.pattern.permute.xlu0 %v2471_v53 }
  0xbf   : > { %925 = vperm.xlu0 %2240, %v2698_v3  }
  0xc1   : > { %791 = vrot.lane.b32.xlu1 %v2703_v35, %s2472_s23 }
  0xc3   : > { %2241 = vset.pattern.permute.xlu0 %v2473_v55 }
  0xc4   : > { %956 = vperm.xlu0 %2241, %v2698_v3  }
  0xc5   : > { %793 = vrot.lane.b32.xlu1 %v2709_v38, %s2472_s23  ;;  %s2509_s23 = smov 115  }
  0xc8   : > { %2242 = vset.pattern.permute.xlu0 %v2474_v60 }
  0xc9   : > { %822 = vrot.lane.b32.xlu1 %v2703_v35, %s2475_s25  ;;  %987 = vperm.xlu0 %2242, %v2698_v3  }
  0xcd   : > { %824 = vrot.lane.b32.xlu1 %v2709_v38, %s2475_s25  ;;  %2243 = vset.pattern.permute.xlu0 %v2476_v62  ;;  %s2512_s25 = smov 114  }
  0xce   : > { %1018 = vperm.xlu0 %2243, %v2698_v3  }
  0xd1   : > { %853 = vrot.lane.b32.xlu1 %v2703_v35, %s2477_s18 }
  0xd2   : > { %2244 = vset.pattern.permute.xlu0 %v2478_v7  ;;  %v464_v7 = vsel %vm2872_vm4, 1, %v2440_v0  ;;  %vm3928_vm4 = vcmp.ge.s32.totalorder %v2765_v4, 48 }
  0xd3   : > { %1049 = vperm.xlu0 %2244, %v2698_v3   ;;  %vm455_vm1 = vmand %vm3928_vm4, %vm2903_vm8  ;;  %v472_v45 = vrot.slane %v464_v7, %v2759_v63 }
  0xd4   : > { %v463_v36 = vsel %vm455_vm1, 1, %v2440_v0 }
  0xd5   : > { %v2772_v9 = vpop.permute.xlu1 %332  ;;  %855 = vrot.lane.b32.xlu1 %v2709_v38, %s2477_s18  ;;  %v2776_v11 = vpop.permute.xlu0 %416  ;;  %v468_v47 = vrot.slane %v463_v36, %v2759_v63  ;;  %s2518_s18 = smov 112  }
  0xd7   : > { %2245 = vset.pattern.permute.xlu0 %v2479_v17 }
  0xd8   : > { %1080 = vperm.xlu0 %2245, %v2698_v3  }
  0xd9   : > { %884 = vrot.lane.b32.xlu1 %v2703_v35, %s2480_s28 }
  0xda   : > { %v2795_v20 = vpop.permute.xlu1 %374 }
  0xdb   : > { %v310_v22 = vpop.permute.xlu0 %309 }
  0xdc   : > { %2246 = vset.pattern.permute.xlu0 %v2481_v27 }
  0xdd   : > { %886 = vrot.lane.b32.xlu1 %v2709_v38, %s2480_s28  ;;  %1111 = vperm.xlu0 %2246, %v2698_v3   ;;  %s2520_s28 = smov 111  }
  0xde   : > { %v354_v28 = vpop.permute.xlu1 %353 }
  0xdf   : > { %v2838_v34 = vpop.permute.xlu0 %395 }
  0xe1   : > { %915 = vrot.lane.b32.xlu1 %v2703_v35, %s2482_s29  ;;  %1158 = vrot.lane.b32.xlu0 %v2709_v38, %s2483_s30 }
  0xe2   : > { %v2849_v42 = vpop.permute.xlu1 %437  ;;  %2249 = vset.pattern.permute.xlu0 %v2484_v48  ;;  %v536_v48 = vrot.slane %v528_v15, %v2769_v8 }
  0xe3   : > { %v312_v50 = vpop.permute.xlu0 %311 }
  0xe4   : > { %v314_v53 = vsel %vm313_vm13, %v310_v22, %v312_v50  ;;  %v315_v55 = vsel %vm313_vm13, %v312_v50, %v310_v22  ;;  %vm2907_vm13 = vcmp.eq.s32.totalorder %v426_v51, 1 }
  0xe5   : > { %917 = vrot.lane.b32.xlu1 %v2709_v38, %s2482_s29  ;;  %1187 = vrot.lane.b32.xlu0 %v2703_v35, %s2485_s4  ;;  %v335_v54 = vmul.f32 %v2772_v9, %v315_v55  ;;  %v336_v62 = vmul.f32 %v2772_v9, %v314_v53  ;;  %v494_v9 = vrot.slane %v2847_v41, %v2769_v8  ;;  %v2487_v41 = vmov 27   ;;  %s2521_s29 = smov 110  }
  0xe6   : > { %v2881_v59 = vpop.permute.xlu1 %479  ;;  %v3935_v53 = vmov 0 }
  0xe7   : > { %v356_v5 = vpop.permute.xlu0 %355  ;;  %v349_v22 = vsel %vm2860_vm2, %v335_v54, 0.0  ;;  %v350_v25 = vsel %vm2877_vm7, %v336_v62, 0.0  ;;  %vm2966_vm1 = vcmp.ne.s32.totalorder %v494_v9, 0  ;;  %v3939_v54 = vmov 0 }
  0xe8   : > { %v358_v12 = vsel %vm3926_vm0, %v354_v28, %v356_v5  ;;  %v359_v14 = vsel %vm3927_vm6, %v356_v5, %v354_v28  ;;  %vm274_vm0 = vcmp.lt.s32.totalorder %v272_v57, 16  ;;  %vm3930_vm6 = vmmov %vm3929_vm11  ;;  %v3934_v46 = vsel %vm2966_vm1, 4294967295, %v3933_v46 }
  0xe9   : > { %v377_v16 = vmul.f32 %v2795_v20, %v359_v14  ;;  %v378_v17 = vmul.f32 %v2795_v20, %v358_v12  ;;  %946 = vrot.lane.b32.xlu1 %v2703_v35, %s2486_s5  ;;  %1197 = vperm.xlu0 %2249, %v2698_v3   ;;  %vm2951_vm2 = vmand %vm273_vm5, %vm274_vm0  ;;  %vm441_vm5 = vcmp.lt.s32.totalorder %v2765_v4, 48  ;;  %v506_v52 = vsel %vm2966_vm1, 1, %v2440_v0 }
  0xea   : > { %v398_v19 = vpop.permute.xlu1 %397  ;;  %v570_v49 = vsel %vm2951_vm2, 1, %v2440_v0  ;;  %v2489_v57 = vmov 28   ;;  %vm2987_vm0 = vcmp.eq.s32.totalorder %v468_v47, 1  ;;  %v3941_v5 = vmov 0  ;;  %vm3943_vm2 = vmmov %vm3928_vm4 }
  0xeb   : > { %v400_v20 = vsel %vm3929_vm11, %v2838_v34, %v398_v19  ;;  %v401_v27 = vsel %vm3930_vm6, %v398_v19, %v2838_v34  ;;  %v391_v28 = vsel %vm2884_vm9, %v377_v16, 0.0  ;;  %v392_v29 = vsel %vm2888_vm10, %v378_v17, 0.0  ;;  %vm497_vm9 = vmand %vm3928_vm4, %vm2916_vm14 }
  0xec   : > { %v419_v30 = vmul.f32 %v2776_v11, %v401_v27  ;;  %v420_v31 = vmul.f32 %v2776_v11, %v400_v20  ;;  %v393_v32 = vadd.f32 %v391_v28, %v349_v22  ;;  %v394_v33 = vadd.f32 %v392_v29, %v350_v25 }
  0xed   : > { %948 = vrot.lane.b32.xlu1 %v2709_v38, %s2486_s5  ;;  %v532_v11 = vrot.slane %v528_v15, %v2759_v63  ;;  %2250 = vset.pattern.permute.xlu0 %v2487_v41  ;;  %v505_v50 = vsel %vm497_vm9, 1, %v2440_v0  ;;  %v574_v55 = vrot.slane %v570_v49, %v2759_v63  ;;  %vm2991_vm11 = vcmp.eq.s32.totalorder %v472_v45, 1  ;;  %s2524_s5 = smov 99  }
  0xee   : > { %v433_v34 = vsel %vm2907_vm13, %v419_v30, 0.0  ;;  %v434_v39 = vsel %vm2899_vm3, %v420_v31, 0.0  ;;  %v440_v40 = vpop.permute.xlu1 %439  ;;  %1228 = vperm.xlu0 %2250, %v2698_v3   ;;  %v3940_v54 = vsel %vm2991_vm11, 4294967295, %v3939_v54  ;;  %v510_v62 = vrot.slane %v505_v50, %v2759_v63 }
  0xef   : > { %v435_v43 = vadd.f32 %v433_v34, %v393_v32  ;;  %v436_v44 = vadd.f32 %v434_v39, %v394_v33  ;;  %vm2982_vm13 = vcmp.ne.s32.totalorder %v532_v11, 0  ;;  %vm2996_vm6 = vcmp.ne.s32.totalorder %v536_v48, 0 }
  0xf0   : > { %v3936_v53 = vsel %vm2982_vm13, 4294967295, %v3935_v53  ;;  %v3942_v5 = vsel %vm2996_vm6, 4294967295, %v3941_v5  ;;  %v442_v6 = vsel %vm441_vm5, %v2849_v42, %v440_v40  ;;  %v443_v7 = vsel %vm441_vm5, %v440_v40, %v2849_v42  ;;  %vm539_vm4 = vmand %vm3943_vm2, %vm2982_vm13 }
  0xf1   : > { %977 = vrot.lane.b32.xlu1 %v2703_v35, %s2488_s6  ;;  %v514_v12 = vrot.slane %v506_v52, %v2759_v63  ;;  %v578_v17 = vrot.slane %v570_v49, %v2769_v8  ;;  %v548_v42 = vsel %vm2996_vm6, 1, %v2440_v0  ;;  %vm3014_vm5 = vcmp.ne.s32.totalorder %v574_v55, 0 }
  0xf2   : > { %v482_v51 = vpop.permute.xlu1 %481  ;;  %2251 = vset.pattern.permute.xlu0 %v2489_v57  ;;  %v3944_v19 = vmov 0  ;;  %v547_v20 = vsel %vm539_vm4, 1, %v2440_v0  ;;  %v2490_v27 = vmov 29   ;;  %vm3023_vm2 = vcmp.eq.s32.totalorder %v510_v62, 1 }
  0xf3   : > { %1259 = vperm.xlu0 %2251, %v2698_v3   ;;  %v3945_v19 = vsel %vm3014_vm5, 4294967295, %v3944_v19  ;;  %vm3027_vm9 = vcmp.eq.s32.totalorder %v514_v12, 1  ;;  %v3948_v30 = vmov 0  ;;  %v556_v37 = vrot.slane %v548_v42, %v2759_v63 }
  0xf4   : > { %v459_v9 = vpop.permute.xlu0 %458  ;;  %v3949_v30 = vsel %vm3027_vm9, 4294967295, %v3948_v30  ;;  %vm3040_vm6 = vcmp.ne.s32.totalorder %v578_v17, 0  ;;  %v3952_v34 = vmov 0  ;;  %vm3954_vm1 = vcmp.ge.s32.totalorder %v2765_v4, 48 }
  0xf5   : > { %v461_v14 = vmul.f32 %v459_v9, %v443_v7  ;;  %v462_v15 = vmul.f32 %v459_v9, %v442_v6  ;;  %979 = vrot.lane.b32.xlu1 %v2709_v38, %s2488_s6  ;;  %v3953_v34 = vsel %vm3040_vm6, 4294967295, %v3952_v34  ;;  %vm581_vm13 = vmand %vm3954_vm1, %vm3014_vm5  ;;  %v552_v11 = vrot.slane %v547_v20, %v2759_v63  ;;  %s2525_s6 = smov 98  }
  0xf6   : > { %v522_v16 = vpop.permute.xlu1 %521  ;;  %vm3061_vm1 = vcmp.eq.s32.totalorder %v556_v37, 1  ;;  %v2493_v50 = vmov 32  }
  0xf7   : > { %v475_v22 = vsel %vm2987_vm0, %v461_v14, 0.0  ;;  %v476_v25 = vsel %vm2991_vm11, %v462_v15, 0.0  ;;  %2252 = vset.pattern.permute.xlu0 %v2490_v27  ;;  %vm3950_vm0 = vcmp.lt.s32.totalorder %v2765_v4, 47 }
  0xf8   : > { %v477_v8 = vadd.f32 %v475_v22, %v435_v43  ;;  %v478_v28 = vadd.f32 %v476_v25, %v436_v44  ;;  %1290 = vperm.xlu0 %2252, %v2698_v3   ;;  %v484_v32 = vsel %vm3950_vm0, %v2881_v59, %v482_v51  ;;  %vm3951_vm4 = vmmov %vm3950_vm0  ;;  %vm525_vm0 = vcmp.lt.s32.totalorder %v2765_v4, 46 }
  0xf9   : > { %1008 = vrot.lane.b32.xlu1 %v2703_v35, %s2491_s7  ;;  %v485_v33 = vsel %vm3951_vm4, %v482_v51, %v2881_v59  ;;  %v501_v36 = vpop.permute.xlu0 %500  ;;  %v589_v43 = vsel %vm581_vm13, 1, %v2440_v0  ;;  %v590_v44 = vsel %vm3040_vm6, 1, %v2440_v0  ;;  %vm557_vm13 = vcmp.eq.s32.totalorder %v552_v11, 1 }
  0xfa   : > { %v524_v31 = vpop.permute.xlu1 %523  ;;  %v503_v39 = vmul.f32 %v501_v36, %v485_v33  ;;  %v504_v40 = vmul.f32 %v501_v36, %v484_v32  ;;  %vm567_vm4 = vcmp.lt.s32.totalorder %v2765_v4, 45  ;;  %v594_v62 = vrot.slane %v589_v43, %v2759_v63 }
  0xfb   : > { %v526_v51 = vsel %vm525_vm0, %v522_v16, %v524_v31  ;;  %v527_v52 = vsel %vm525_vm0, %v524_v31, %v522_v16  ;;  %v598_v6 = vrot.slane %v590_v44, %v2759_v63 }
  0xfc   : > { %v517_v59 = vsel %vm3023_vm2, %v503_v39, 0.0  ;;  %v518_v41 = vsel %vm3027_vm9, %v504_v40, 0.0  ;;  %1311 = vrot.lane.b32.xlu0 %v2703_v35, %s2492_s11  ;;  %vm282_vm2 = vcmp.ge.s32.totalorder %v2765_v4, 32  ;;  %vm599_vm0 = vcmp.eq.s32.totalorder %v594_v62, 1 }
  0xfd   : > { %v519_v45 = vadd.f32 %v517_v59, %v477_v8  ;;  %v520_v47 = vadd.f32 %v518_v41, %v478_v28  ;;  %1010 = vrot.lane.b32.xlu1 %v2709_v38, %s2491_s7  ;;  %2255 = vset.pattern.permute.xlu0 %v2493_v50  ;;  %vm612_vm6 = vmand %vm282_vm2, %vm2780_vm12  ;;  %vm3081_vm5 = vcmp.eq.s32.totalorder %v598_v6, 1  ;;  %v2495_v8 = vmov 33   ;;  %s2526_s7 = smov 97  }
  0xfe   : > { %v564_v48 = vpop.permute.xlu1 %563  ;;  %v543_v55 = vpop.permute.xlu0 %542  ;;  %v620_v25 = vsel %vm612_vm6, 1, %v2440_v0  ;;  %vm643_vm6 = vmand %vm282_vm2, %vm2789_vm15  ;;  %v2497_v40 = vmov 34  }
  0xff   : > { %v545_v57 = vmul.f32 %v543_v55, %v527_v52  ;;  %v546_v60 = vmul.f32 %v543_v55, %v526_v51  ;;  %v625_v32 = vrot.slane %v620_v25, %v2759_v63  ;;  %v651_v44 = vsel %vm643_vm6, 1, %v2440_v0 }
 0x100   : > { %1383 = vperm.xlu0 %2255, %v2698_v3   ;;  %v656_v52 = vrot.slane %v651_v44, %v2759_v63  ;;  %v2498_v55 = vmov 35  }
 0x101   : > { %v559_v7 = vsel %vm557_vm13, %v545_v57, 0.0  ;;  %v560_v9 = vsel %vm3061_vm1, %v546_v60, 0.0  ;;  %1039 = vrot.lane.b32.xlu1 %v2703_v35, %s2494_s17  ;;  %vm609_vm13 = vcmp.lt.s32.totalorder %v2765_v4, 35 }
 0x102   : > { %v566_v12 = vpop.permute.xlu1 %565  ;;  %v561_v14 = vadd.f32 %v559_v7, %v519_v45  ;;  %v562_v15 = vadd.f32 %v560_v9, %v520_v47 }
 0x103   : > { %v568_v16 = vsel %vm567_vm4, %v564_v48, %v566_v12  ;;  %v569_v17 = vsel %vm567_vm4, %v566_v12, %v564_v48  ;;  %v585_v22 = vpop.permute.xlu0 %584  ;;  %vm630_vm4 = vcmp.eq.s32.totalorder %v625_v32, 1 }
 0x104   : > { %v587_v20 = vmul.f32 %v585_v22, %v569_v17  ;;  %v588_v27 = vmul.f32 %v585_v22, %v568_v16  ;;  %2256 = vset.pattern.permute.xlu0 %v2495_v8  ;;  %v2501_v8 = vmov 37  }
 0x105   : > { %1041 = vrot.lane.b32.xlu1 %v2709_v38, %s2494_s17  ;;  %1414 = vperm.xlu0 %2256, %v2698_v3   ;;  %s2528_s17 = smov 95  }
 0x106   : > { %v606_v28 = vpop.permute.xlu1 %605  ;;  %v601_v29 = vsel %vm599_vm0, %v587_v20, 0.0  ;;  %v602_v31 = vsel %vm3081_vm5, %v588_v27, 0.0  ;;  %vm640_vm0 = vcmp.lt.s32.totalorder %v2765_v4, 34 }
 0x107   : > { %v603_v33 = vadd.f32 %v601_v29, %v561_v14  ;;  %v604_v36 = vadd.f32 %v602_v31, %v562_v15  ;;  %v2500_v14 = vmov 36  }
 0x108   : > { %v616_v37 = vpop.permute.xlu0 %615 }
 0x109   : > { %1070 = vrot.lane.b32.xlu1 %v2703_v35, %s2496_s10  ;;  %2257 = vset.pattern.permute.xlu0 %v2497_v40 }
 0x10a   : > { %v608_v39 = vpop.permute.xlu1 %607  ;;  %1445 = vperm.xlu0 %2257, %v2698_v3  }
 0x10b   : > { %v610_v11 = vsel %vm609_vm13, %v606_v28, %v608_v39  ;;  %v611_v59 = vsel %vm609_vm13, %v608_v39, %v606_v28  ;;  %vm3959_vm13 = vnez %v3901_v21 }
 0x10c   : > { %v618_v41 = vmul.f32 %v616_v37, %v611_v59  ;;  %v619_v43 = vmul.f32 %v616_v37, %v610_v11  ;;  %vm674_vm6 = vmand %vm282_vm2, %vm3959_vm13  ;;  %v2502_v11 = vmov 38  }
 0x10d   : > { %1072 = vrot.lane.b32.xlu1 %v2709_v38, %s2496_s10  ;;  %v647_v57 = vpop.permute.xlu0 %646  ;;  %v682_v12 = vsel %vm674_vm6, 1, %v2440_v0  ;;  %vm705_vm6 = vmand %vm282_vm2, %vm2903_vm8  ;;  %s2529_s10 = smov 94  }
 0x10e   : > { %v632_v45 = vsel %vm630_vm4, %v618_v41, 0.0  ;;  %v633_v47 = vsel %vm2877_vm7, %v619_v43, 0.0  ;;  %v637_v48 = vpop.permute.xlu1 %636  ;;  %2258 = vset.pattern.permute.xlu0 %v2498_v55  ;;  %vm661_vm4 = vcmp.eq.s32.totalorder %v656_v52, 1  ;;  %v687_v20 = vrot.slane %v682_v12, %v2759_v63 }
 0x10f   : > { %v634_v50 = vadd.f32 %v632_v45, %v603_v33  ;;  %v635_v51 = vadd.f32 %v633_v47, %v604_v36  ;;  %1476 = vperm.xlu0 %2258, %v2698_v3   ;;  %v713_v36 = vsel %vm705_vm6, 1, %v2440_v0  ;;  %v2503_v43 = vmov 25   ;;  %vm736_vm6 = vmand %vm282_vm2, %vm2916_vm14 }
 0x110   : > { %v718_v44 = vrot.slane %v713_v36, %v2759_v63 }
 0x111   : > { %1101 = vrot.lane.b32.xlu1 %v2703_v35, %s2499_s21 }
 0x112   : > { %v639_v60 = vpop.permute.xlu1 %638  ;;  %v678_v27 = vpop.permute.xlu0 %677 }
 0x113   : > { %v641_v62 = vsel %vm640_vm0, %v637_v48, %v639_v60  ;;  %v642_v6 = vsel %vm640_vm0, %v639_v60, %v637_v48  ;;  %2259 = vset.pattern.permute.xlu0 %v2500_v14  ;;  %vm671_vm0 = vcmp.lt.s32.totalorder %v2765_v4, 33  ;;  %v2505_v14 = vmov 30  }
 0x114   : > { %v649_v7 = vmul.f32 %v647_v57, %v642_v6  ;;  %v650_v9 = vmul.f32 %v647_v57, %v641_v62  ;;  %1507 = vperm.xlu0 %2259, %v2698_v3   ;;  %v744_v57 = vsel %vm736_vm6, 1, %v2440_v0  ;;  %vm3960_vm6 = vnez %v3936_v53 }
 0x115   : > { %1103 = vrot.lane.b32.xlu1 %v2709_v38, %s2499_s21  ;;  %v749_v12 = vrot.slane %v744_v57, %v2759_v63  ;;  %v2511_v57 = vmov 43   ;;  %s2530_s21 = smov 93  }
 0x116   : > { %v663_v15 = vsel %vm661_vm4, %v649_v7, 0.0  ;;  %v664_v16 = vsel %vm2888_vm10, %v650_v9, 0.0  ;;  %v668_v17 = vpop.permute.xlu1 %667  ;;  %vm692_vm4 = vcmp.eq.s32.totalorder %v687_v20, 1 }
 0x117   : > { %v665_v22 = vadd.f32 %v663_v15, %v634_v50  ;;  %v666_v25 = vadd.f32 %v664_v16, %v635_v51  ;;  %v709_v45 = vpop.permute.xlu0 %708  ;;  %v2504_v51 = vmov 39   ;;  %v2506_v15 = vmov 40  }
 0x118   : > { %2260 = vset.pattern.permute.xlu0 %v2501_v8 }
 0x119   : > { %1135 = vperm.xlu1 %2247, %v2698_v3   ;;  %1538 = vperm.xlu0 %2260, %v2698_v3  }
 0x11a   : > { %v670_v28 = vpop.permute.xlu1 %669 }
 0x11b   : > { %v672_v29 = vsel %vm671_vm0, %v668_v17, %v670_v28  ;;  %v673_v31 = vsel %vm671_vm0, %v670_v28, %v668_v17  ;;  %vm702_vm0 = vcmp.lt.s32.totalorder %v2765_v4, 32  ;;  %v2508_v28 = vmov 41  }
 0x11c   : > { %v680_v32 = vmul.f32 %v678_v27, %v673_v31  ;;  %v681_v33 = vmul.f32 %v678_v27, %v672_v29  ;;  %v740_v16 = vpop.permute.xlu0 %739 }
 0x11d   : > { %1156 = vrot.lane.b32.xlu1 %v2703_v35, %s2483_s30  ;;  %2261 = vset.pattern.permute.xlu0 %v2502_v11  ;;  %v2510_v11 = vmov 42   ;;  %s2522_s30 = smov 77  }
 0x11e   : > { %v694_v37 = vsel %vm692_vm4, %v680_v32, 0.0  ;;  %v695_v39 = vsel %vm2899_vm3, %v681_v33, 0.0  ;;  %v699_v40 = vpop.permute.xlu1 %698  ;;  %2248 = vset.pattern.permute.xlu1 %v2503_v43  ;;  %1569 = vperm.xlu0 %2261, %v2698_v3   ;;  %vm723_vm4 = vcmp.eq.s32.totalorder %v718_v44, 1  ;;  %v3154_v32 = vld [vmem:[#allocation2] sm:$0x3] }
 0x11f   : > { %v696_v59 = vadd.f32 %v694_v37, %v665_v22  ;;  %v697_v41 = vadd.f32 %v695_v39, %v666_v25 }
 0x121   : > { %1166 = vperm.xlu1 %2248, %v2698_v3   ;;  %v771_v39 = vpop.permute.xlu0 %770 }
 0x122   : > { %v701_v47 = vpop.permute.xlu1 %700  ;;  %2262 = vset.pattern.permute.xlu0 %v2504_v51 }
 0x123   : > { %v703_v48 = vsel %vm702_vm0, %v699_v40, %v701_v47  ;;  %v704_v50 = vsel %vm702_vm0, %v701_v47, %v699_v40  ;;  %1600 = vperm.xlu0 %2262, %v2698_v3   ;;  %vm733_vm0 = vcmp.lt.s32.totalorder %v2765_v4, 31 }
 0x124   : > { %v711_v52 = vmul.f32 %v709_v45, %v704_v50  ;;  %v712_v55 = vmul.f32 %v709_v45, %v703_v48 }
 0x125   : > { %1189 = vrot.lane.b32.xlu1 %v2709_v38, %s2485_s4  ;;  %s2523_s4 = smov 109  }
 0x126   : > { %v725_v60 = vsel %vm723_vm4, %v711_v52, 0.0  ;;  %v726_v62 = vsel %vm2991_vm11, %v712_v55, 0.0  ;;  %v730_v6 = vpop.permute.xlu1 %729  ;;  %2253 = vset.pattern.permute.xlu1 %v2505_v14  ;;  %vm767_vm4 = vmand %vm282_vm2, %vm3960_vm6  ;;  %vm754_vm11 = vcmp.eq.s32.totalorder %v749_v12, 1 }
 0x127   : > { %v727_v7 = vadd.f32 %v725_v60, %v696_v59  ;;  %v728_v9 = vadd.f32 %v726_v62, %v697_v41  ;;  %2263 = vset.pattern.permute.xlu0 %v2506_v15  ;;  %v775_v8 = vsel %vm767_vm4, 1, %v2440_v0  ;;  %vm3961_vm4 = vnez %v3945_v19  ;;  %v802_v60 = vpop.permute.xlu0 %801 }
 0x128   : > { %1631 = vperm.xlu0 %2263, %v2698_v3   ;;  %v780_v37 = vrot.slane %v775_v8, %v2759_v63  ;;  %v2513_v15 = vmov 44  }
 0x129   : > { %1218 = vrot.lane.b32.xlu1 %v2703_v35, %s2507_s22 }
 0x12a   : > { %v732_v17 = vpop.permute.xlu1 %731 }
 0x12b   : > { %v734_v22 = vsel %vm733_vm0, %v730_v6, %v732_v17  ;;  %v735_v25 = vsel %vm733_vm0, %v732_v17, %v730_v6  ;;  %vm764_vm0 = vcmp.lt.s32.totalorder %v2765_v4, 30  ;;  %v833_v8 = vpop.permute.xlu0 %832 }
 0x12c   : > { %v742_v20 = vmul.f32 %v740_v16, %v735_v25  ;;  %v743_v27 = vmul.f32 %v740_v16, %v734_v22  ;;  %2264 = vset.pattern.permute.xlu0 %v2508_v28 }
 0x12d   : > { %1220 = vrot.lane.b32.xlu1 %v2709_v38, %s2507_s22  ;;  %1662 = vperm.xlu0 %2264, %v3154_v32   ;;  %s2531_s22 = smov 83  }
 0x12e   : > { %v756_v29 = vsel %vm754_vm11, %v742_v20, 0.0  ;;  %v757_v31 = vsel %vm3027_vm9, %v743_v27, 0.0  ;;  %v761_v3 = vpop.permute.xlu1 %760  ;;  %vm798_vm11 = vmand %vm282_vm2, %vm3961_vm4  ;;  %vm785_vm9 = vcmp.eq.s32.totalorder %v780_v37, 1  ;;  %vm286_vm2 = vcmp.ge.s32.totalorder %v2765_v4, 16 }
 0x12f   : > { %v758_v33 = vadd.f32 %v756_v29, %v727_v7  ;;  %v759_v36 = vadd.f32 %v757_v31, %v728_v9  ;;  %v806_v45 = vsel %vm798_vm11, 1, %v2440_v0 }
 0x130   : > { %v811_v55 = vrot.slane %v806_v45, %v2759_v63  ;;  %v2516_v45 = vmov 46  }
 0x131   : > { %1249 = vrot.lane.b32.xlu1 %v2703_v35, %s2509_s23  ;;  %2265 = vset.pattern.permute.xlu0 %v2510_v11  ;;  %v2515_v11 = vmov 31  }
 0x132   : > { %v763_v40 = vpop.permute.xlu1 %762  ;;  %1693 = vperm.xlu0 %2265, %v3154_v32   ;;  %vm816_vm11 = vcmp.eq.s32.totalorder %v811_v55, 1 }
 0x133   : > { %v765_v59 = vsel %vm764_vm0, %v761_v3, %v763_v40  ;;  %v766_v41 = vsel %vm764_vm0, %v763_v40, %v761_v3  ;;  %vm795_vm0 = vcmp.lt.s32.totalorder %v2765_v4, 29  ;;  %v2514_v3 = vmov 45  }
 0x134   : > { %v773_v43 = vmul.f32 %v771_v39, %v766_v41  ;;  %v774_v44 = vmul.f32 %v771_v39, %v765_v59 }
 0x135   : > { %1251 = vrot.lane.b32.xlu1 %v2709_v38, %s2509_s23  ;;  %s2532_s23 = smov 82  }
 0x136   : > { %v787_v47 = vsel %vm785_vm9, %v773_v43, 0.0  ;;  %v788_v48 = vsel %vm3061_vm1, %v774_v44, 0.0  ;;  %v792_v50 = vpop.permute.xlu1 %791  ;;  %2266 = vset.pattern.permute.xlu0 %v2511_v57  ;;  %vm829_vm9 = vmand %vm286_vm2, %vm2780_vm12 }
 0x137   : > { %v789_v51 = vadd.f32 %v787_v47, %v758_v33  ;;  %v790_v52 = vadd.f32 %v788_v48, %v759_v36  ;;  %1724 = vperm.xlu0 %2266, %v3154_v32   ;;  %v837_v14 = vsel %vm829_vm9, 1, %v2440_v0  ;;  %vm860_vm9 = vmand %vm286_vm2, %vm2789_vm15  ;;  %v864_v47 = vpop.permute.xlu0 %863  ;;  %vm3971_vm15 = vnez %v3949_v30 }
 0x138   : > { %v842_v27 = vrot.slane %v837_v14, %v2759_v63  ;;  %v868_v37 = vsel %vm860_vm9, 1, %v2440_v0  ;;  %vm891_vm9 = vmand %vm286_vm2, %vm3959_vm13 }
 0x139   : > { %1280 = vrot.lane.b32.xlu1 %v2703_v35, %s2512_s25  ;;  %v873_v44 = vrot.slane %v868_v37, %v2759_v63  ;;  %v899_v57 = vsel %vm891_vm9, 1, %v2440_v0 }
 0x13a   : > { %v794_v62 = vpop.permute.xlu1 %793  ;;  %v904_v14 = vrot.slane %v899_v57, %v2759_v63 }
 0x13b   : > { %v796_v6 = vsel %vm795_vm0, %v792_v50, %v794_v62  ;;  %v797_v7 = vsel %vm795_vm0, %v794_v62, %v792_v50  ;;  %2267 = vset.pattern.permute.xlu0 %v2513_v15  ;;  %vm826_vm0 = vcmp.lt.s32.totalorder %v2765_v4, 19  ;;  %v895_v15 = vpop.permute.xlu0 %894 }
 0x13c   : > { %v804_v9 = vmul.f32 %v802_v60, %v797_v7  ;;  %v805_v12 = vmul.f32 %v802_v60, %v796_v6  ;;  %1755 = vperm.xlu0 %2267, %v3154_v32   ;;  %v2517_v60 = vmov 47   ;;  %vm909_vm9 = vcmp.eq.s32.totalorder %v904_v14, 1 }
 0x13d   : > { %1282 = vrot.lane.b32.xlu1 %v2709_v38, %s2512_s25  ;;  %s2533_s25 = smov 81  }
 0x13e   : > { %v818_v16 = vsel %vm816_vm11, %v804_v9, 0.0  ;;  %v819_v17 = vsel %vm3081_vm5, %v805_v12, 0.0  ;;  %v823_v22 = vpop.permute.xlu1 %822  ;;  %vm847_vm11 = vcmp.eq.s32.totalorder %v842_v27, 1 }
 0x13f   : > { %v820_v25 = vadd.f32 %v818_v16, %v789_v51  ;;  %v821_v20 = vadd.f32 %v819_v17, %v790_v52  ;;  %v2519_v17 = vmov 48  }
 0x140   : > { %2268 = vset.pattern.permute.xlu0 %v2514_v3 }
 0x141   : > { %1321 = vperm.xlu1 %2253, %v3154_v32   ;;  %1786 = vperm.xlu0 %2268, %v3154_v32  }
 0x142   : > { %v825_v28 = vpop.permute.xlu1 %824 }
 0x143   : > { %v827_v29 = vsel %vm826_vm0, %v823_v22, %v825_v28  ;;  %v828_v31 = vsel %vm826_vm0, %v825_v28, %v823_v22  ;;  %vm857_vm0 = vcmp.lt.s32.totalorder %v2765_v4, 18 }
 0x144   : > { %v835_v33 = vmul.f32 %v833_v8, %v828_v31  ;;  %v836_v36 = vmul.f32 %v833_v8, %v827_v29 }
 0x145   : > { %2254 = vset.pattern.permute.xlu1 %v2515_v11  ;;  %2269 = vset.pattern.permute.xlu0 %v2516_v45  ;;  %v926_v11 = vpop.permute.xlu0 %925 }
 0x146   : > { %v849_v39 = vsel %vm847_vm11, %v835_v33, 0.0  ;;  %v850_v40 = vsel %vm2877_vm7, %v836_v36, 0.0  ;;  %v854_v59 = vpop.permute.xlu1 %853  ;;  %1352 = vperm.xlu1 %2254, %v3154_v32   ;;  %1817 = vperm.xlu0 %2269, %v3154_v32   ;;  %vm878_vm11 = vcmp.eq.s32.totalorder %v873_v44, 1 }
 0x147   : > { %v851_v41 = vadd.f32 %v849_v39, %v820_v25  ;;  %v852_v43 = vadd.f32 %v850_v40, %v821_v20 }
 0x14a   : > { %v856_v48 = vpop.permute.xlu1 %855  ;;  %1313 = vrot.lane.b32.xlu1 %v2709_v38, %s2492_s11  ;;  %2270 = vset.pattern.permute.xlu0 %v2517_v60  ;;  %s2527_s11 = smov 96  }
 0x14b   : > { %v858_v50 = vsel %vm857_vm0, %v854_v59, %v856_v48  ;;  %v859_v51 = vsel %vm857_vm0, %v856_v48, %v854_v59  ;;  %1848 = vperm.xlu0 %2270, %v3154_v32   ;;  %vm888_vm0 = vcmp.lt.s32.totalorder %v2765_v4, 17 }
 0x14c   : > { %v866_v52 = vmul.f32 %v864_v47, %v859_v51  ;;  %v867_v55 = vmul.f32 %v864_v47, %v858_v50 }
 0x14e   : > { %v880_v62 = vsel %vm878_vm11, %v866_v52, 0.0  ;;  %v881_v6 = vsel %vm2888_vm10, %v867_v55, 0.0  ;;  %v885_v7 = vpop.permute.xlu1 %884  ;;  %1342 = vrot.lane.b32.xlu1 %v2703_v35, %s2518_s18  ;;  %vm922_vm11 = vmand %vm286_vm2, %vm2903_vm8 }
 0x14f   : > { %v882_v9 = vadd.f32 %v880_v62, %v851_v41  ;;  %v883_v12 = vadd.f32 %v881_v6, %v852_v43  ;;  %2271 = vset.pattern.permute.xlu0 %v2519_v17  ;;  %v957_v41 = vpop.permute.xlu0 %956  ;;  %v930_v43 = vsel %vm922_vm11, 1, %v2440_v0  ;;  %vm981_vm11 = vcmp.lt.s32.totalorder %v2765_v4, 14 }
 0x150   : > { %1879 = vperm.xlu0 %2271, %v3154_v32   ;;  %v935_v50 = vrot.slane %v930_v43, %v2759_v63 }
 0x152   : > { %v887_v16 = vpop.permute.xlu1 %886  ;;  %1344 = vrot.lane.b32.xlu1 %v2709_v38, %s2518_s18  ;;  %s2534_s18 = smov 80  }
 0x153   : > { %v889_v22 = vsel %vm888_vm0, %v885_v7, %v887_v16  ;;  %v890_v25 = vsel %vm888_vm0, %v887_v16, %v885_v7  ;;  %vm953_vm0 = vmand %vm286_vm2, %vm2916_vm14  ;;  %vm919_vm14 = vcmp.lt.s32.totalorder %v2765_v4, 16  ;;  %v988_v52 = vpop.permute.xlu0 %987 }
 0x154   : > { %v897_v20 = vmul.f32 %v895_v15, %v890_v25  ;;  %v898_v27 = vmul.f32 %v895_v15, %v889_v22  ;;  %1869 = vrot.lane.b32.xlu0 %v2703_v35, %s2522_s30  ;;  %v961_v44 = vsel %vm953_vm0, 1, %v2440_v0  ;;  %v1054_v22 = vsel %vm2780_vm12, 1, %v2440_v0 }
 0x155   : > { %v966_v51 = vrot.slane %v961_v44, %v2759_v63  ;;  %vm1074_vm12 = vcmp.lt.s32.totalorder %v2765_v4, 2 }
 0x156   : > { %v911_v8 = vsel %vm909_vm9, %v897_v20, 0.0  ;;  %v912_v28 = vsel %vm2899_vm3, %v898_v27, 0.0  ;;  %v916_v29 = vpop.permute.xlu1 %915  ;;  %1373 = vrot.lane.b32.xlu1 %v2703_v35, %s2520_s28  ;;  %vm984_vm9 = vmand %vm286_vm2, %vm3960_vm6 }
 0x157   : > { %v3215_v31 = vadd.f32 %v911_v8, %v882_v9  ;;  %v3217_v3 = vadd.f32 %v912_v28, %v883_v12  ;;  %vm1015_vm3 = vmand %vm286_vm2, %vm3961_vm4  ;;  %v992_v45 = vsel %vm984_vm9, 1, %v2440_v0  ;;  %vm950_vm2 = vcmp.lt.s32.totalorder %v2765_v4, 15  ;;  %v1019_v15 = vpop.permute.xlu0 %1018 }
 0x158   : > { %v1023_v47 = vsel %vm1015_vm3, 1, %v2440_v0  ;;  %v997_v60 = vrot.slane %v992_v45, %v2759_v63  ;;  %vm3257_vm3 = vcmp.eq.s32.totalorder %v935_v50, 1  ;;  %vm3261_vm0 = vcmp.eq.s32.totalorder %v966_v51, 1 }
 0x159   : > { %v1028_v62 = vrot.slane %v1023_v47, %v2759_v63  ;;  %vm1043_vm4 = vcmp.lt.s32.totalorder %v2765_v4, 3 }
 0x15a   : > { %v918_v33 = vpop.permute.xlu1 %917  ;;  %1375 = vrot.lane.b32.xlu1 %v2709_v38, %s2520_s28  ;;  %vm3270_vm9 = vcmp.eq.s32.totalorder %v997_v60, 1  ;;  %s2535_s28 = smov 79  }
 0x15b   : > { %v920_v55 = vsel %vm919_vm14, %v916_v29, %v918_v33  ;;  %v921_v57 = vsel %vm919_vm14, %v918_v33, %v916_v29  ;;  %vm1012_vm14 = vcmp.lt.s32.totalorder %v2765_v4, 13 }
 0x15c   : > { %v928_v16 = vmul.f32 %v926_v11, %v921_v57  ;;  %v929_v17 = vmul.f32 %v926_v11, %v920_v55 }
 0x15e   : > { %v947_v36 = vpop.permute.xlu1 %946  ;;  %1404 = vrot.lane.b32.xlu1 %v2703_v35, %s2521_s29  ;;  %v942_v11 = vsel %vm3257_vm3, %v928_v16, 0.0  ;;  %vm1105_vm3 = vcmp.lt.s32.totalorder %v2765_v4, 1 }
 0x15f   : > { %v944_v60 = vadd.f32 %v942_v11, %v3215_v31 }
 0x162   : > { %v949_v32 = vpop.permute.xlu1 %948  ;;  %1406 = vrot.lane.b32.xlu1 %v2709_v38, %s2521_s29  ;;  %s2536_s29 = smov 78  }
 0x163   : > { %v951_v9 = vsel %vm950_vm2, %v947_v36, %v949_v32  ;;  %v952_v12 = vsel %vm950_vm2, %v949_v32, %v947_v36  ;;  %vm3274_vm2 = vcmp.eq.s32.totalorder %v1028_v62, 1 }
 0x164   : > { %v959_v28 = vmul.f32 %v957_v41, %v952_v12  ;;  %v960_v29 = vmul.f32 %v957_v41, %v951_v9 }
 0x166   : > { %v978_v37 = vpop.permute.xlu1 %977  ;;  %1435 = vrot.lane.b32.xlu1 %v2703_v35, %s2523_s4  ;;  %v973_v47 = vsel %vm3261_vm0, %v959_v28, 0.0  ;;  %v974_v50 = vsel %vm3971_vm15, %v960_v29, 0.0  ;;  %v3974_v29 = vmov 0 }
 0x167   : > { %v975_v31 = vadd.f32 %v973_v47, %v944_v60 }
 0x16a   : > { %v980_v39 = vpop.permute.xlu1 %979  ;;  %1437 = vrot.lane.b32.xlu1 %v2709_v38, %s2523_s4  ;;  %s209_s4 = scalar_lea.vmem [#allocation8], %s2688_s20 }
 0x16b   : > { %v982_v25 = vsel %vm981_vm11, %v978_v37, %v980_v39  ;;  %v983_v20 = vsel %vm981_vm11, %v980_v39, %v978_v37  ;;  %v1059_v37 = vrot.slane %v1054_v22, %v2759_v63  ;;  %v1050_v39 = vpop.permute.xlu0 %1049  ;;  %vm3970_vm11 = vnez %v3940_v54 }
 0x16c   : > { %v943_v41 = vsel %vm3970_vm11, %v929_v17, 0.0  ;;  %v990_v43 = vmul.f32 %v988_v52, %v983_v20  ;;  %v991_v44 = vmul.f32 %v988_v52, %v982_v25 }
 0x16d   : > { %v945_v52 = vadd.f32 %v943_v41, %v3217_v3  ;;  %v3972_v3 = vmov 0  ;;  %v3976_v41 = vmov 0 }
 0x16e   : > { %v1009_v40 = vpop.permute.xlu1 %1008  ;;  %1466 = vrot.lane.b32.xlu1 %v2703_v35, %s2524_s5  ;;  %v1005_v7 = vsel %vm3061_vm1, %v991_v44, 0.0 }
 0x16f   : > { %v1081_v62 = vpop.permute.xlu0 %1080  ;;  %v976_v14 = vadd.f32 %v974_v50, %v945_v52 }
 0x171   : > { %v1007_v28 = vadd.f32 %v1005_v7, %v976_v14 }
 0x172   : > { %v1011_v59 = vpop.permute.xlu1 %1010  ;;  %1468 = vrot.lane.b32.xlu1 %v2709_v38, %s2524_s5  ;;  %s1948_s5 = sshll.u32 %s209_s4, 4  ;;  %s1949_s5 = int_to_ptr.vmem [resolvable:$true] %s1948_s5 }
 0x173   : > { %v1013_v36 = vsel %vm1012_vm14, %v1009_v40, %v1011_v59  ;;  %v1014_v32 = vsel %vm1012_vm14, %v1011_v59, %v1009_v40  ;;  %v1090_v40 = vrot.slane %v1085_v13, %v2759_v63  ;;  %v1116_v59 = vsel %vm3959_vm13, 1, %v2440_v0 }
 0x174   : > { %v1021_v51 = vmul.f32 %v1019_v15, %v1014_v32  ;;  %v1022_v55 = vmul.f32 %v1019_v15, %v1013_v36  ;;  %vm3308_vm13 = vcmp.eq.s32.totalorder %v1059_v37, 1  ;;  %v1121_v15 = vrot.slane %v1116_v59, %v2759_v63  ;;  %v1112_v32 = vpop.permute.xlu0 %1111 }
 0x175   : > { %v3973_v3 = vsel %vm3308_vm13, 4294967295, %v3972_v3  ;;  %vm1160_vm14 = vcmp.lt.s32.totalorder %v2765_v4, 127 }
 0x176   : > { %v1040_v48 = vpop.permute.xlu1 %1039  ;;  %1497 = vrot.lane.b32.xlu1 %v2703_v35, %s2525_s6  ;;  %v1035_v16 = vsel %vm3274_vm2, %v1021_v51, 0.0  ;;  %v1036_v17 = vsel %vm3081_vm5, %v1022_v55, 0.0  ;;  %vm3331_vm0 = vcmp.eq.s32.totalorder %v1121_v15, 1  ;;  %v1140_v51 = vsel %vm2903_vm8, 1, %v2440_v0 }
 0x177   : > { %v1038_v36 = vadd.f32 %v1036_v17, %v1007_v28  ;;  %v3977_v41 = vsel %vm3331_vm0, 4294967295, %v3976_v41  ;;  %v1145_v60 = vrot.slane %v1140_v51, %v2759_v63  ;;  %vm3981_vm8 = vnez %v3925_v10 }
 0x178   : > { %v1159_v52 = vpop.permute.xlu0 %1158  ;;  %v1202_v10 = vsel %vm3960_vm6, 1, %v2440_v0  ;;  %vm1191_vm2 = vcmp.lt.s32.totalorder %v2765_v4, 126  ;;  %v3988_v51 = vmov 0 }
 0x17a   : > { %v1042_v6 = vpop.permute.xlu1 %1041  ;;  %1499 = vrot.lane.b32.xlu1 %v2709_v38, %s2525_s6 }
 0x17b   : > { %v1044_v18 = vsel %vm1043_vm4, %v1040_v48, %v1042_v6  ;;  %v1045_v45 = vsel %vm1043_vm4, %v1042_v6, %v1040_v48  ;;  %v1004_v6 = vsel %vm3270_vm9, %v990_v43, 0.0  ;;  %vm3317_vm4 = vcmp.eq.s32.totalorder %v1090_v40, 1 }
 0x17c   : > { %v1052_v9 = vmul.f32 %v1050_v39, %v1045_v45  ;;  %v1053_v12 = vmul.f32 %v1050_v39, %v1044_v18  ;;  %v1006_v27 = vadd.f32 %v1004_v6, %v975_v31  ;;  %v3975_v29 = vsel %vm3317_vm4, 4294967295, %v3974_v29  ;;  %v1188_v15 = vpop.permute.xlu0 %1187 }
 0x17e   : > { %v1071_v33 = vpop.permute.xlu1 %1070  ;;  %1528 = vrot.lane.b32.xlu1 %v2703_v35, %s2526_s7  ;;  %v1067_v8 = vsel %vm2877_vm7, %v1053_v12, 0.0  ;;  %v1037_v13 = vadd.f32 %v1035_v16, %v1006_v27  ;;  %vm3978_vm7 = vnez %v3919_v1  ;;  %v1207_v27 = vrot.slane %v1202_v10, %v2759_v63 }
 0x17f   : > { %v1069_v44 = vadd.f32 %v1067_v8, %v1038_v36 }
 0x180   : > { %vm3380_vm6 = vcmp.eq.s32.totalorder %v1207_v27, 1 }
 0x182   : > { %v1073_v57 = vpop.permute.xlu1 %1072  ;;  %1530 = vrot.lane.b32.xlu1 %v2709_v38, %s2526_s7 }
 0x183   : > { %v1075_v48 = vsel %vm1074_vm12, %v1071_v33, %v1073_v57  ;;  %v1076_v21 = vsel %vm1074_vm12, %v1073_v57, %v1071_v33  ;;  %v1066_v33 = vsel %vm3308_vm13, %v1052_v9, 0.0  ;;  %vm3986_vm12 = vnez %v3945_v19 }
 0x184   : > { %v1083_v22 = vmul.f32 %v1081_v62, %v1076_v21  ;;  %v1084_v25 = vmul.f32 %v1081_v62, %v1075_v48  ;;  %v1068_v43 = vadd.f32 %v1066_v33, %v1037_v13  ;;  %v3979_v48 = vmov 0  ;;  %v1198_v33 = vpop.permute.xlu0 %1197 }
 0x185   : > { %v1171_v62 = vsel %vm3981_vm8, 1, %v2440_v0  ;;  %v1233_v30 = vsel %vm3986_vm12, 1, %v2440_v0  ;;  %vm1253_vm8 = vcmp.lt.s32.totalorder %v2765_v4, 115  ;;  %vm1284_vm12 = vcmp.lt.s32.totalorder %v2765_v4, 114 }
 0x186   : > { %v1102_v20 = vpop.permute.xlu1 %1101  ;;  %1559 = vrot.lane.b32.xlu1 %v2703_v35, %s2527_s11  ;;  %v1097_v37 = vsel %vm3317_vm4, %v1083_v22, 0.0  ;;  %v1098_v39 = vsel %vm2888_vm10, %v1084_v25, 0.0  ;;  %vm3346_vm10 = vcmp.eq.s32.totalorder %v1145_v60, 1  ;;  %v1176_v14 = vrot.slane %v1171_v62, %v2759_v63 }
 0x187   : > { %v1099_v59 = vadd.f32 %v1097_v37, %v1068_v43  ;;  %v1100_v47 = vadd.f32 %v1098_v39, %v1069_v44  ;;  %v3980_v48 = vsel %vm3346_vm10, 4294967295, %v3979_v48 }
 0x188   : > { %vm3366_vm9 = vcmp.eq.s32.totalorder %v1176_v14, 1  ;;  %v1229_v19 = vpop.permute.xlu0 %1228 }
 0x18a   : > { %v1104_v11 = vpop.permute.xlu1 %1103  ;;  %1561 = vrot.lane.b32.xlu1 %v2709_v38, %s2527_s11 }
 0x18b   : > { %v1106_v58 = vsel %vm1105_vm3, %v1102_v20, %v1104_v11  ;;  %v1107_v18 = vsel %vm1105_vm3, %v1104_v11, %v1102_v20  ;;  %vm3987_vm3 = vnez %v3903_v23 }
 0x18c   : > { %v1114_v45 = vmul.f32 %v1112_v32, %v1107_v18  ;;  %v1115_v40 = vmul.f32 %v1112_v32, %v1106_v58  ;;  %v3378_v32 = vadd.s32 128, %v2765_v4 }
 0x18e   : > { %v1128_v50 = vsel %vm3331_vm0, %v1114_v45, 0.0  ;;  %v1129_v61 = vsel %vm3978_vm7, %v1115_v40, 0.0  ;;  %1590 = vrot.lane.b32.xlu1 %v2703_v35, %s2528_s17 }
 0x18f   : > { %v1130_v55 = vadd.f32 %v1128_v50, %v1099_v59  ;;  %v1131_v57 = vadd.f32 %v1129_v61, %v1100_v47  ;;  %v1238_v47 = vrot.slane %v1233_v30, %v2759_v63 }
 0x192   : > { %1592 = vrot.lane.b32.xlu1 %v2709_v38, %s2528_s17  ;;  %s1934_s17 = scalar_lea.sflag [#allocation4], %s185_s24 }
 0x194   : > { %v1136_v1 = vpop.permute.xlu1 %1135 }
 0x195   : > { %v1138_v21 = vmul.f32 %v1136_v1, %v2703_v35  ;;  %v1139_v2 = vmul.f32 %v1136_v1, %v2709_v38 }
 0x196   : > { %1621 = vrot.lane.b32.xlu1 %v2703_v35, %s2529_s10 }
 0x197   : > { %v1152_v6 = vsel %vm3346_vm10, %v1138_v21, 0.0  ;;  %v1153_v7 = vsel %vm3970_vm11, %v1139_v2, 0.0  ;;  %vm295_vm11 = vcmp.lt.s32.totalorder %v3378_v32, 240 }
 0x198   : > { %v1154_v9 = vadd.f32 %v1152_v6, %v1130_v55  ;;  %v1155_v12 = vadd.f32 %v1153_v7, %v1131_v57  ;;  %v1157_v31 = vpop.permute.xlu1 %1156  ;;  %vm1257_vm7 = vmand %vm295_vm11, %vm3987_vm3  ;;  %v1260_v7 = vpop.permute.xlu0 %1259 }
 0x199   : > { %v1161_v16 = vsel %vm1160_vm14, %v1157_v31, %v1159_v52  ;;  %v1162_v17 = vsel %vm1160_vm14, %v1159_v52, %v1157_v31  ;;  %v1265_v60 = vsel %vm1257_vm7, 1, %v2440_v0  ;;  %vm3990_vm14 = vnez %v3905_v24 }
 0x19a   : > { %1623 = vrot.lane.b32.xlu1 %v2709_v38, %s2529_s10  ;;  %v1273_v6 = vrot.slane %v1265_v60, %v2759_v63  ;;  %vm3991_vm7 = vnez %v3907_v26  ;;  %s2363_s10 = scalar_lea.vmem %s1949_s5, 128 }
 0x19b   : > { %p2364_p11 = scmp.ne.s32.totalorder %s1949_s5, %s2363_s10 }
 0x19c   : > { %v1167_v54 = vpop.permute.xlu1 %1166  ;;  %v1291_v27 = vpop.permute.xlu0 %1290 }
 0x19d   : > { %v1169_v25 = vmul.f32 %v1167_v54, %v1161_v16  ;;  %v1170_v20 = vmul.f32 %v1167_v54, %v1162_v17  ;;  %p2365_p4 = pnand %p2364_p11, %p4034_p2 }
 0x19e   : > { %1652 = vrot.lane.b32.xlu1 %v2703_v35, %s2530_s21 }
 0x19f   : > { %v1183_v53 = vsel %vm3366_vm9, %v1169_v25, 0.0  ;;  %v1184_v28 = vsel %vm3971_vm15, %v1170_v20, 0.0  ;;  %vm1222_vm15 = vcmp.lt.s32.totalorder %v2765_v4, 125  ;;  %p2366_p6 = pneg %p2365_p4 }
 0x1a0   : > { %v1185_v8 = vadd.f32 %v1183_v53, %v1154_v9  ;;  %v1186_v13 = vadd.f32 %v1184_v28, %v1155_v12  ;;  %v1190_v36 = vpop.permute.xlu1 %1189 }
 0x1a1   : > { %v1192_v37 = vsel %vm1191_vm2, %v1188_v15, %v1190_v36  ;;  %v1193_v39 = vsel %vm1191_vm2, %v1190_v36, %v1188_v15  ;;  %vm1288_vm2 = vmand %vm295_vm11, %vm3990_vm14 }
 0x1a2   : > { %v1200_v43 = vmul.f32 %v1198_v33, %v1192_v37  ;;  %v1201_v44 = vmul.f32 %v1198_v33, %v1193_v39  ;;  %1654 = vrot.lane.b32.xlu1 %v2709_v38, %s2530_s21  ;;  %v1296_v15 = vsel %vm1288_vm2, 1, %v2440_v0  ;;  %vm1315_vm2 = vcmp.lt.s32.totalorder %v2765_v4, 113 }
 0x1a3   : > { %v1304_v20 = vrot.slane %v1296_v15, %v2759_v63 }
 0x1a4   : > { %v1214_v58 = vsel %vm3380_vm6, %v1200_v43, 0.0  ;;  %v1215_v18 = vsel %vm3061_vm1, %v1201_v44, 0.0  ;;  %v1219_v45 = vpop.permute.xlu1 %1218  ;;  %vm3400_vm1 = vcmp.eq.s32.totalorder %v1238_v47, 1 }
 0x1a5   : > { %v1216_v40 = vadd.f32 %v1214_v58, %v1185_v8  ;;  %v1217_v59 = vadd.f32 %v1215_v18, %v1186_v13  ;;  %v3989_v51 = vsel %vm3400_vm1, 4294967295, %v3988_v51 }
 0x1a6   : > { %1683 = vrot.lane.b32.xlu1 %v2703_v35, %s2531_s22 }
 0x1a8   : > { %v1221_v49 = vpop.permute.xlu1 %1220 }
 0x1a9   : > { %v1223_v50 = vsel %vm1222_vm15, %v1219_v45, %v1221_v49  ;;  %v1224_v61 = vsel %vm1222_vm15, %v1221_v49, %v1219_v45  ;;  %vm1306_vm15 = vcmp.eq.s32.totalorder %v1304_v20, 1  ;;  %v1312_v45 = vpop.permute.xlu0 %1311 }
 0x1aa   : > { %v1231_v55 = vmul.f32 %v1229_v19, %v1223_v50  ;;  %v1232_v57 = vmul.f32 %v1229_v19, %v1224_v61  ;;  %1685 = vrot.lane.b32.xlu1 %v2709_v38, %s2531_s22 }
 0x1ac   : > { %v1245_v52 = vsel %vm3400_vm1, %v1231_v55, 0.0  ;;  %v1246_v1 = vsel %vm3081_vm5, %v1232_v57, 0.0  ;;  %v1250_v21 = vpop.permute.xlu1 %1249  ;;  %vm1275_vm5 = vcmp.eq.s32.totalorder %v1273_v6, 1 }
 0x1ad   : > { %v1247_v2 = vadd.f32 %v1245_v52, %v1216_v40  ;;  %v1248_v62 = vadd.f32 %v1246_v1, %v1217_v59 }
 0x1ae   : > { %1714 = vrot.lane.b32.xlu1 %v2703_v35, %s2532_s23 }
 0x1b0   : > { %v1252_v9 = vpop.permute.xlu1 %1251 }
 0x1b1   : > { %v1254_v12 = vsel %vm1253_vm8, %v1250_v21, %v1252_v9  ;;  %v1255_v42 = vsel %vm1253_vm8, %v1252_v9, %v1250_v21  ;;  %vm1319_vm8 = vmand %vm295_vm11, %vm3991_vm7 }
 0x1b2   : > { %v1262_v31 = vmul.f32 %v1260_v7, %v1254_v12  ;;  %v1263_v14 = vmul.f32 %v1260_v7, %v1255_v42  ;;  %1716 = vrot.lane.b32.xlu1 %v2709_v38, %s2532_s23  ;;  %v1327_v30 = vsel %vm1319_vm8, 1, %v2440_v0  ;;  %vm1346_vm8 = vcmp.lt.s32.totalorder %v2765_v4, 112 }
 0x1b3   : > { %v1335_v18 = vrot.slane %v1327_v30, %v2759_v63 }
 0x1b4   : > { %v1276_v10 = vsel %vm3308_vm13, %v1262_v31, 0.0  ;;  %v1277_v16 = vsel %vm1275_vm5, %v1263_v14, 0.0  ;;  %v1281_v17 = vpop.permute.xlu1 %1280  ;;  %vm3992_vm5 = vnez %v3911_v56 }
 0x1b5   : > { %v1278_v54 = vadd.f32 %v1276_v10, %v1247_v2  ;;  %v1279_v25 = vadd.f32 %v1277_v16, %v1248_v62  ;;  %v1384_v16 = vpop.permute.xlu0 %1383 }
 0x1b6   : > { %1745 = vrot.lane.b32.xlu1 %v2703_v35, %s2533_s25 }
 0x1b8   : > { %v1283_v53 = vpop.permute.xlu1 %1282 }
 0x1b9   : > { %v1285_v28 = vsel %vm1284_vm12, %v1281_v17, %v1283_v53  ;;  %v1286_v33 = vsel %vm1284_vm12, %v1283_v53, %v1281_v17  ;;  %vm1350_vm12 = vmand %vm295_vm11, %vm3992_vm5 }
 0x1ba   : > { %v1293_v8 = vmul.f32 %v1291_v27, %v1285_v28  ;;  %v1294_v13 = vmul.f32 %v1291_v27, %v1286_v33  ;;  %1747 = vrot.lane.b32.xlu1 %v2709_v38, %s2533_s25  ;;  %v1358_v50 = vsel %vm1350_vm12, 1, %v2440_v0 }
 0x1bb   : > { %v1366_v1 = vrot.slane %v1358_v50, %v2759_v63 }
 0x1bc   : > { %v1307_v36 = vsel %vm3317_vm4, %v1293_v8, 0.0  ;;  %v1308_v37 = vsel %vm1306_vm15, %v1294_v13, 0.0  ;;  %v1322_v39 = vpop.permute.xlu1 %1321  ;;  %vm1337_vm15 = vcmp.eq.s32.totalorder %v1335_v18, 1 }
 0x1bd   : > { %v1309_v43 = vadd.f32 %v1307_v36, %v1278_v54  ;;  %v1310_v44 = vadd.f32 %v1308_v37, %v1279_v25  ;;  %vm1368_vm12 = vcmp.eq.s32.totalorder %v1366_v1, 1  ;;  %v1415_v37 = vpop.permute.xlu0 %1414 }
 0x1be   : > { %1776 = vrot.lane.b32.xlu1 %v2703_v35, %s2534_s18 }
 0x1c1   : > { %v1353_v58 = vpop.permute.xlu1 %1352 }
 0x1c2   : > { %1778 = vrot.lane.b32.xlu1 %v2709_v38, %s2534_s18 }
 0x1c5   : > { %v1314_v40 = vpop.permute.xlu1 %1313 }
 0x1c6   : > { %v1316_v59 = vsel %vm1315_vm2, %v1312_v45, %v1314_v40  ;;  %v1317_v47 = vsel %vm1315_vm2, %v1314_v40, %v1312_v45  ;;  %1807 = vrot.lane.b32.xlu1 %v2703_v35, %s2535_s28  ;;  %vm3993_vm2 = vnez %v3934_v46 }
 0x1c7   : > { %v1324_v19 = vmul.f32 %v1322_v39, %v1316_v59  ;;  %v1325_v49 = vmul.f32 %v1322_v39, %v1317_v47  ;;  %vm1381_vm5 = vmand %vm295_vm11, %vm3993_vm2 }
 0x1c8   : > { %v1389_v9 = vsel %vm1381_vm5, 1, %v2440_v0 }
 0x1c9   : > { %v1338_v61 = vsel %vm3331_vm0, %v1324_v19, 0.0  ;;  %v1339_v55 = vsel %vm1337_vm15, %v1325_v49, 0.0  ;;  %v1343_v57 = vpop.permute.xlu1 %1342  ;;  %v1397_v10 = vrot.slane %v1389_v9, %v2759_v63  ;;  %vm1377_vm15 = vcmp.lt.s32.totalorder %v2765_v4, 111  ;;  %v1446_v49 = vpop.permute.xlu0 %1445 }
 0x1ca   : > { %v1340_v60 = vadd.f32 %v1338_v61, %v1309_v43  ;;  %v1341_v52 = vadd.f32 %v1339_v55, %v1310_v44  ;;  %1809 = vrot.lane.b32.xlu1 %v2709_v38, %s2535_s28 }
 0x1cb   : > { %vm1399_vm5 = vcmp.eq.s32.totalorder %v1397_v10, 1 }
 0x1cd   : > { %v1345_v21 = vpop.permute.xlu1 %1344  ;;  %v1477_v9 = vpop.permute.xlu0 %1476 }
 0x1ce   : > { %v1347_v2 = vsel %vm1346_vm8, %v1343_v57, %v1345_v21  ;;  %v1348_v62 = vsel %vm1346_vm8, %v1345_v21, %v1343_v57  ;;  %1838 = vrot.lane.b32.xlu1 %v2703_v35, %s2536_s29  ;;  %vm3994_vm8 = vnez %v3942_v5 }
 0x1cf   : > { %v1355_v6 = vmul.f32 %v1353_v58, %v1347_v2  ;;  %v1356_v7 = vmul.f32 %v1353_v58, %v1348_v62  ;;  %vm1412_vm2 = vmand %vm295_vm11, %vm3994_vm8 }
 0x1d0   : > { %v1420_v27 = vsel %vm1412_vm2, 1, %v2440_v0 }
 0x1d1   : > { %v1369_v12 = vsel %vm3346_vm10, %v1355_v6, 0.0  ;;  %v1370_v42 = vsel %vm1368_vm12, %v1356_v7, 0.0  ;;  %v1374_v31 = vpop.permute.xlu1 %1373  ;;  %v1428_v36 = vrot.slane %v1420_v27, %v2759_v63  ;;  %vm1408_vm12 = vcmp.lt.s32.totalorder %v2765_v4, 110  ;;  %v1508_v27 = vpop.permute.xlu0 %1507 }
 0x1d2   : > { %v1371_v14 = vadd.f32 %v1369_v12, %v1340_v60  ;;  %v1372_v15 = vadd.f32 %v1370_v42, %v1341_v52  ;;  %1840 = vrot.lane.b32.xlu1 %v2709_v38, %s2536_s29 }
 0x1d3   : > { %vm1430_vm2 = vcmp.eq.s32.totalorder %v1428_v36, 1 }
 0x1d5   : > { %v1376_v35 = vpop.permute.xlu1 %1375 }
 0x1d6   : > { %v1378_v17 = vsel %vm1377_vm15, %v1374_v31, %v1376_v35  ;;  %v1379_v54 = vsel %vm1377_vm15, %v1376_v35, %v1374_v31  ;;  %1871 = vrot.lane.b32.xlu1 %v2709_v38, %s2522_s30  ;;  %vm3995_vm15 = vnez %v3953_v34  ;;  %s2058_s30 = sshll.u32 %s2579_s16, 7  ;;  %s2537_s16 = smov [#allocation8]  }
 0x1d7   : > { %v1386_v25 = vmul.f32 %v1384_v16, %v1378_v17  ;;  %v1387_v20 = vmul.f32 %v1384_v16, %v1379_v54  ;;  %vm1443_vm10 = vmand %vm295_vm11, %vm3995_vm15  ;;  %vm1439_vm11 = vcmp.lt.s32.totalorder %v2765_v4, 109  ;;  %s1946_s11 = scalar_lea.hbm %s3842_s3, %s2058_s30  ;;  %s2367_s21 = sshll.u32 %s2537_s16, 4  ;;  %s2368_s21 = int_to_ptr.vmem [resolvable:$false] %s2367_s21 }
 0x1d8   : > { %v1451_v58 = vsel %vm1443_vm10, 1, %v2440_v0  ;;  %s2369_s22 = scalar_lea.vmem %s2368_s21, 256  ;;  %p2370_p8 = scmp.lt.s32.totalorder %s1949_s5, %s2368_s21 }
 0x1d9   : > { %v1400_v53 = vsel %vm3366_vm9, %v1386_v25, 0.0  ;;  %v1401_v28 = vsel %vm1399_vm5, %v1387_v20, 0.0  ;;  %v1405_v33 = vpop.permute.xlu1 %1404  ;;  %vm299_vm5 = vcmp.lt.s32.totalorder %v3378_v32, 224  ;;  %v1459_v19 = vrot.slane %v1451_v58, %v2759_v63  ;;  %v1539_v58 = vpop.permute.xlu0 %1538  ;;  %p2371_p12 = scmp.lt.s32.totalorder %s2369_s22, %s2363_s10 }
 0x1da   : > { %v1402_v8 = vadd.f32 %v1400_v53, %v1371_v14  ;;  %v1403_v13 = vadd.f32 %v1401_v28, %v1372_v15 }
 0x1db   : > { %vm1461_vm10 = vcmp.eq.s32.totalorder %v1459_v19, 1  ;;  %p2372_p3 = por %p2371_p12, %p2370_p8 }
 0x1dd   : > { %v1407_v38 = vpop.permute.xlu1 %1406  ;;  %p2373_p7 = pnand %p2372_p3, %p2366_p6 }
 0x1de   : > { %v1409_v39 = vsel %vm1408_vm12, %v1405_v33, %v1407_v38  ;;  %v1410_v43 = vsel %vm1408_vm12, %v1407_v38, %v1405_v33  ;;  %vm1474_vm12 = vmand %vm299_vm5, %vm3987_vm3 }
 0x1df   : > { %v1417_v44 = vmul.f32 %v1415_v37, %v1409_v39  ;;  %v1418_v30 = vmul.f32 %v1415_v37, %v1410_v43  ;;  %v1482_v52 = vsel %vm1474_vm12, 1, %v2440_v0 }
 0x1e0   : > { %v1490_v7 = vrot.slane %v1482_v52, %v2759_v63 }
 0x1e1   : > { %v1431_v18 = vsel %vm3380_vm6, %v1417_v44, 0.0  ;;  %v1432_v45 = vsel %vm1430_vm2, %v1418_v30, 0.0  ;;  %v1436_v40 = vpop.permute.xlu1 %1435  ;;  %vm1470_vm2 = vcmp.lt.s32.totalorder %v2765_v4, 99 }
 0x1e2   : > { %v1433_v59 = vadd.f32 %v1431_v18, %v1402_v8  ;;  %v1434_v47 = vadd.f32 %v1432_v45, %v1403_v13  ;;  %vm1492_vm12 = vcmp.eq.s32.totalorder %v1490_v7, 1 }
 0x1e5   : > { %v1438_v50 = vpop.permute.xlu1 %1437 }
 0x1e6   : > { %v1440_v61 = vsel %vm1439_vm11, %v1436_v40, %v1438_v50  ;;  %v1441_v55 = vsel %vm1439_vm11, %v1438_v50, %v1436_v40  ;;  %vm1505_vm11 = vmand %vm299_vm5, %vm3990_vm14 }
 0x1e7   : > { %v1448_v57 = vmul.f32 %v1446_v49, %v1440_v61  ;;  %v1449_v60 = vmul.f32 %v1446_v49, %v1441_v55  ;;  %v1513_v10 = vsel %vm1505_vm11, 1, %v2440_v0 }
 0x1e8   : > { %v1521_v20 = vrot.slane %v1513_v10, %v2759_v63 }
 0x1e9   : > { %v1462_v1 = vsel %vm3400_vm1, %v1448_v57, 0.0  ;;  %v1463_v21 = vsel %vm1461_vm10, %v1449_v60, 0.0  ;;  %v1467_v2 = vpop.permute.xlu1 %1466  ;;  %vm1501_vm10 = vcmp.lt.s32.totalorder %v2765_v4, 98 }
 0x1ea   : > { %v1464_v62 = vadd.f32 %v1462_v1, %v1433_v59  ;;  %v1465_v6 = vadd.f32 %v1463_v21, %v1434_v47  ;;  %vm1523_vm11 = vcmp.eq.s32.totalorder %v1521_v20, 1 }
 0x1ed   : > { %v1469_v12 = vpop.permute.xlu1 %1468 }
 0x1ee   : > { %v1471_v42 = vsel %vm1470_vm2, %v1467_v2, %v1469_v12  ;;  %v1472_v31 = vsel %vm1470_vm2, %v1469_v12, %v1467_v2  ;;  %vm1536_vm2 = vmand %vm299_vm5, %vm3991_vm7 }
 0x1ef   : > { %v1479_v14 = vmul.f32 %v1477_v9, %v1471_v42  ;;  %v1480_v15 = vmul.f32 %v1477_v9, %v1472_v31  ;;  %v1544_v36 = vsel %vm1536_vm2, 1, %v2440_v0  ;;  %vm3996_vm2 = vnez %v3911_v56 }
 0x1f0   : > { %v1552_v30 = vrot.slane %v1544_v36, %v2759_v63 }
 0x1f1   : > { %v1493_v16 = vsel %vm3308_vm13, %v1479_v14, 0.0  ;;  %v1494_v35 = vsel %vm1492_vm12, %v1480_v15, 0.0  ;;  %v1498_v17 = vpop.permute.xlu1 %1497  ;;  %vm1532_vm12 = vcmp.lt.s32.totalorder %v2765_v4, 97  ;;  %vm1660_vm13 = vmand %vm299_vm5, %vm3995_vm15 }
 0x1f2   : > { %v1495_v54 = vadd.f32 %v1493_v16, %v1464_v62  ;;  %v1496_v25 = vadd.f32 %v1494_v35, %v1465_v6  ;;  %v1570_v62 = vpop.permute.xlu0 %1569 }
 0x1f5   : > { %v1500_v53 = vpop.permute.xlu1 %1499 }
 0x1f6   : > { %v1502_v28 = vsel %vm1501_vm10, %v1498_v17, %v1500_v53  ;;  %v1503_v33 = vsel %vm1501_vm10, %v1500_v53, %v1498_v17  ;;  %vm1554_vm10 = vcmp.eq.s32.totalorder %v1552_v30, 1  ;;  %v1601_v7 = vpop.permute.xlu0 %1600  ;;  %v1668_v53 = vsel %vm1660_vm13, 1, %v2440_v0 }
 0x1f7   : > { %v1510_v8 = vmul.f32 %v1508_v27, %v1502_v28  ;;  %v1511_v13 = vmul.f32 %v1508_v27, %v1503_v33 }
 0x1f9   : > { %v1524_v37 = vsel %vm3317_vm4, %v1510_v8, 0.0  ;;  %v1525_v38 = vsel %vm1523_vm11, %v1511_v13, 0.0  ;;  %v1529_v39 = vpop.permute.xlu1 %1528  ;;  %vm1567_vm11 = vmand %vm299_vm5, %vm3996_vm2  ;;  %vm3882_vm4 = vcmp.lt.s32.totalorder %v3378_v32, 208  ;;  %v1676_v13 = vrot.slane %v1668_v53, %v2759_v63 }
 0x1fa   : > { %v1526_v43 = vadd.f32 %v1524_v37, %v1495_v54  ;;  %v1527_v44 = vadd.f32 %v1525_v38, %v1496_v25  ;;  %v3520_v12 = vpop.permute.xlu0 %1631  ;;  %v1575_v35 = vsel %vm1567_vm11, 1, %v2440_v0  ;;  %vm1691_vm1 = vmand %vm3882_vm4, %vm3987_vm3 }
 0x1fb   : > { %v1583_v20 = vrot.slane %v1575_v35, %v2759_v63  ;;  %v1699_v33 = vsel %vm1691_vm1, 1, %v2440_v0  ;;  %vm1753_vm13 = vmand %vm3882_vm4, %vm3991_vm7  ;;  %vm1625_vm1 = vcmp.lt.s32.totalorder %v2765_v4, 94 }
 0x1fc   : > { %v1707_v26 = vrot.slane %v1699_v33, %v2759_v63  ;;  %vm3597_vm7 = vmand %vm3882_vm4, %vm3996_vm2 }
 0x1fd   : > { %v1531_v18 = vpop.permute.xlu1 %1530  ;;  %vm3579_vm3 = vcmp.eq.s32.totalorder %v1583_v20, 1 }
 0x1fe   : > { %v1533_v45 = vsel %vm1532_vm12, %v1529_v39, %v1531_v18  ;;  %v1534_v40 = vsel %vm1532_vm12, %v1531_v18, %v1529_v39  ;;  %v3524_v31 = vpop.permute.xlu0 %1662  ;;  %vm3997_vm12 = vnez %v3934_v46 }
 0x1ff   : > { %v1541_v59 = vmul.f32 %v1539_v58, %v1533_v45  ;;  %v1542_v47 = vmul.f32 %v1539_v58, %v1534_v40  ;;  %v1761_v58 = vsel %vm1753_vm13, 1, %v2440_v0  ;;  %vm3614_vm2 = vmand %vm3882_vm4, %vm3997_vm12  ;;  %vm1718_vm13 = vcmp.lt.s32.totalorder %v2765_v4, 82 }
 0x201   : > { %v1555_v19 = vsel %vm3331_vm0, %v1541_v59, 0.0  ;;  %v1556_v49 = vsel %vm1554_vm10, %v1542_v47, 0.0  ;;  %v1560_v50 = vpop.permute.xlu1 %1559  ;;  %vm1598_vm10 = vmand %vm299_vm5, %vm3997_vm12 }
 0x202   : > { %v3508_v61 = vadd.f32 %v1555_v19, %v1526_v43  ;;  %v3510_v55 = vadd.f32 %v1556_v49, %v1527_v44  ;;  %v3528_v15 = vpop.permute.xlu0 %1693  ;;  %vm1629_vm0 = vmand %vm299_vm5, %vm3994_vm8  ;;  %v1606_v17 = vsel %vm1598_vm10, 1, %v2440_v0  ;;  %v1792_v49 = vsel %vm3597_vm7, 1, %v2440_v0 }
 0x203   : > { %v1637_v25 = vsel %vm1629_vm0, 1, %v2440_v0  ;;  %v1614_v27 = vrot.slane %v1606_v17, %v2759_v63  ;;  %vm1722_vm5 = vmand %vm3882_vm4, %vm3990_vm14  ;;  %vm1563_vm0 = vcmp.lt.s32.totalorder %v2765_v4, 96  ;;  %vm1594_vm14 = vcmp.lt.s32.totalorder %v2765_v4, 95 }
 0x204   : > { %v1645_v23 = vrot.slane %v1637_v25, %v2759_v63  ;;  %v1730_v37 = vsel %vm1722_vm5, 1, %v2440_v0  ;;  %vm3622_vm5 = vcmp.eq.s32.totalorder %v1676_v13, 1  ;;  %vm1846_vm12 = vmand %vm3882_vm4, %vm3994_vm8  ;;  %vm1780_vm8 = vcmp.lt.s32.totalorder %v2765_v4, 80 }
 0x205   : > { %v1562_v57 = vpop.permute.xlu1 %1561  ;;  %vm3584_vm11 = vcmp.eq.s32.totalorder %v1614_v27, 1  ;;  %v1738_v46 = vrot.slane %v1730_v37, %v2759_v63  ;;  %v3653_v25 = vsel %vm3614_vm2, 1, %v2440_v0  ;;  %v1800_v27 = vrot.slane %v1792_v49, %v2759_v63 }
 0x206   : > { %v3545_v16 = vpop.permute.xlu0 %1724  ;;  %v1564_v39 = vsel %vm1563_vm0, %v1560_v50, %v1562_v57  ;;  %v1565_v43 = vsel %vm1563_vm0, %v1562_v57, %v1560_v50  ;;  %vm3601_vm10 = vcmp.eq.s32.totalorder %v1645_v23, 1  ;;  %vm1749_vm0 = vcmp.lt.s32.totalorder %v2765_v4, 81 }
 0x207   : > { %v1572_v47 = vmul.f32 %v1570_v62, %v1564_v39  ;;  %v1573_v19 = vmul.f32 %v1570_v62, %v1565_v43  ;;  %vm3666_vm4 = vcmp.eq.s32.totalorder %v1738_v46, 1  ;;  %v1831_v24 = vrot.slane %v3653_v25, %v2759_v63 }
 0x209   : > { %v1591_v60 = vpop.permute.xlu1 %1590  ;;  %v1587_v23 = vsel %vm3579_vm3, %v1573_v19, 0.0  ;;  %vm3710_vm3 = vcmp.eq.s32.totalorder %v1800_v27, 1 }
 0x20a   : > { %v3563_v28 = vpop.permute.xlu0 %1755 }
 0x20d   : > { %v1593_v52 = vpop.permute.xlu1 %1592 }
 0x20e   : > { %v3589_v38 = vpop.permute.xlu0 %1786  ;;  %v1595_v45 = vsel %vm1594_vm14, %v1591_v60, %v1593_v52  ;;  %v1596_v40 = vsel %vm1594_vm14, %v1593_v52, %v1591_v60  ;;  %vm3642_vm14 = vcmp.eq.s32.totalorder %v1707_v26, 1  ;;  %v1769_v60 = vrot.slane %v1761_v58, %v2759_v63 }
 0x20f   : > { %v1603_v52 = vmul.f32 %v1601_v7, %v1595_v45  ;;  %v1604_v62 = vmul.f32 %v1601_v7, %v1596_v40  ;;  %v1589_v58 = vadd.f32 %v1587_v23, %v3510_v55 }
 0x210   : > { %vm3686_vm2 = vcmp.eq.s32.totalorder %v1769_v60, 1 }
 0x211   : > { %v3512_v1 = vpop.permute.xlu1 %1621  ;;  %v1617_v39 = vsel %vm3366_vm9, %v1603_v52, 0.0  ;;  %v1618_v43 = vsel %vm3584_vm11, %v1604_v62, 0.0  ;;  %vm4023_vm11 = vnez %v3989_v51 }
 0x212   : > { %v3648_v17 = vpop.permute.xlu0 %1817  ;;  %v1620_v19 = vadd.f32 %v1618_v43, %v1589_v58 }
 0x215   : > { %v1624_v21 = vpop.permute.xlu1 %1623 }
 0x216   : > { %v1626_v50 = vsel %vm1625_vm1, %v3512_v1, %v1624_v21  ;;  %v1627_v57 = vsel %vm1625_vm1, %v1624_v21, %v3512_v1  ;;  %v3656_v1 = vsel %vm1846_vm12, 1, %v2440_v0  ;;  %vm4012_vm1 = vcmp.lt.s32.totalorder %v2765_v4, 93  ;;  %v1849_v46 = vpop.permute.xlu0 %1848 }
 0x217   : > { %vm4013_vm7 = vmmov %vm4012_vm1  ;;  %vm4016_vm12 = vnez %v3980_v48  ;;  %v1634_v33 = vmul.f32 %v3520_v12, %v1626_v50  ;;  %v1635_v13 = vmul.f32 %v3520_v12, %v1627_v57  ;;  %v1862_v12 = vrot.slane %v3656_v1, %v2759_v63 }
 0x218   : > { %v1586_v53 = vsel %vm4016_vm12, %v1572_v47, 0.0 }
 0x219   : > { %v3514_v2 = vpop.permute.xlu1 %1652  ;;  %v1588_v44 = vadd.f32 %v1586_v53, %v3508_v61  ;;  %v1649_v61 = vsel %vm3601_vm10, %v1635_v13, 0.0  ;;  %vm4024_vm10 = vnez %v3973_v3 }
 0x21a   : > { %v1651_v52 = vadd.f32 %v1649_v61, %v1620_v19 }
 0x21b   : > { %v1619_v47 = vadd.f32 %v1617_v39, %v1588_v44 }
 0x21d   : > { %v3516_v6 = vpop.permute.xlu1 %1654 }
 0x21e   : > { %v1657_v21 = vsel %vm4012_vm1, %v3514_v2, %v3516_v6  ;;  %v1658_v7 = vsel %vm4013_vm7, %v3516_v6, %v3514_v2  ;;  %vm4017_vm1 = vcmp.lt.s32.totalorder %v2765_v4, 83 }
 0x21f   : > { %vm4018_vm7 = vmmov %vm4017_vm1  ;;  %v1665_v26 = vmul.f32 %v3524_v31, %v1657_v21 }
 0x221   : > { %v3518_v9 = vpop.permute.xlu1 %1683  ;;  %v1679_v30 = vsel %vm4023_vm11, %v1665_v26, 0.0 }
 0x225   : > { %v3522_v42 = vpop.permute.xlu1 %1685 }
 0x226   : > { %v1688_v2 = vsel %vm4017_vm1, %v3518_v9, %v3522_v42  ;;  %v1689_v6 = vsel %vm4018_vm7, %v3522_v42, %v3518_v9  ;;  %v1666_v9 = vmul.f32 %v3524_v31, %v1658_v7  ;;  %v1648_v31 = vsel %vm3380_vm6, %v1634_v33, 0.0  ;;  %v1880_v7 = vpop.permute.xlu0 %1879 }
 0x227   : > { %v1696_v55 = vmul.f32 %v3528_v15, %v1688_v2  ;;  %v1697_v40 = vmul.f32 %v3528_v15, %v1689_v6  ;;  %v1650_v60 = vadd.f32 %v1648_v31, %v1619_v47  ;;  %vm4028_vm1 = vnez %v3975_v29 }
 0x228   : > { %v1680_v49 = vsel %vm3622_vm5, %v1666_v9, 0.0  ;;  %vm4025_vm5 = vcmp.lt.s32.totalorder %v3378_v32, 208  ;;  %vm3772_vm7 = vcmp.eq.s32.totalorder %v1862_v12, 1 }
 0x229   : > { %v3526_v14 = vpop.permute.xlu1 %1714  ;;  %v1711_v59 = vsel %vm3642_vm14, %v1697_v40, 0.0  ;;  %v1681_v1 = vadd.f32 %v1679_v30, %v1650_v60  ;;  %v1682_v21 = vadd.f32 %v1680_v49, %v1651_v52  ;;  %vm4029_vm14 = vnez %v3977_v41 }
 0x22a   : > { %v1870_v58 = vpop.permute.xlu0 %1869 }
 0x22b   : > { %v1713_v53 = vadd.f32 %v1711_v59, %v1682_v21 }
 0x22d   : > { %v3538_v10 = vpop.permute.xlu1 %1716 }
 0x22e   : > { %v1719_v56 = vsel %vm1718_vm13, %v3526_v14, %v3538_v10  ;;  %v1720_v36 = vsel %vm1718_vm13, %v3538_v10, %v3526_v14  ;;  %vm4026_vm13 = vcmp.lt.s32.totalorder %v2765_v4, 79 }
 0x22f   : > { %v1727_v15 = vmul.f32 %v3545_v16, %v1719_v56  ;;  %v1728_v50 = vmul.f32 %v3545_v16, %v1720_v36 }
 0x231   : > { %v3553_v54 = vpop.permute.xlu1 %1745  ;;  %v1741_v5 = vsel %vm4028_vm1, %v1727_v15, 0.0 }
 0x235   : > { %v3572_v8 = vpop.permute.xlu1 %1747 }
 0x236   : > { %v1750_v14 = vsel %vm1749_vm0, %v3553_v54, %v3572_v8  ;;  %v1751_v10 = vsel %vm1749_vm0, %v3572_v8, %v3553_v54  ;;  %v1710_v8 = vsel %vm4024_vm10, %v1696_v55, 0.0  ;;  %vm1877_vm0 = vmand %vm4025_vm5, %vm3995_vm15  ;;  %vm1842_vm15 = vcmp.lt.s32.totalorder %v2765_v4, 78 }
 0x237   : > { %v1758_v25 = vmul.f32 %v3563_v28, %v1750_v14  ;;  %v1759_v16 = vmul.f32 %v3563_v28, %v1751_v10  ;;  %v1712_v27 = vadd.f32 %v1710_v8, %v1681_v1  ;;  %v1885_v23 = vsel %vm1877_vm0, 1, %v2440_v0 }
 0x239   : > { %v3608_v18 = vpop.permute.xlu1 %1776  ;;  %v1772_v33 = vsel %vm4029_vm14, %v1758_v25, 0.0  ;;  %v1773_v29 = vsel %vm3686_vm2, %v1759_v16, 0.0  ;;  %v1743_v2 = vadd.f32 %v1741_v5, %v1712_v27  ;;  %vm1873_vm2 = vcmp.lt.s32.totalorder %v2765_v4, 77  ;;  %v2282_v27 = vld [vmem:[%s187_s27] sm:$0xff] }
 0x23b   : > { %v1774_v43 = vadd.f32 %v1772_v33, %v1743_v2 }
 0x23d   : > { %v1779_v35 = vpop.permute.xlu1 %1778 }
 0x23e   : > { %v1781_v62 = vsel %vm1780_vm8, %v3608_v18, %v1779_v35  ;;  %v1782_v54 = vsel %vm1780_vm8, %v1779_v35, %v3608_v18  ;;  %vm4027_vm8 = vmmov %vm4026_vm13  ;;  %v1742_v35 = vsel %vm3666_vm4, %v1728_v50, 0.0  ;;  %vm3768_vm4 = vcmp.eq.s32.totalorder %v1831_v24, 1 }
 0x23f   : > { %v1789_v28 = vmul.f32 %v3589_v38, %v1781_v62  ;;  %v1790_v34 = vmul.f32 %v3589_v38, %v1782_v54  ;;  %v1744_v38 = vadd.f32 %v1742_v35, %v1713_v53 }
 0x241   : > { %v1808_v42 = vpop.permute.xlu1 %1807  ;;  %v1803_v0 = vsel %vm4016_vm12, %v1789_v28, 0.0  ;;  %v1804_v41 = vsel %vm3710_vm3, %v1790_v34, 0.0  ;;  %v1775_v24 = vadd.f32 %v1773_v29, %v1744_v38 }
 0x242   : > { %v1805_v56 = vadd.f32 %v1803_v0, %v1774_v43 }
 0x243   : > { %v1806_v36 = vadd.f32 %v1804_v41, %v1775_v24 }
 0x245   : > { %v1810_v57 = vpop.permute.xlu1 %1809 }
 0x246   : > { %v1812_v18 = vsel %vm4026_vm13, %v1808_v42, %v1810_v57  ;;  %v1813_v3 = vsel %vm4027_vm8, %v1810_v57, %v1808_v42 }
 0x247   : > { %v1820_v20 = vmul.f32 %v3648_v17, %v1812_v18  ;;  %v1821_v13 = vmul.f32 %v3648_v17, %v1813_v3  ;;  %v1893_v17 = vrot.slane %v1885_v23, %v2759_v63 }
 0x249   : > { %v1839_v32 = vpop.permute.xlu1 %1838  ;;  %v1834_v48 = vsel %vm3366_vm9, %v1820_v20, 0.0  ;;  %v1835_v9 = vsel %vm3768_vm4, %v1821_v13, 0.0  ;;  %vm1895_vm12 = vcmp.eq.s32.totalorder %v1893_v17, 1  ;;  %vm1900_vm9 = vcmask 1041408  }
 0x24a   : > { %v1836_v61 = vadd.f32 %v1834_v48, %v1805_v56  ;;  %v1837_v55 = vadd.f32 %v1835_v9, %v1806_v36 }
 0x24d   : > { %v1841_v37 = vpop.permute.xlu1 %1840 }
 0x24e   : > { %v1843_v26 = vsel %vm1842_vm15, %v1839_v32, %v1841_v37  ;;  %v1844_v12 = vsel %vm1842_vm15, %v1841_v37, %v1839_v32 }
 0x24f   : > { %v1851_v42 = vmul.f32 %v1849_v46, %v1843_v26  ;;  %v1852_v44 = vmul.f32 %v1849_v46, %v1844_v12 }
 0x251   : > { %v1865_v63 = vsel %vm3380_vm6, %v1851_v42, 0.0  ;;  %v1866_v45 = vsel %vm3772_vm7, %v1852_v44, 0.0  ;;  %v1872_v31 = vpop.permute.xlu1 %1871 }
 0x252   : > { %v1874_v22 = vsel %vm1873_vm2, %v1870_v58, %v1872_v31  ;;  %v1875_v40 = vsel %vm1873_vm2, %v1872_v31, %v1870_v58  ;;  %v1867_v19 = vadd.f32 %v1865_v63, %v1836_v61  ;;  %v1868_v14 = vadd.f32 %v1866_v45, %v1837_v55 }
 0x253   : > { %v1882_v46 = vmul.f32 %v1880_v7, %v1874_v22  ;;  %v1883_v47 = vmul.f32 %v1880_v7, %v1875_v40 }
 0x255   : > { %v1896_v11 = vsel %vm4023_vm11, %v1882_v46, 0.0  ;;  %v1897_v10 = vsel %vm1895_vm12, %v1883_v47, 0.0 }
 0x256   : > { %v1898_v30 = vadd.f32 %v1896_v11, %v1867_v19  ;;  %v1899_v49 = vadd.f32 %v1897_v10, %v1868_v14 }
 0x258   : > { %v1901_v15 = vsel %vm1900_vm9, %v1898_v30, 0.0  ;;  %v1908_v50 = vsel %vm1900_vm9, %v1899_v49, 0.0 }
 0x259   : > { %v1902_v57 = vrot.slane %v1901_v15, 4  ;;  %v1909_v60 = vrot.slane %v1908_v50, 4 }
 0x25b   : > { %v1903_v52 = vadd.f32 %v1902_v57, %v1901_v15  ;;  %v1910_v62 = vadd.f32 %v1909_v60, %v1908_v50 }
 0x25d   : > { %v1904_v54 = vrot.slane %v1903_v52, 2  ;;  %v1911_v4 = vrot.slane %v1910_v62, 2 }
 0x25f   : > { %v1905_v8 = vadd.f32 %v1904_v54, %v1903_v52  ;;  %v1912_v59 = vadd.f32 %v1911_v4, %v1910_v62 }
 0x261   : > { %v1906_v25 = vrot.slane %v1905_v8, 1  ;;  %v1913_v16 = vrot.slane %v1912_v59, 1 }
 0x263   : > { %v1907_v1 = vadd.f32 %v1906_v25, %v1905_v8  ;;  %v1914_v51 = vadd.f32 %v1913_v16, %v1912_v59 }
 0x265   : > { %v2050_v21 = vmul.f32 -1.442695, %v1907_v1  ;;  %v2051_v18 = vmul.f32 -1.442695, %v1914_v51 }
 0x267   : > { %2273 = vpow2.f32 %v2050_v21 }
 0x268   : > { %2275 = vpow2.f32 %v2051_v18 }
 0x274   : > { %v2274_v3 = vpop.eup %2273 }
 0x275   : > { %v2276_v5 = vpop.eup %2275  ;;  %v1921_v35 = vadd.f32 1.0, %v2274_v3 }
 0x276   : > { %v1922_v28 = vadd.f32 1.0, %v2276_v5 }
 0x277   : > { %2277 = vrcp.f32 %v1921_v35 }
 0x278   : > { %2279 = vrcp.f32 %v1922_v28 }
 0x284   : > { %v2278_v34 = vpop.eup %2277 }
 0x285   : > { %v2280_v32 = vpop.eup %2279 }
 0x286   : > { %v1929_v7 = vcombine.low %v2278_v34, %v2280_v32 }
 0x288   : > { %v1931_v53 = vmul.f32 %v2282_v27, %v1929_v7 }
 0x28a   : > { %1932 = vst [vmem:[%s209_s4] sm:$0xff] %v1931_v53 }
 0x28b   : > { %2376 = shalt.err (!%p2373_p7)
}
 0x28c   : > { %s2377_s20 = scalar_lea.hbm %s1946_s11, 128  ;;  %s2381_s23 = scalar_lea.hbm %s3842_s3, 256 }
 0x28d   : > { %p2378_p10 = scmp.ne.s32.totalorder %s1946_s11, %s2377_s20  ;;  %p2382_p0 = scmp.lt.s32.totalorder %s1946_s11, %s3842_s3 }
 0x28e   : > { %p2383_p1 = scmp.lt.s32.totalorder %s2381_s23, %s2377_s20 }
 0x28f   : > { %p2379_p13 = pnand %p2378_p10, %p4034_p2 }
 0x290   : > { %p2384_p9 = por %p2383_p1, %p2382_p0 }
 0x291   : > { %p2380_p5 = pneg %p2379_p13 }
 0x293   : > { %p2385_p11 = pnand %p2384_p9, %p2380_p5 }
 0x295   : > { %2388 = shalt.err (!%p2385_p11)
}
 0x296   : > { %2069 = dma.vmem_to_hbm [thread:$0]  (%p4034_p2), %s1949_s5, 128, %s1946_s11, %s1934_s17  }
 0x297 PF: > { %s1960_s28 = sand.u32 1, %s2423_s12   ;;  %p4035_p4 = scmp.ne.s32.totalorder %s3884_s19, 0 }
 0x298   : > { %p4036_p6 = scmp.ge.s32.totalorder %s2435_s15, 2  ;;  %s1961_s29 = scalar_lea.sflag [#allocation4], %s1960_s28 }
 0x29a   : > { %p2083_p8 = pnand %p4036_p6, %p4035_p4 }
 0x29c   : > { %p2084_p12 = pneg %p2083_p8 }
 0x29e   : > { %2418 = dma.done.wait (%p2084_p12), %s1961_s29, 128  }
 0x29f   : > { %2420 = vsyncadd (%p2084_p12), %s1961_s29, 4294967168  ;;  %p15_p3 = scmp.ge.s32.totalorder %s2612_s26, 4   ;;  %s4037_s12 = smov %s2427_s13 }
 0x2a0   : > { %s4038_s13 = smov %s2431_s14  ;;  %s4039_s14 = smov %s2639_s8 }
 0x2a1   : > { %s4040_s15 = smov %s2612_s26  ;;  %17 = sbr.rel (!%p15_p3) target bundleno = 5 (0x5), region = 84 }
 0x2a6   :  { %1966 = vsyncpa [#allocation3], 1 }
 0x2a7   :  { %1968 = vsyncpa [#allocation3 + $0x1], 1 }
 0x2a8   :  { %1969 = vsyncpa [#allocation6], 1 }
 0x2a9   :  { %1970 = vsyncpa [#allocation4], 1 }
 0x2aa   :  { %1972 = vsyncpa [#allocation4 + $0x1], 1 }

</bundles_post_ra>
